<compile_context>
chip_gen: v7x
topology: tpu7x:2x2x1
jax: 0.10.0
libtpu: 0.0.40
codegen_flags: <defaults>
</compile_context>

<pallas_src>
import functools

import jax
import jax.numpy as jnp
from jax.experimental import pallas as pl
from jax.experimental.pallas import tpu as pltpu

VALUES_PER_ITEM = 4


def _round_up(n, m):
    return ((n + m - 1) // m) * m


def _pick_tile(dim, candidates, fallback):
    for c in candidates:
        if dim % c == 0:
            return c
    return fallback


def _device_kind():
    try:
        return jax.devices()[0].device_kind.lower()
    except Exception:
        return ""


def _default_mxu_dtype():
    # v5e / v6e MXUs have a native int8 path; v7x (and other gens) -> bf16.
    kind = _device_kind()
    if "v5" in kind or "v6" in kind:
        return jnp.int8
    return jnp.bfloat16


def _vmem_cap_bytes():
    # Per-generation scoped-VMEM cap (v7x has only 64 MiB physical VMEM).
    kind = _device_kind()
    if "v7" in kind:
        return 48 * 1024 * 1024
    if "v4" in kind or "v5" in kind or "v6" in kind:
        return 96 * 1024 * 1024
    return 48 * 1024 * 1024


# ----------------------- pass 1: per-token activation quant -----------------------
def _act_quant_kernel(x_ref, wscale_ref, xq_ref, inv_ref):
    # x_ref:   (tm, K)  activations in their native dtype (upcast here)
    # wscale:  (1, 1)   f32 in SMEM
    # xq_ref:  (tm, K)  int8 quantized activations (storage dtype, always int8)
    # inv_ref: (tm, 1)  f32 = 1 / (act_scale * weight_scale)
    x = x_ref[...].astype(jnp.float32)
    absmax = jnp.maximum(jnp.max(jnp.abs(x), axis=-1, keepdims=True), 1e-5)
    act_scale = 127.0 / absmax                                   # (tm, 1)
    xq = jnp.clip(jnp.round(x * act_scale), -128.0, 127.0)
    xq_ref[...] = xq.astype(xq_ref.dtype)
    # 1 / (act_scale * weight_scale) == absmax / (127 * weight_scale)
    inv_ref[...] = absmax / (127.0 * wscale_ref[0, 0])


# ----------------------- pass 2: tiled matmul over packed weight ------------------
def _bitlinear_matmul_kernel(xq_ref, wp_ref, inv_ref, *rest,
                             tk, tn, blocks_per_plane, weight_resident,
                             mxu_dtype, has_bias):
    if has_bias:
        bias_ref, o_ref, acc_ref = rest
    else:
        bias_ref = None
        o_ref, acc_ref = rest

    j = pl.program_id(1)
    k = pl.program_id(2)

    @pl.when(k == 0)
    def _():
        acc_ref[...] = jnp.zeros_like(acc_ref)

    # Current K window of the (tm, K)-resident int8 activations.
    k_off = pl.multiple_of(k * tk, tk)
    xq = xq_ref[:, pl.ds(k_off, tk)]
    if xq.dtype != mxu_dtype:
        xq = xq.astype(mxu_dtype)            # int8 storage -> bf16 MXU operand (v7x)

    # Packed 2-bit weight tile (tk, tn) for this K window / packed-column block.
    if weight_resident:
        j_off = pl.multiple_of((j % blocks_per_plane) * tn, tn)
        p = wp_ref[pl.ds(k_off, tk), pl.ds(j_off, tn)]
    else:
        p = wp_ref[...]

    # Output block j lies entirely inside bit-plane j // blocks_per_plane, so a
    # single shift/and/sub unpacks the whole tile.  The uint8 tile is widened
    # once (Mosaic-safe) and narrowed straight to the MXU dtype.
    shift = 2 * (j // blocks_per_plane)
    w = ((p.astype(jnp.int32) >> shift) & 3).astype(mxu_dtype) - 1   # ternary {-1,0,1}

    acc_ref[...] += jnp.dot(xq, w, preferred_element_type=acc_ref.dtype)

    @pl.when(k == pl.num_programs(2) - 1)
    def _():
        y = acc_ref[...].astype(jnp.float32) * inv_ref[...]      # (tm,tn) * (tm,1)
        if has_bias:
            y = y + bias_ref[...]
        o_ref[...] = y.astype(o_ref.dtype)


# --------------------------------- wrappers ---------------------------------------
def prepare_packed_weight(packed_weight_u8):
    """One-time weight prep (call at weight-load/init time, NOT per forward):
    transpose the packed (out//4, in) uint8 tensor to (in, out//4) so pass 2
    contracts over the leading dim without any per-call transpose."""
    return jnp.asarray(packed_weight_u8, jnp.uint8).T


def bitlinear_forward(x, packed_weight_t, weight_scale, bias=None,
                      *, tm=256, tn=None, tk=None, mxu_dtype=None):
    """x: (..., in_features); packed_weight_t: (in_features, out//4) uint8 as
    returned by prepare_packed_weight; weight_scale: scalar; bias: (out,) or None."""
    # TODO(synk): rms_norm path (use_rms_norm=True) not implemented; module default is False.
    if mxu_dtype is None:
        mxu_dtype = _default_mxu_dtype()

    in_features, p_rows = packed_weight_t.shape       # p_rows = out_features // 4
    out_features = p_rows * VALUES_PER_ITEM
    assert x.shape[-1] == in_features
    lead = x.shape[:-1]
    out_dtype = x.dtype

    x2d = x.reshape(-1, in_features)                  # keep native dtype; upcast in-kernel
    tokens = x2d.shape[0]

    # ---- tile sizes ----
    tm = min(tm, _round_up(tokens, 32))
    tm = _round_up(tm, 32)
    t_pad = _round_up(tokens, tm)
    if t_pad != tokens:
        x2d = jnp.pad(x2d, ((0, t_pad - tokens), (0, 0)))

    if tk is None:
        tk = _pick_tile(in_features, (512, 256, 128), in_features)
    if tn is None:
        tn = _pick_tile(p_rows, (512, 256, 128), p_rows)
    assert in_features % tk == 0
    assert p_rows % tn == 0
    assert tn % 128 == 0, (
        "this kernel requires out_features to be a multiple of 512 "
        "(out_features // 4 must be divisible by a 128-multiple tile)")
    blocks_per_plane = p_rows // tn

    cap = _vmem_cap_bytes()
    wscale_2d = jnp.asarray(weight_scale, jnp.float32).reshape(1, 1)

    # ---- pass 1: activation quantization (hoisted out of the matmul grid) ----
    xq, inv = pl.pallas_call(
        _act_quant_kernel,
        grid=(t_pad // tm,),
        in_specs=[
            pl.BlockSpec((tm, in_features), lambda i: (i, 0)),
            pl.BlockSpec(memory_space=pltpu.MemorySpace.SMEM),
        ],
        out_specs=[
            pl.BlockSpec((tm, in_features), lambda i: (i, 0)),
            pl.BlockSpec((tm, 1), lambda i: (i, 0)),
        ],
        out_shape=[
            jax.ShapeDtypeStruct((t_pad, in_features), jnp.int8),   # int8 storage always
            jax.ShapeDtypeStruct((t_pad, 1), jnp.float32),
        ],
        compiler_params=pltpu.CompilerParams(
            dimension_semantics=("parallel",),
            vmem_limit_bytes=cap,
        ),
    )(x2d, wscale_2d)

    # ---- pass 2: tiled matmul over the packed 2-bit weight ----
    wp = jnp.asarray(packed_weight_t, jnp.uint8)
    has_bias = bias is not None
    acc_dtype = jnp.int32 if jnp.issubdtype(mxu_dtype, jnp.integer) else jnp.float32

    # Decide whether the whole packed weight fits VMEM (with headroom for the
    # double-buffered xq block, output block, accumulator and temporaries).
    fixed_bytes = (2 * tm * in_features        # xq int8, double buffered
                   + 2 * tm * tn * 4           # output block, double buffered
                   + tm * tn * 4               # accumulator scratch
                   + 2 * tm * 128 * 4          # inv block (lane-padded)
                   + 2 * tn * 4                # bias block
                   + (4 << 20))                # compiler slack / relayout temps
    weight_resident = fixed_bytes + 2 * in_features * p_rows <= cap

    if weight_resident:
        # Whole packed (K, O//4) tensor lives in VMEM; slice the window in-kernel.
        wp_spec = pl.BlockSpec((in_features, p_rows), lambda i, j, k: (0, 0))
    else:
        # Streaming fallback for very large layers.
        # TODO(synk): a 4-plane-per-step variant would cut streamed weight DMA 4x.
        wp_spec = pl.BlockSpec((tk, tn), lambda i, j, k: (k, j % blocks_per_plane))

    kernel = functools.partial(
        _bitlinear_matmul_kernel,
        tk=tk, tn=tn, blocks_per_plane=blocks_per_plane,
        weight_resident=weight_resident, mxu_dtype=mxu_dtype, has_bias=has_bias)

    in_specs = [
        pl.BlockSpec((tm, in_features), lambda i, j, k: (i, 0)),   # xq resident over (j,k)
        wp_spec,                                                   # packed W^T
        pl.BlockSpec((tm, 1), lambda i, j, k: (i, 0)),             # inv scale
    ]
    args = [xq, wp, inv]
    if has_bias:
        in_specs.append(pl.BlockSpec((1, tn), lambda i, j, k: (0, j)))
        args.append(jnp.asarray(bias, jnp.float32).reshape(1, out_features))

    y2d = pl.pallas_call(
        kernel,
        grid=(t_pad // tm, out_features // tn, in_features // tk),
        in_specs=in_specs,
        out_specs=pl.BlockSpec((tm, tn), lambda i, j, k: (i, j)),
        out_shape=jax.ShapeDtypeStruct((t_pad, out_features), out_dtype),
        scratch_shapes=[pltpu.VMEM((tm, tn), acc_dtype)],
        compiler_params=pltpu.CompilerParams(
            dimension_semantics=("parallel", "parallel", "arbitrary"),
            vmem_limit_bytes=cap,
        ),
    )(*args)

    if t_pad != tokens:
        y2d = y2d[:tokens]
    return y2d.reshape(*lead, out_features)


# ---------------- pure-JAX reference (mirrors the PyTorch module) -----------------
def _reference_forward(x, packed_weight_u8, weight_scale, bias):
    p = packed_weight_u8.astype(jnp.int32)
    w = jnp.concatenate(
        [(((p >> (2 * i)) & 3) - 1).astype(jnp.float32) for i in range(VALUES_PER_ITEM)],
        axis=0,
    )
    absmax = jnp.max(jnp.abs(x), axis=-1, keepdims=True)
    act_scale = 127.0 / jnp.maximum(absmax, 1e-5)
    xq = jnp.clip(jnp.round(x * act_scale), -128.0, 127.0)
    y = jnp.einsum("...k,ok->...o", xq, w)
    y = y / (act_scale * weight_scale)
    if bias is not None:
        y = y + bias
    return y


if __name__ == "__main__":
    key = jax.random.PRNGKey(0)
    k_x, k_w, k_b = jax.random.split(key, 3)

    # Small but tile-friendly shapes: 256 tokens, K=1024 (2 K-steps), O=512
    # (4 bit-planes -> 4 output blocks) -> exercises the full tiled grid.
    batch, seq, in_features, out_features = 2, 128, 1024, 512
    P = out_features // VALUES_PER_ITEM

    x = jax.random.normal(k_x, (batch, seq, in_features), dtype=jnp.float32)

    # Build genuinely ternary weights and pack them the way the module does
    # (value + 1, 2 bits per value, rows [i*P,(i+1)*P) -> bit pair i).
    w_ternary = jax.random.randint(k_w, (out_features, in_features), -1, 2, dtype=jnp.int32)
    w_plus = (w_ternary + 1).astype(jnp.uint8)
    packed_weight = jnp.zeros((P, in_features), dtype=jnp.uint8)
    for i in range(VALUES_PER_ITEM):
        packed_weight = packed_weight | (w_plus[i * P:(i + 1) * P] << (2 * i))

    weight_scale = jnp.asarray(1.5, dtype=jnp.float32)
    bias = jax.random.normal(k_b, (out_features,), dtype=jnp.float32)

    # One-time weight prep (hoisted out of the per-call forward).
    packed_weight_t = prepare_packed_weight(packed_weight)

    y = bitlinear_forward(x, packed_weight_t, weight_scale, bias)
    jax.block_until_ready(y)

    y_ref = _reference_forward(x, packed_weight, weight_scale, bias)
    assert y.shape == (batch, seq, out_features)
    max_err = jnp.max(jnp.abs(y - y_ref))
    assert jnp.allclose(y, y_ref, atol=2e-4, rtol=2e-4), f"mismatch vs reference: {max_err}"

    print("KERNEL_OK")
</pallas_src>

<mosaic_0001>
module attributes {stable_mosaic.version = 11 : i64} {
  func.func @_act_quant_kernel(%arg0: i32, %arg1: memref<256x1024xf32, #tpu.memory_space<vmem>>, %arg2: memref<1x1xf32, #tpu.memory_space<smem>>, %arg3: memref<256x1024xi8, #tpu.memory_space<vmem>>, %arg4: memref<256x1xf32, #tpu.memory_space<vmem>>) attributes {dimension_semantics = [#tpu.dimension_semantics<parallel>], iteration_bounds = array<i64: 1>, scalar_prefetch = 0 : i64, scratch_operands = 0 : i64, tpu.core_type = #tpu.core_type<tc>, window_params = [{transform_indices = @transform_0, window_bounds = array<i64: 256, 1024>}, {transform_indices = @transform_1, window_bounds = array<i64: 1, 1>}, {transform_indices = @transform_2, window_bounds = array<i64: 256, 1024>}, {transform_indices = @transform_3, window_bounds = array<i64: 256, 1>}]} {
    %c0 = arith.constant 0 : index
    %c0_0 = arith.constant 0 : index
    %0 = vector.load %arg1[%c0, %c0_0] : memref<256x1024xf32, #tpu.memory_space<vmem>>, vector<256x1024xf32>
    %1 = math.absf %0 : vector<256x1024xf32>
    %cst = arith.constant dense<0xFF800000> : vector<256xf32>
    %2 = vector.multi_reduction <maximumf>, %1, %cst [1] : vector<256x1024xf32> to vector<256xf32>
    %3 = vector.shape_cast %2 : vector<256xf32> to vector<256x1xf32>
    %cst_1 = arith.constant 9.99999974E-6 : f32
    %4 = vector.broadcast %cst_1 : f32 to vector<256x1xf32>
    %5 = arith.maximumf %3, %4 : vector<256x1xf32>
    %cst_2 = arith.constant 1.270000e+02 : f32
    %6 = vector.broadcast %cst_2 : f32 to vector<256x1xf32>
    %7 = arith.divf %6, %5 : vector<256x1xf32>
    %8 = vector.broadcast %7 : vector<256x1xf32> to vector<256x1024xf32>
    %9 = arith.mulf %0, %8 : vector<256x1024xf32>
    %10 = math.roundeven %9 : vector<256x1024xf32>
    %cst_3 = arith.constant -1.280000e+02 : f32
    %cst_4 = arith.constant 1.270000e+02 : f32
    %11 = vector.broadcast %cst_3 : f32 to vector<256x1024xf32>
    %12 = arith.maximumf %11, %10 : vector<256x1024xf32>
    %13 = vector.broadcast %cst_4 : f32 to vector<256x1024xf32>
    %14 = arith.minimumf %13, %12 : vector<256x1024xf32>
    %15 = arith.fptosi %14 : vector<256x1024xf32> to vector<256x1024xi8>
    %c0_5 = arith.constant 0 : index
    %c0_6 = arith.constant 0 : index
    %16 = vector.load %arg3[%c0_5, %c0_6] : memref<256x1024xi8, #tpu.memory_space<vmem>>, vector<256x1024xi8>
    tpu.vector_store %arg3[%c0_5, %c0_6], %15 {strides = array<i32>} : memref<256x1024xi8, #tpu.memory_space<vmem>>, vector<256x1024xi8>,
    %c0_7 = arith.constant 0 : index
    %c0_8 = arith.constant 0 : index
    %17 = memref.load %arg2[%c0_7, %c0_8] : memref<1x1xf32, #tpu.memory_space<smem>>
    %cst_9 = arith.constant 1.270000e+02 : f32
    %18 = arith.mulf %cst_9, %17 : f32
    %19 = vector.broadcast %18 : f32 to vector<256x1xf32>
    %20 = arith.divf %5, %19 : vector<256x1xf32>
    %c0_10 = arith.constant 0 : index
    %c0_11 = arith.constant 0 : index
    %21 = vector.load %arg4[%c0_10, %c0_11] : memref<256x1xf32, #tpu.memory_space<vmem>>, vector<256x1xf32>
    tpu.vector_store %arg4[%c0_10, %c0_11], %20 {strides = array<i32>} : memref<256x1xf32, #tpu.memory_space<vmem>>, vector<256x1xf32>,
    return
  }
  func.func @transform_0(%arg0: i32) -> (i32, i32) {
    %c0_i32 = arith.constant 0 : i32
    %c0_i32_0 = arith.constant 0 : i32
    return %arg0, %c0_i32 : i32, i32
  }
  func.func @transform_1(%arg0: i32) -> (i32, i32) {
    %c0_i32 = arith.constant 0 : i32
    %c0_i32_0 = arith.constant 0 : i32
    %c0_i32_1 = arith.constant 0 : i32
    return %c0_i32, %c0_i32_0 : i32, i32
  }
  func.func @transform_2(%arg0: i32) -> (i32, i32) {
    %c0_i32 = arith.constant 0 : i32
    %c0_i32_0 = arith.constant 0 : i32
    return %arg0, %c0_i32 : i32, i32
  }
  func.func @transform_3(%arg0: i32) -> (i32, i32) {
    %c0_i32 = arith.constant 0 : i32
    %c0_i32_0 = arith.constant 0 : i32
    return %arg0, %c0_i32 : i32, i32
  }
}

</mosaic_0001>

<bundles_post_ra>
// kernel: tpu_custom_call.1
= control target key start
LH: loop header
LB: loop body
LE: loop exit
PB: predicated region body
PF: predicated region fallthrough
CT: control target
= control target key end

     0   :  { %10 = vsyncpa [#allocation4], 0  ;;  %s5105_s0 = inlined_call_operand.hbm [shape: f32[256,1024], index: 0, kind: input, shape index: {}]   ;;  %s5106_s1 = inlined_call_operand.<no memory space> [shape: f32[1,1], index: 1, kind: input, shape index: {}]   ;;  %s5107_s2 = inlined_call_operand.hbm [shape: s8[256,1024], index: 2, kind: output, shape index: {0}]   ;;  %s5108_s3 = inlined_call_operand.vmem [shape: f32[256,1], index: 3, kind: output, shape index: {1}]  }
   0x1   :  { %11 = vsyncpa [#allocation5], 0  ;;  %s3789_s12 = smov [#allocation3]   ;;  %s3581_s16 = scalar_lea.hbm %s5105_s0, 32768 }
   0x2   :  { %s17_s13 = sshll.u32 %s3789_s12, 4  ;;  %p3582_p0 = scmp.ne.s32.totalorder %s5105_s0, %s3581_s16  ;;  %s18_s13 = int_to_ptr.vmem [resolvable:$true] %s17_s13 }
   0x3   :  { %p3585_p1 = scmp.lt.u32.totalorder %s3581_s16, %s5105_s0 }
   0x5   :  { %p3587_p2 = pnand %p3585_p1, %p3582_p0 }
   0x7   :  { %3590 = shalt.err (!%p3587_p2)
}
   0x8   :  { %s3591_s21 = scalar_lea.vmem %s18_s13, 32768  ;;  %p3596_p4 = scmp.lt.s32.totalorder %s18_s13, %s18_s13 }
   0x9   :  { %p3592_p3 = scmp.ne.s32.totalorder %s18_s13, %s3591_s21  ;;  %p3597_p5 = scmp.lt.s32.totalorder %s3591_s21, %s3591_s21 }
   0xb   :  { %p3598_p6 = por %p3597_p5, %p3596_p4 }
   0xd   :  { %p3599_p7 = pnand %p3598_p6, %p3592_p3 }
   0xf   :  { %3602 = shalt.err (!%p3599_p7)
}
  0x10   :  { %s3790_s22 = smov 1024   ;;  %s3791_s23 = smov 64  }
  0x11   :  { %23 = dma.hbm_to_vmem [thread:$0]  %s5105_s0, 32768, %s18_s13, [#allocation4], %s3790_s22, %s3790_s22, %s3791_s23  }
  0x12   :  { %3625 = dma.done.wait [#allocation4], 32768  }
  0x13   :  { %3626 = vsyncadd [#allocation4], 4294934528  ;;  %v45_v0 = vld [vmem:[#allocation3 + $0x80] sm:$0xff]  ;;  %v46_v1 = vld [vmem:[#allocation3 + $0x88] sm:$0xff]  ;;  %s2910_s27 = smul.f32 127.0, %s5106_s1  ;;  %vm2945_vm0 = vcmask 7168  }
  0x14   :  { %v47_v2 = vld [vmem:[#allocation3 + $0x90] sm:$0xff]  ;;  %v48_v3 = vld [vmem:[#allocation3 + $0x98] sm:$0xff]  ;;  %v49_v4 = vld [vmem:[#allocation3 + $0xa0] sm:$0xff]  ;;  %3784 = vmaxabs.init.f32.vacc3 %v45_v0, %v46_v1 }
  0x15   :  { %v50_v5 = vld [vmem:[#allocation3 + $0xa8] sm:$0xff]  ;;  %v51_v6 = vld [vmem:[#allocation3 + $0xb0] sm:$0xff]  ;;  %v52_v7 = vld [vmem:[#allocation3 + $0xb8] sm:$0xff] }
  0x16   :  { %v29_v8 = vld [vmem:[#allocation3] sm:$0xff]  ;;  %v30_v9 = vld [vmem:[#allocation3 + $0x8] sm:$0xff]  ;;  %v31_v10 = vld [vmem:[#allocation3 + $0x10] sm:$0xff]  ;;  %3785 = vmaxabs.f32.vacc3 %v47_v2, %v48_v3 }
  0x17   :  { %v32_v11 = vld [vmem:[#allocation3 + $0x18] sm:$0xff]  ;;  %v33_v12 = vld [vmem:[#allocation3 + $0x20] sm:$0xff]  ;;  %v34_v13 = vld [vmem:[#allocation3 + $0x28] sm:$0xff]  ;;  %3779 = vmaxabs.init.f32.vacc2 %v29_v8, %v30_v9 }
  0x18   :  { %v35_v14 = vld [vmem:[#allocation3 + $0x30] sm:$0xff]  ;;  %v36_v15 = vld [vmem:[#allocation3 + $0x38] sm:$0xff]  ;;  %v53_v16 = vld [vmem:[#allocation3 + $0xc0] sm:$0xff]  ;;  %3786 = vmaxabs.f32.vacc3 %v49_v4, %v50_v5 }
  0x19   :  { %v54_v17 = vld [vmem:[#allocation3 + $0xc8] sm:$0xff]  ;;  %v55_v18 = vld [vmem:[#allocation3 + $0xd0] sm:$0xff]  ;;  %v56_v19 = vld [vmem:[#allocation3 + $0xd8] sm:$0xff]  ;;  %3780 = vmaxabs.f32.vacc2 %v31_v10, %v32_v11 }
  0x1a   :  { %v57_v20 = vld [vmem:[#allocation3 + $0xe0] sm:$0xff]  ;;  %v58_v21 = vld [vmem:[#allocation3 + $0xe8] sm:$0xff]  ;;  %v59_v22 = vld [vmem:[#allocation3 + $0xf0] sm:$0xff]  ;;  %3774 = vmaxabs.init.f32.vacc1 %v53_v16, %v54_v17  ;;  %3787 = vmaxabs.f32.vacc3 %v51_v6, %v52_v7 }
  0x1b   :  { %v60_v23 = vld [vmem:[#allocation3 + $0xf8] sm:$0xff]  ;;  %v37_v24 = vld [vmem:[#allocation3 + $0x40] sm:$0xff]  ;;  %v38_v25 = vld [vmem:[#allocation3 + $0x48] sm:$0xff]  ;;  %3781 = vmaxabs.f32.vacc2 %v33_v12, %v34_v13 }
  0x1c   :  { %v39_v26 = vld [vmem:[#allocation3 + $0x50] sm:$0xff]  ;;  %v40_v27 = vld [vmem:[#allocation3 + $0x58] sm:$0xff]  ;;  %v41_v28 = vld [vmem:[#allocation3 + $0x60] sm:$0xff]  ;;  %v3788_v32 = vmovacc.low.even.vacc3  ;;  %3775 = vmaxabs.f32.vacc1 %v55_v18, %v56_v19  ;;  %3769 = vmaxabs.init.f32.vacc0 %v37_v24, %v38_v25 }
  0x1d   :  { %v42_v29 = vld [vmem:[#allocation3 + $0x68] sm:$0xff]  ;;  %v43_v30 = vld [vmem:[#allocation3 + $0x70] sm:$0xff]  ;;  %v44_v31 = vld [vmem:[#allocation3 + $0x78] sm:$0xff]  ;;  %3782 = vmaxabs.f32.vacc2 %v35_v14, %v36_v15 }
  0x1e   :  { %v69_v33 = vld [vmem:[#allocation3 + $0x140] sm:$0xff]  ;;  %v70_v34 = vld [vmem:[#allocation3 + $0x148] sm:$0xff]  ;;  %566 = vmax.xlane.f32.xlu1 %v3788_v32  ;;  %v71_v35 = vld [vmem:[#allocation3 + $0x150] sm:$0xff]  ;;  %3776 = vmaxabs.f32.vacc1 %v57_v20, %v58_v21  ;;  %3770 = vmaxabs.f32.vacc0 %v39_v26, %v40_v27 }
  0x1f   :  { %v72_v36 = vld [vmem:[#allocation3 + $0x158] sm:$0xff]  ;;  %v73_v37 = vld [vmem:[#allocation3 + $0x160] sm:$0xff]  ;;  %v74_v38 = vld [vmem:[#allocation3 + $0x168] sm:$0xff]  ;;  %v3783_v41 = vmovacc.low.even.vacc2  ;;  %3764 = vmaxabs.init.f32.vacc3 %v69_v33, %v70_v34 }
  0x20   :  { %v75_v39 = vld [vmem:[#allocation3 + $0x170] sm:$0xff]  ;;  %v76_v40 = vld [vmem:[#allocation3 + $0x178] sm:$0xff]  ;;  %v61_v42 = vld [vmem:[#allocation3 + $0x100] sm:$0xff]  ;;  %3777 = vmaxabs.f32.vacc1 %v59_v22, %v60_v23  ;;  %3771 = vmaxabs.f32.vacc0 %v41_v28, %v42_v29 }
  0x21   :  { %v62_v43 = vld [vmem:[#allocation3 + $0x108] sm:$0xff]  ;;  %v63_v44 = vld [vmem:[#allocation3 + $0x110] sm:$0xff]  ;;  %v64_v45 = vld [vmem:[#allocation3 + $0x118] sm:$0xff]  ;;  %548 = vmax.xlane.f32.xlu0 %v3783_v41  ;;  %3765 = vmaxabs.f32.vacc3 %v71_v35, %v72_v36 }
  0x22   :  { %v65_v46 = vld [vmem:[#allocation3 + $0x120] sm:$0xff]  ;;  %v66_v47 = vld [vmem:[#allocation3 + $0x128] sm:$0xff]  ;;  %v67_v48 = vld [vmem:[#allocation3 + $0x130] sm:$0xff]  ;;  %v3778_v51 = vmovacc.low.even.vacc1  ;;  %3759 = vmaxabs.init.f32.vacc2 %v61_v42, %v62_v43  ;;  %3772 = vmaxabs.f32.vacc0 %v43_v30, %v44_v31 }
  0x23   :  { %v68_v49 = vld [vmem:[#allocation3 + $0x138] sm:$0xff]  ;;  %v85_v50 = vld [vmem:[#allocation3 + $0x1c0] sm:$0xff]  ;;  %v86_v52 = vld [vmem:[#allocation3 + $0x1c8] sm:$0xff]  ;;  %3766 = vmaxabs.f32.vacc3 %v73_v37, %v74_v38 }
  0x24   :  { %v87_v53 = vld [vmem:[#allocation3 + $0x1d0] sm:$0xff]  ;;  %575 = vmax.xlane.f32.xlu1 %v3778_v51  ;;  %v88_v54 = vld [vmem:[#allocation3 + $0x1d8] sm:$0xff]  ;;  %v89_v55 = vld [vmem:[#allocation3 + $0x1e0] sm:$0xff]  ;;  %v3773_v59 = vmovacc.low.even.vacc0  ;;  %3760 = vmaxabs.f32.vacc2 %v63_v44, %v64_v45  ;;  %3754 = vmaxabs.init.f32.vacc1 %v85_v50, %v86_v52 }
  0x25   :  { %v90_v56 = vld [vmem:[#allocation3 + $0x1e8] sm:$0xff]  ;;  %v91_v57 = vld [vmem:[#allocation3 + $0x1f0] sm:$0xff]  ;;  %v92_v58 = vld [vmem:[#allocation3 + $0x1f8] sm:$0xff]  ;;  %3767 = vmaxabs.f32.vacc3 %v75_v39, %v76_v40 }
  0x26   :  { %v77_v60 = vld [vmem:[#allocation3 + $0x180] sm:$0xff]  ;;  %v78_v61 = vld [vmem:[#allocation3 + $0x188] sm:$0xff]  ;;  %v79_v62 = vld [vmem:[#allocation3 + $0x190] sm:$0xff]  ;;  %557 = vmax.xlane.f32.xlu0 %v3773_v59  ;;  %3761 = vmaxabs.f32.vacc2 %v65_v46, %v66_v47  ;;  %3755 = vmaxabs.f32.vacc1 %v87_v53, %v88_v54 }
  0x27   :  { %v80_v63 = vld [vmem:[#allocation3 + $0x198] sm:$0xff]  ;;  %v81_v0 = vld [vmem:[#allocation3 + $0x1a0] sm:$0xff]  ;;  %v82_v1 = vld [vmem:[#allocation3 + $0x1a8] sm:$0xff]  ;;  %v3768_v6 = vmovacc.low.even.vacc3  ;;  %3749 = vmaxabs.init.f32.vacc0 %v77_v60, %v78_v61 }
  0x28   :  { %v83_v2 = vld [vmem:[#allocation3 + $0x1b0] sm:$0xff]  ;;  %v84_v3 = vld [vmem:[#allocation3 + $0x1b8] sm:$0xff]  ;;  %v101_v4 = vld [vmem:[#allocation3 + $0x240] sm:$0xff]  ;;  %3762 = vmaxabs.f32.vacc2 %v67_v48, %v68_v49  ;;  %3756 = vmaxabs.f32.vacc1 %v89_v55, %v90_v56 }
  0x29   :  { %v102_v5 = vld [vmem:[#allocation3 + $0x248] sm:$0xff]  ;;  %v103_v7 = vld [vmem:[#allocation3 + $0x250] sm:$0xff]  ;;  %v104_v8 = vld [vmem:[#allocation3 + $0x258] sm:$0xff]  ;;  %593 = vmax.xlane.f32.xlu1 %v3768_v6  ;;  %3750 = vmaxabs.f32.vacc0 %v79_v62, %v80_v63 }
  0x2a   :  { %v105_v9 = vld [vmem:[#allocation3 + $0x260] sm:$0xff]  ;;  %v106_v10 = vld [vmem:[#allocation3 + $0x268] sm:$0xff]  ;;  %v107_v11 = vld [vmem:[#allocation3 + $0x270] sm:$0xff]  ;;  %v3763_v16 = vmovacc.low.even.vacc2  ;;  %3744 = vmaxabs.init.f32.vacc3 %v101_v4, %v102_v5  ;;  %3757 = vmaxabs.f32.vacc1 %v91_v57, %v92_v58 }
  0x2b   :  { %v108_v12 = vld [vmem:[#allocation3 + $0x278] sm:$0xff]  ;;  %v93_v13 = vld [vmem:[#allocation3 + $0x200] sm:$0xff]  ;;  %v94_v14 = vld [vmem:[#allocation3 + $0x208] sm:$0xff]  ;;  %3751 = vmaxabs.f32.vacc0 %v81_v0, %v82_v1 }
  0x2c   :  { %v95_v15 = vld [vmem:[#allocation3 + $0x210] sm:$0xff]  ;;  %v96_v17 = vld [vmem:[#allocation3 + $0x218] sm:$0xff]  ;;  %v97_v18 = vld [vmem:[#allocation3 + $0x220] sm:$0xff]  ;;  %584 = vmax.xlane.f32.xlu0 %v3763_v16  ;;  %v3758_v24 = vmovacc.low.even.vacc1  ;;  %3745 = vmaxabs.f32.vacc3 %v103_v7, %v104_v8  ;;  %3739 = vmaxabs.init.f32.vacc2 %v93_v13, %v94_v14 }
  0x2d   :  { %v98_v19 = vld [vmem:[#allocation3 + $0x228] sm:$0xff]  ;;  %v99_v20 = vld [vmem:[#allocation3 + $0x230] sm:$0xff]  ;;  %v100_v21 = vld [vmem:[#allocation3 + $0x238] sm:$0xff]  ;;  %3752 = vmaxabs.f32.vacc0 %v83_v2, %v84_v3 }
  0x2e   :  { %v117_v22 = vld [vmem:[#allocation3 + $0x2c0] sm:$0xff]  ;;  %v118_v23 = vld [vmem:[#allocation3 + $0x2c8] sm:$0xff]  ;;  %v119_v25 = vld [vmem:[#allocation3 + $0x2d0] sm:$0xff]  ;;  %611 = vmax.xlane.f32.xlu1 %v3758_v24  ;;  %3746 = vmaxabs.f32.vacc3 %v105_v9, %v106_v10  ;;  %3740 = vmaxabs.f32.vacc2 %v95_v15, %v96_v17 }
  0x2f   :  { %v120_v26 = vld [vmem:[#allocation3 + $0x2d8] sm:$0xff]  ;;  %v121_v27 = vld [vmem:[#allocation3 + $0x2e0] sm:$0xff]  ;;  %v122_v28 = vld [vmem:[#allocation3 + $0x2e8] sm:$0xff]  ;;  %v3753_v34 = vmovacc.low.even.vacc0  ;;  %3734 = vmaxabs.init.f32.vacc1 %v117_v22, %v118_v23 }
  0x30   :  { %v123_v29 = vld [vmem:[#allocation3 + $0x2f0] sm:$0xff]  ;;  %v124_v30 = vld [vmem:[#allocation3 + $0x2f8] sm:$0xff]  ;;  %v109_v31 = vld [vmem:[#allocation3 + $0x280] sm:$0xff]  ;;  %3747 = vmaxabs.f32.vacc3 %v107_v11, %v108_v12  ;;  %3741 = vmaxabs.f32.vacc2 %v97_v18, %v98_v19 }
  0x31   :  { %v110_v32 = vld [vmem:[#allocation3 + $0x288] sm:$0xff]  ;;  %v111_v33 = vld [vmem:[#allocation3 + $0x290] sm:$0xff]  ;;  %v112_v35 = vld [vmem:[#allocation3 + $0x298] sm:$0xff]  ;;  %602 = vmax.xlane.f32.xlu0 %v3753_v34  ;;  %3735 = vmaxabs.f32.vacc1 %v119_v25, %v120_v26 }
  0x32   :  { %v113_v36 = vld [vmem:[#allocation3 + $0x2a0] sm:$0xff]  ;;  %v114_v37 = vld [vmem:[#allocation3 + $0x2a8] sm:$0xff]  ;;  %v115_v38 = vld [vmem:[#allocation3 + $0x2b0] sm:$0xff]  ;;  %3729 = vmaxabs.init.f32.vacc0 %v109_v31, %v110_v32  ;;  %v3748_v43 = vmovacc.low.even.vacc3  ;;  %3742 = vmaxabs.f32.vacc2 %v99_v20, %v100_v21 }
  0x33   :  { %v116_v39 = vld [vmem:[#allocation3 + $0x2b8] sm:$0xff]  ;;  %v133_v40 = vld [vmem:[#allocation3 + $0x340] sm:$0xff]  ;;  %v134_v41 = vld [vmem:[#allocation3 + $0x348] sm:$0xff]  ;;  %3736 = vmaxabs.f32.vacc1 %v121_v27, %v122_v28 }
  0x34   :  { %v135_v42 = vld [vmem:[#allocation3 + $0x350] sm:$0xff]  ;;  %v136_v44 = vld [vmem:[#allocation3 + $0x358] sm:$0xff]  ;;  %v137_v45 = vld [vmem:[#allocation3 + $0x360] sm:$0xff]  ;;  %629 = vmax.xlane.f32.xlu1 %v3748_v43  ;;  %3730 = vmaxabs.f32.vacc0 %v111_v33, %v112_v35  ;;  %v3743_v51 = vmovacc.low.even.vacc2  ;;  %3724 = vmaxabs.init.f32.vacc3 %v133_v40, %v134_v41 }
  0x35   :  { %v138_v46 = vld [vmem:[#allocation3 + $0x368] sm:$0xff]  ;;  %v139_v47 = vld [vmem:[#allocation3 + $0x370] sm:$0xff]  ;;  %v125_v48 = vld [vmem:[#allocation3 + $0x300] sm:$0xff]  ;;  %3737 = vmaxabs.f32.vacc1 %v123_v29, %v124_v30 }
  0x36   :  { %v140_v49 = vld [vmem:[#allocation3 + $0x378] sm:$0xff]  ;;  %v126_v50 = vld [vmem:[#allocation3 + $0x308] sm:$0xff]  ;;  %v127_v52 = vld [vmem:[#allocation3 + $0x310] sm:$0xff]  ;;  %620 = vmax.xlane.f32.xlu0 %v3743_v51  ;;  %3731 = vmaxabs.f32.vacc0 %v113_v36, %v114_v37  ;;  %3725 = vmaxabs.f32.vacc3 %v135_v42, %v136_v44 }
  0x37   :  { %v128_v53 = vld [vmem:[#allocation3 + $0x318] sm:$0xff]  ;;  %v129_v54 = vld [vmem:[#allocation3 + $0x320] sm:$0xff]  ;;  %v130_v55 = vld [vmem:[#allocation3 + $0x328] sm:$0xff]  ;;  %v3738_v61 = vmovacc.low.even.vacc1  ;;  %3719 = vmaxabs.init.f32.vacc2 %v125_v48, %v126_v50 }
  0x38   :  { %v131_v56 = vld [vmem:[#allocation3 + $0x330] sm:$0xff]  ;;  %v132_v57 = vld [vmem:[#allocation3 + $0x338] sm:$0xff]  ;;  %v149_v58 = vld [vmem:[#allocation3 + $0x3c0] sm:$0xff]  ;;  %3732 = vmaxabs.f32.vacc0 %v115_v38, %v116_v39  ;;  %3726 = vmaxabs.f32.vacc3 %v137_v45, %v138_v46 }
  0x39   :  { %v150_v59 = vld [vmem:[#allocation3 + $0x3c8] sm:$0xff]  ;;  %v151_v60 = vld [vmem:[#allocation3 + $0x3d0] sm:$0xff]  ;;  %v152_v62 = vld [vmem:[#allocation3 + $0x3d8] sm:$0xff]  ;;  %647 = vmax.xlane.f32.xlu1 %v3738_v61  ;;  %3720 = vmaxabs.f32.vacc2 %v127_v52, %v128_v53 }
  0x3a   :  { %v153_v63 = vld [vmem:[#allocation3 + $0x3e0] sm:$0xff]  ;;  %v154_v0 = vld [vmem:[#allocation3 + $0x3e8] sm:$0xff]  ;;  %v155_v1 = vld [vmem:[#allocation3 + $0x3f0] sm:$0xff]  ;;  %v3733_v2 = vmovacc.low.even.vacc0  ;;  %3714 = vmaxabs.init.f32.vacc1 %v149_v58, %v150_v59  ;;  %3727 = vmaxabs.f32.vacc3 %v139_v47, %v140_v49 }
  0x3b   :  { %v141_v3 = vld [vmem:[#allocation3 + $0x380] sm:$0xff]  ;;  %v142_v4 = vld [vmem:[#allocation3 + $0x388] sm:$0xff]  ;;  %v156_v5 = vld [vmem:[#allocation3 + $0x3f8] sm:$0xff]  ;;  %3721 = vmaxabs.f32.vacc2 %v129_v54, %v130_v55 }
  0x3c   :  { %v143_v6 = vld [vmem:[#allocation3 + $0x390] sm:$0xff]  ;;  %638 = vmax.xlane.f32.xlu0 %v3733_v2  ;;  %v144_v7 = vld [vmem:[#allocation3 + $0x398] sm:$0xff]  ;;  %v145_v8 = vld [vmem:[#allocation3 + $0x3a0] sm:$0xff]  ;;  %3715 = vmaxabs.f32.vacc1 %v151_v60, %v152_v62  ;;  %v3728_v14 = vmovacc.low.even.vacc3  ;;  %3709 = vmaxabs.init.f32.vacc0 %v141_v3, %v142_v4 }
  0x3d   :  { %v146_v9 = vld [vmem:[#allocation3 + $0x3a8] sm:$0xff]  ;;  %v147_v10 = vld [vmem:[#allocation3 + $0x3b0] sm:$0xff]  ;;  %v165_v11 = vld [vmem:[#allocation3 + $0x440] sm:$0xff]  ;;  %3722 = vmaxabs.f32.vacc2 %v131_v56, %v132_v57 }
  0x3e   :  { %v148_v12 = vld [vmem:[#allocation3 + $0x3b8] sm:$0xff]  ;;  %v166_v13 = vld [vmem:[#allocation3 + $0x448] sm:$0xff]  ;;  %v167_v15 = vld [vmem:[#allocation3 + $0x450] sm:$0xff]  ;;  %665 = vmax.xlane.f32.xlu1 %v3728_v14  ;;  %3716 = vmaxabs.f32.vacc1 %v153_v63, %v154_v0  ;;  %3710 = vmaxabs.f32.vacc0 %v143_v6, %v144_v7 }
  0x3f   :  { %v168_v16 = vld [vmem:[#allocation3 + $0x458] sm:$0xff]  ;;  %v169_v17 = vld [vmem:[#allocation3 + $0x460] sm:$0xff]  ;;  %v170_v18 = vld [vmem:[#allocation3 + $0x468] sm:$0xff]  ;;  %v3723_v23 = vmovacc.low.even.vacc2  ;;  %3704 = vmaxabs.init.f32.vacc3 %v165_v11, %v166_v13 }
  0x40   :  { %v171_v19 = vld [vmem:[#allocation3 + $0x470] sm:$0xff]  ;;  %v157_v20 = vld [vmem:[#allocation3 + $0x400] sm:$0xff]  ;;  %v172_v21 = vld [vmem:[#allocation3 + $0x478] sm:$0xff]  ;;  %3717 = vmaxabs.f32.vacc1 %v155_v1, %v156_v5  ;;  %3711 = vmaxabs.f32.vacc0 %v145_v8, %v146_v9 }
  0x41   :  { %v158_v22 = vld [vmem:[#allocation3 + $0x408] sm:$0xff]  ;;  %v159_v24 = vld [vmem:[#allocation3 + $0x410] sm:$0xff]  ;;  %v160_v25 = vld [vmem:[#allocation3 + $0x418] sm:$0xff]  ;;  %656 = vmax.xlane.f32.xlu0 %v3723_v23  ;;  %3705 = vmaxabs.f32.vacc3 %v167_v15, %v168_v16 }
  0x42   :  { %v161_v26 = vld [vmem:[#allocation3 + $0x420] sm:$0xff]  ;;  %v162_v27 = vld [vmem:[#allocation3 + $0x428] sm:$0xff]  ;;  %v163_v28 = vld [vmem:[#allocation3 + $0x430] sm:$0xff]  ;;  %v3718_v30 = vmovacc.low.even.vacc1  ;;  %3699 = vmaxabs.init.f32.vacc2 %v157_v20, %v158_v22  ;;  %3712 = vmaxabs.f32.vacc0 %v147_v10, %v148_v12 }
  0x43   :  { %v181_v29 = vld [vmem:[#allocation3 + $0x4c0] sm:$0xff]  ;;  %v164_v31 = vld [vmem:[#allocation3 + $0x438] sm:$0xff]  ;;  %v182_v32 = vld [vmem:[#allocation3 + $0x4c8] sm:$0xff]  ;;  %3706 = vmaxabs.f32.vacc3 %v169_v17, %v170_v18 }
  0x44   :  { %v183_v33 = vld [vmem:[#allocation3 + $0x4d0] sm:$0xff]  ;;  %683 = vmax.xlane.f32.xlu1 %v3718_v30  ;;  %v184_v34 = vld [vmem:[#allocation3 + $0x4d8] sm:$0xff]  ;;  %v185_v35 = vld [vmem:[#allocation3 + $0x4e0] sm:$0xff]  ;;  %v3713_v40 = vmovacc.low.even.vacc0  ;;  %3700 = vmaxabs.f32.vacc2 %v159_v24, %v160_v25  ;;  %3694 = vmaxabs.init.f32.vacc1 %v181_v29, %v182_v32 }
  0x45   :  { %v186_v36 = vld [vmem:[#allocation3 + $0x4e8] sm:$0xff]  ;;  %v187_v37 = vld [vmem:[#allocation3 + $0x4f0] sm:$0xff]  ;;  %v173_v38 = vld [vmem:[#allocation3 + $0x480] sm:$0xff]  ;;  %3707 = vmaxabs.f32.vacc3 %v171_v19, %v172_v21 }
  0x46   :  { %v174_v39 = vld [vmem:[#allocation3 + $0x488] sm:$0xff]  ;;  %v188_v41 = vld [vmem:[#allocation3 + $0x4f8] sm:$0xff]  ;;  %v175_v42 = vld [vmem:[#allocation3 + $0x490] sm:$0xff]  ;;  %674 = vmax.xlane.f32.xlu0 %v3713_v40  ;;  %3701 = vmaxabs.f32.vacc2 %v161_v26, %v162_v27  ;;  %3695 = vmaxabs.f32.vacc1 %v183_v33, %v184_v34 }
  0x47   :  { %v176_v43 = vld [vmem:[#allocation3 + $0x498] sm:$0xff]  ;;  %v177_v44 = vld [vmem:[#allocation3 + $0x4a0] sm:$0xff]  ;;  %v178_v45 = vld [vmem:[#allocation3 + $0x4a8] sm:$0xff]  ;;  %3689 = vmaxabs.init.f32.vacc0 %v173_v38, %v174_v39  ;;  %v3708_v49 = vmovacc.low.even.vacc3 }
  0x48   :  { %v197_v46 = vld [vmem:[#allocation3 + $0x540] sm:$0xff]  ;;  %v179_v47 = vld [vmem:[#allocation3 + $0x4b0] sm:$0xff]  ;;  %v198_v48 = vld [vmem:[#allocation3 + $0x548] sm:$0xff]  ;;  %3702 = vmaxabs.f32.vacc2 %v163_v28, %v164_v31  ;;  %3696 = vmaxabs.f32.vacc1 %v185_v35, %v186_v36 }
  0x49   :  { %v180_v50 = vld [vmem:[#allocation3 + $0x4b8] sm:$0xff]  ;;  %v199_v51 = vld [vmem:[#allocation3 + $0x550] sm:$0xff]  ;;  %v201_v53 = vld [vmem:[#allocation3 + $0x560] sm:$0xff]  ;;  %701 = vmax.xlane.f32.xlu1 %v3708_v49  ;;  %3690 = vmaxabs.f32.vacc0 %v175_v42, %v176_v43  ;;  %3684 = vmaxabs.init.f32.vacc3 %v197_v46, %v198_v48 }
  0x4a   :  { %v200_v52 = vld [vmem:[#allocation3 + $0x558] sm:$0xff]  ;;  %v202_v54 = vld [vmem:[#allocation3 + $0x568] sm:$0xff]  ;;  %v189_v55 = vld [vmem:[#allocation3 + $0x500] sm:$0xff]  ;;  %v3703_v58 = vmovacc.low.even.vacc2  ;;  %3697 = vmaxabs.f32.vacc1 %v187_v37, %v188_v41 }
  0x4b   :  { %v203_v56 = vld [vmem:[#allocation3 + $0x570] sm:$0xff]  ;;  %v190_v57 = vld [vmem:[#allocation3 + $0x508] sm:$0xff]  ;;  %v204_v59 = vld [vmem:[#allocation3 + $0x578] sm:$0xff]  ;;  %3691 = vmaxabs.f32.vacc0 %v177_v44, %v178_v45  ;;  %3685 = vmaxabs.f32.vacc3 %v199_v51, %v200_v52 }
  0x4c   :  { %v191_v60 = vld [vmem:[#allocation3 + $0x510] sm:$0xff]  ;;  %v192_v61 = vld [vmem:[#allocation3 + $0x518] sm:$0xff]  ;;  %v193_v62 = vld [vmem:[#allocation3 + $0x520] sm:$0xff]  ;;  %692 = vmax.xlane.f32.xlu0 %v3703_v58  ;;  %v3698_v2 = vmovacc.low.even.vacc1  ;;  %3679 = vmaxabs.init.f32.vacc2 %v189_v55, %v190_v57 }
  0x4d   :  { %v213_v63 = vld [vmem:[#allocation3 + $0x5c0] sm:$0xff]  ;;  %v214_v0 = vld [vmem:[#allocation3 + $0x5c8] sm:$0xff]  ;;  %v215_v1 = vld [vmem:[#allocation3 + $0x5d0] sm:$0xff]  ;;  %3692 = vmaxabs.f32.vacc0 %v179_v47, %v180_v50  ;;  %3686 = vmaxabs.f32.vacc3 %v201_v53, %v202_v54 }
  0x4e   :  { %v194_v3 = vld [vmem:[#allocation3 + $0x528] sm:$0xff]  ;;  %v195_v4 = vld [vmem:[#allocation3 + $0x530] sm:$0xff]  ;;  %v216_v5 = vld [vmem:[#allocation3 + $0x5d8] sm:$0xff]  ;;  %719 = vmax.xlane.f32.xlu1 %v3698_v2  ;;  %3674 = vmaxabs.init.f32.vacc1 %v213_v63, %v214_v0  ;;  %3680 = vmaxabs.f32.vacc2 %v191_v60, %v192_v61 }
  0x4f   :  { %v196_v6 = vld [vmem:[#allocation3 + $0x538] sm:$0xff]  ;;  %v217_v7 = vld [vmem:[#allocation3 + $0x5e0] sm:$0xff]  ;;  %v3693_v8 = vmovacc.low.even.vacc0  ;;  %v206_v10 = vld [vmem:[#allocation3 + $0x588] sm:$0xff]  ;;  %3687 = vmaxabs.f32.vacc3 %v203_v56, %v204_v59 }
  0x50   :  { %v205_v9 = vld [vmem:[#allocation3 + $0x580] sm:$0xff]  ;;  %v218_v11 = vld [vmem:[#allocation3 + $0x5e8] sm:$0xff]  ;;  %v207_v12 = vld [vmem:[#allocation3 + $0x590] sm:$0xff]  ;;  %3675 = vmaxabs.f32.vacc1 %v215_v1, %v216_v5  ;;  %3681 = vmaxabs.f32.vacc2 %v193_v62, %v194_v3 }
  0x51   :  { %710 = vmax.xlane.f32.xlu0 %v3693_v8  ;;  %v219_v13 = vld [vmem:[#allocation3 + $0x5f0] sm:$0xff]  ;;  %v220_v14 = vld [vmem:[#allocation3 + $0x5f8] sm:$0xff]  ;;  %v209_v16 = vld [vmem:[#allocation3 + $0x5a0] sm:$0xff]  ;;  %v3688_v20 = vmovacc.low.even.vacc3  ;;  %3669 = vmaxabs.init.f32.vacc0 %v205_v9, %v206_v10 }
  0x52   :  { %v208_v15 = vld [vmem:[#allocation3 + $0x598] sm:$0xff]  ;;  %v229_v17 = vld [vmem:[#allocation3 + $0x640] sm:$0xff]  ;;  %v210_v18 = vld [vmem:[#allocation3 + $0x5a8] sm:$0xff]  ;;  %3676 = vmaxabs.f32.vacc1 %v217_v7, %v218_v11  ;;  %3682 = vmaxabs.f32.vacc2 %v195_v4, %v196_v6 }
  0x53   :  { %v230_v19 = vld [vmem:[#allocation3 + $0x648] sm:$0xff]  ;;  %v211_v21 = vld [vmem:[#allocation3 + $0x5b0] sm:$0xff]  ;;  %v212_v23 = vld [vmem:[#allocation3 + $0x5b8] sm:$0xff]  ;;  %737 = vmax.xlane.f32.xlu1 %v3688_v20  ;;  %3670 = vmaxabs.f32.vacc0 %v207_v12, %v208_v15 }
  0x54   :  { %v231_v22 = vld [vmem:[#allocation3 + $0x650] sm:$0xff]  ;;  %v232_v24 = vld [vmem:[#allocation3 + $0x658] sm:$0xff]  ;;  %v233_v25 = vld [vmem:[#allocation3 + $0x660] sm:$0xff]  ;;  %v3683_v29 = vmovacc.low.even.vacc2  ;;  %3664 = vmaxabs.init.f32.vacc3 %v229_v17, %v230_v19  ;;  %3677 = vmaxabs.f32.vacc1 %v219_v13, %v220_v14 }
  0x55   :  { %v221_v26 = vld [vmem:[#allocation3 + $0x600] sm:$0xff]  ;;  %v234_v27 = vld [vmem:[#allocation3 + $0x668] sm:$0xff]  ;;  %v223_v30 = vld [vmem:[#allocation3 + $0x610] sm:$0xff]  ;;  %3671 = vmaxabs.f32.vacc0 %v209_v16, %v210_v18 }
  0x56   :  { %v222_v28 = vld [vmem:[#allocation3 + $0x608] sm:$0xff]  ;;  %v235_v31 = vld [vmem:[#allocation3 + $0x670] sm:$0xff]  ;;  %v236_v32 = vld [vmem:[#allocation3 + $0x678] sm:$0xff]  ;;  %728 = vmax.xlane.f32.xlu0 %v3683_v29  ;;  %v3678_v35 = vmovacc.low.even.vacc1  ;;  %3665 = vmaxabs.f32.vacc3 %v231_v22, %v232_v24 }
  0x57   :  { %v224_v33 = vld [vmem:[#allocation3 + $0x618] sm:$0xff]  ;;  %v245_v34 = vld [vmem:[#allocation3 + $0x6c0] sm:$0xff]  ;;  %v226_v37 = vld [vmem:[#allocation3 + $0x628] sm:$0xff]  ;;  %3659 = vmaxabs.init.f32.vacc2 %v221_v26, %v222_v28  ;;  %3672 = vmaxabs.f32.vacc0 %v211_v21, %v212_v23 }
  0x58   :  { %v225_v36 = vld [vmem:[#allocation3 + $0x620] sm:$0xff]  ;;  %v246_v38 = vld [vmem:[#allocation3 + $0x6c8] sm:$0xff]  ;;  %v227_v39 = vld [vmem:[#allocation3 + $0x630] sm:$0xff]  ;;  %755 = vmax.xlane.f32.xlu1 %v3678_v35  ;;  %3666 = vmaxabs.f32.vacc3 %v233_v25, %v234_v27 }
  0x59   :  { %v247_v40 = vld [vmem:[#allocation3 + $0x6d0] sm:$0xff]  ;;  %v228_v41 = vld [vmem:[#allocation3 + $0x638] sm:$0xff]  ;;  %v249_v43 = vld [vmem:[#allocation3 + $0x6e0] sm:$0xff]  ;;  %v3673_v46 = vmovacc.low.even.vacc0  ;;  %3660 = vmaxabs.f32.vacc2 %v223_v30, %v224_v33  ;;  %3654 = vmaxabs.init.f32.vacc1 %v245_v34, %v246_v38 }
  0x5a   :  { %v248_v42 = vld [vmem:[#allocation3 + $0x6d8] sm:$0xff]  ;;  %v237_v44 = vld [vmem:[#allocation3 + $0x680] sm:$0xff]  ;;  %v238_v45 = vld [vmem:[#allocation3 + $0x688] sm:$0xff]  ;;  %3667 = vmaxabs.f32.vacc3 %v235_v31, %v236_v32  ;;  %v2911_v31 = vstv %s2910_s27 }
  0x5b   :  { %v250_v47 = vld [vmem:[#allocation3 + $0x6e8] sm:$0xff]  ;;  %v239_v48 = vld [vmem:[#allocation3 + $0x690] sm:$0xff]  ;;  %v240_v49 = vld [vmem:[#allocation3 + $0x698] sm:$0xff]  ;;  %746 = vmax.xlane.f32.xlu0 %v3673_v46  ;;  %3649 = vmaxabs.init.f32.vacc0 %v237_v44, %v238_v45  ;;  %3661 = vmaxabs.f32.vacc2 %v225_v36, %v226_v37  ;;  %3655 = vmaxabs.f32.vacc1 %v247_v40, %v248_v42  ;;  %3259 = vrcp.f32 %v2911_v31 }
  0x5c   :  { %v251_v50 = vld [vmem:[#allocation3 + $0x6f0] sm:$0xff]  ;;  %v241_v51 = vld [vmem:[#allocation3 + $0x6a0] sm:$0xff]  ;;  %v252_v53 = vld [vmem:[#allocation3 + $0x6f8] sm:$0xff]  ;;  %v3668_v55 = vmovacc.low.even.vacc3 }
  0x5d   :  { %v261_v52 = vld [vmem:[#allocation3 + $0x740] sm:$0xff]  ;;  %v262_v54 = vld [vmem:[#allocation3 + $0x748] sm:$0xff]  ;;  %v263_v57 = vld [vmem:[#allocation3 + $0x750] sm:$0xff]  ;;  %3650 = vmaxabs.f32.vacc0 %v239_v48, %v240_v49  ;;  %3662 = vmaxabs.f32.vacc2 %v227_v39, %v228_v41  ;;  %3656 = vmaxabs.f32.vacc1 %v249_v43, %v250_v47 }
  0x5e   :  { %v242_v56 = vld [vmem:[#allocation3 + $0x6a8] sm:$0xff]  ;;  %v243_v58 = vld [vmem:[#allocation3 + $0x6b0] sm:$0xff]  ;;  %v244_v59 = vld [vmem:[#allocation3 + $0x6b8] sm:$0xff]  ;;  %773 = vmax.xlane.f32.xlu1 %v3668_v55  ;;  %3644 = vmaxabs.init.f32.vacc3 %v261_v52, %v262_v54 }
  0x5f   :  { %v264_v60 = vld [vmem:[#allocation3 + $0x758] sm:$0xff]  ;;  %v253_v61 = vld [vmem:[#allocation3 + $0x700] sm:$0xff]  ;;  %v254_v63 = vld [vmem:[#allocation3 + $0x708] sm:$0xff]  ;;  %v3663_v0 = vmovacc.low.even.vacc2  ;;  %3651 = vmaxabs.f32.vacc0 %v241_v51, %v242_v56  ;;  %3657 = vmaxabs.f32.vacc1 %v251_v50, %v252_v53 }
  0x60   :  { %v265_v62 = vld [vmem:[#allocation3 + $0x760] sm:$0xff]  ;;  %v266_v1 = vld [vmem:[#allocation3 + $0x768] sm:$0xff]  ;;  %v255_v2 = vld [vmem:[#allocation3 + $0x710] sm:$0xff]  ;;  %3645 = vmaxabs.f32.vacc3 %v263_v57, %v264_v60 }
  0x61   :  { %v267_v3 = vld [vmem:[#allocation3 + $0x770] sm:$0xff]  ;;  %v256_v4 = vld [vmem:[#allocation3 + $0x718] sm:$0xff]  ;;  %764 = vmax.xlane.f32.xlu0 %v3663_v0  ;;  %v277_v5 = vld [vmem:[#allocation3 + $0x7c0] sm:$0xff]  ;;  %v3658_v8 = vmovacc.low.even.vacc1  ;;  %3639 = vmaxabs.init.f32.vacc2 %v253_v61, %v254_v63  ;;  %3652 = vmaxabs.f32.vacc0 %v243_v58, %v244_v59 }
  0x62   :  { %v278_v6 = vld [vmem:[#allocation3 + $0x7c8] sm:$0xff]  ;;  %v279_v7 = vld [vmem:[#allocation3 + $0x7d0] sm:$0xff]  ;;  %v257_v9 = vld [vmem:[#allocation3 + $0x720] sm:$0xff]  ;;  %3646 = vmaxabs.f32.vacc3 %v265_v62, %v266_v1 }
  0x63   :  { %v268_v10 = vld [vmem:[#allocation3 + $0x778] sm:$0xff]  ;;  %791 = vmax.xlane.f32.xlu1 %v3658_v8  ;;  %v258_v12 = vld [vmem:[#allocation3 + $0x728] sm:$0xff]  ;;  %v281_v13 = vld [vmem:[#allocation3 + $0x7e0] sm:$0xff]  ;;  %v3653_v14 = vmovacc.low.even.vacc0  ;;  %3634 = vmaxabs.init.f32.vacc1 %v277_v5, %v278_v6  ;;  %3640 = vmaxabs.f32.vacc2 %v255_v2, %v256_v4 }
  0x64   :  { %v280_v11 = vld [vmem:[#allocation3 + $0x7d8] sm:$0xff]  ;;  %v269_v15 = vld [vmem:[#allocation3 + $0x780] sm:$0xff]  ;;  %v270_v16 = vld [vmem:[#allocation3 + $0x788] sm:$0xff]  ;;  %3647 = vmaxabs.f32.vacc3 %v267_v3, %v268_v10 }
  0x65   :  { %v259_v17 = vld [vmem:[#allocation3 + $0x730] sm:$0xff]  ;;  %782 = vmax.xlane.f32.xlu0 %v3653_v14  ;;  %v260_v19 = vld [vmem:[#allocation3 + $0x738] sm:$0xff]  ;;  %v282_v20 = vld [vmem:[#allocation3 + $0x7e8] sm:$0xff]  ;;  %3635 = vmaxabs.f32.vacc1 %v279_v7, %v280_v11  ;;  %3641 = vmaxabs.f32.vacc2 %v257_v9, %v258_v12  ;;  %3629 = vmaxabs.init.f32.vacc0 %v269_v15, %v270_v16  ;;  %v3831_v33 = vpop.eup %3259 }
  0x66   :  { %v271_v18 = vld [vmem:[#allocation3 + $0x790] sm:$0xff]  ;;  %v272_v21 = vld [vmem:[#allocation3 + $0x798] sm:$0xff]  ;;  %v273_v23 = vld [vmem:[#allocation3 + $0x7a0] sm:$0xff]  ;;  %v3648_v24 = vmovacc.low.even.vacc3 }
  0x67   :  { %v283_v22 = vld [vmem:[#allocation3 + $0x7f0] sm:$0xff]  ;;  %v284_v25 = vld [vmem:[#allocation3 + $0x7f8] sm:$0xff]  ;;  %v274_v26 = vld [vmem:[#allocation3 + $0x7a8] sm:$0xff]  ;;  %3636 = vmaxabs.f32.vacc1 %v281_v13, %v282_v20  ;;  %3642 = vmaxabs.f32.vacc2 %v259_v17, %v260_v19  ;;  %3630 = vmaxabs.f32.vacc0 %v271_v18, %v272_v21 }
  0x68   :  { %809 = vmax.xlane.f32.xlu1 %v3648_v24  ;;  %v275_v27 = vld [vmem:[#allocation3 + $0x7b0] sm:$0xff]  ;;  %v276_v29 = vld [vmem:[#allocation3 + $0x7b8] sm:$0xff]  ;;  %v3325_v47 = vld [vmem:[#allocation3 + $0x80] sm:$0xff] }
  0x69   :  { %v3643_v28 = vmovacc.low.even.vacc2  ;;  %3637 = vmaxabs.f32.vacc1 %v283_v22, %v284_v25  ;;  %3631 = vmaxabs.f32.vacc0 %v273_v23, %v274_v26  ;;  %v3326_v49 = vld [vmem:[#allocation3 + $0x88] sm:$0xff]  ;;  %v3327_v51 = vld [vmem:[#allocation3 + $0x90] sm:$0xff]  ;;  %v3328_v53 = vld [vmem:[#allocation3 + $0x98] sm:$0xff] }
  0x6a   :  { %v3329_v55 = vld [vmem:[#allocation3 + $0xa0] sm:$0xff]  ;;  %v3330_v57 = vld [vmem:[#allocation3 + $0xa8] sm:$0xff]  ;;  %v3331_v59 = vld [vmem:[#allocation3 + $0xb0] sm:$0xff] }
  0x6b   :  { %800 = vmax.xlane.f32.xlu0 %v3643_v28  ;;  %v3638_v30 = vmovacc.low.even.vacc1  ;;  %3632 = vmaxabs.f32.vacc0 %v275_v27, %v276_v29  ;;  %v3332_v61 = vld [vmem:[#allocation3 + $0xb8] sm:$0xff] }
  0x6d   :  { %827 = vmax.xlane.f32.xlu1 %v3638_v30  ;;  %v3633_v32 = vmovacc.low.even.vacc0 }
  0x6f   :  { %818 = vmax.xlane.f32.xlu0 %v3633_v32 }
  0xab   :  { %v567_v34 = vpop.xlane.xlu1 %566 }
  0xac   :  { %v831_v35 = vmax.f32 %v567_v34, 1e-05 }
  0xae   :  { %3261 = vrcp.f32 %v831_v35  ;;  %v2915_v36 = vmul.f32 %v3831_v33, %v831_v35  ;;  %v549_v37 = vpop.xlane.xlu0 %548 }
  0xaf   :  { %v829_v38 = vmax.f32 %v549_v37, 1e-05 }
  0xb0   :  { %2948 = vst.msk [vmem:[%s5108_s3 + $0x10] sm:$0xff] %vm2945_vm0, %v2915_v36 }
  0xb1   :  { %v2913_v39 = vmul.f32 %v3831_v33, %v829_v38  ;;  %v576_v40 = vpop.xlane.xlu1 %575  ;;  %3263 = vrcp.f32 %v829_v38 }
  0xb2   :  { %v832_v41 = vmax.f32 %v576_v40, 1e-05 }
  0xb3   :  { %2946 = vst.msk [vmem:[%s5108_s3] sm:$0xff] %vm2945_vm0, %v2913_v39  ;;  %v558_v45 = vpop.xlane.xlu0 %557 }
  0xb4   :  { %v2916_v42 = vmul.f32 %v3831_v33, %v832_v41  ;;  %3265 = vrcp.f32 %v832_v41  ;;  %v830_v46 = vmax.f32 %v558_v45, 1e-05  ;;  %v3333_v41 = vld [vmem:[#allocation3] sm:$0xff]  ;;  %v3335_v45 = vld [vmem:[#allocation3 + $0x10] sm:$0xff] }
  0xb6   :  { %2949 = vst.msk [vmem:[%s5108_s3 + $0x18] sm:$0xff] %vm2945_vm0, %v2916_v42  ;;  %v3852_v27 = vpop.xlane.xlu1 %593  ;;  %v2914_v37 = vmul.f32 %v3831_v33, %v830_v46  ;;  %3267 = vrcp.f32 %v830_v46  ;;  %v3338_v46 = vld [vmem:[#allocation3 + $0x28] sm:$0xff] }
  0xb7   :  { %v5110_v39 = vmax.f32 %v3852_v27, 1e-05 }
  0xb8   :  { %v3262_v43 = vpop.eup %3261  ;;  %2947 = vst.msk [vmem:[%s5108_s3 + $0x8] sm:$0xff] %vm2945_vm0, %v2914_v37  ;;  %v3341_v37 = vld [vmem:[#allocation3 + $0xc0] sm:$0xff] }
  0xb9   :  { %v866_v44 = vmul.f32 127.0, %v3262_v43  ;;  %v3854_v28 = vpop.xlane.xlu0 %584  ;;  %v3334_v43 = vld [vmem:[#allocation3 + $0x8] sm:$0xff] }
  0xba   :  { %v5109_v40 = vmax.f32 %v3854_v28, 1e-05 }
  0xbb   :  { %v941_v48 = vmul.f32 %v3325_v47, %v866_v44  ;;  %v942_v50 = vmul.f32 %v3326_v49, %v866_v44  ;;  %v943_v52 = vmul.f32 %v3327_v51, %v866_v44  ;;  %v944_v54 = vmul.f32 %v3328_v53, %v866_v44  ;;  %v3264_v19 = vpop.eup %3263  ;;  %v3339_v53 = vld [vmem:[#allocation3 + $0x30] sm:$0xff] }
  0xbc   :  { %v945_v56 = vmul.f32 %v3329_v55, %v866_v44  ;;  %v946_v58 = vmul.f32 %v3330_v57, %v866_v44  ;;  %v947_v60 = vmul.f32 %v3331_v59, %v866_v44  ;;  %v948_v62 = vmul.f32 %v3332_v61, %v866_v44  ;;  %v3340_v55 = vld [vmem:[#allocation3 + $0x38] sm:$0xff] }
  0xbd   :  { %v3015_v63 = vround.rtne.f32 %v941_v48  ;;  %v3016_v0 = vround.rtne.f32 %v942_v50  ;;  %v3017_v1 = vround.rtne.f32 %v943_v52  ;;  %v3018_v2 = vround.rtne.f32 %v944_v54  ;;  %v3336_v48 = vld [vmem:[#allocation3 + $0x18] sm:$0xff]  ;;  %v3337_v50 = vld [vmem:[#allocation3 + $0x20] sm:$0xff] }
  0xbe   :  { %v3019_v3 = vround.rtne.f32 %v945_v56  ;;  %v3020_v4 = vround.rtne.f32 %v946_v58  ;;  %v3021_v5 = vround.rtne.f32 %v947_v60  ;;  %v3022_v6 = vround.rtne.f32 %v948_v62  ;;  %v3266_v24 = vpop.eup %3265 }
  0xbf   :  { %v1453_v7 = vmax.f32 %v3015_v63, -128.0  ;;  %v1454_v8 = vmax.f32 %v3016_v0, -128.0  ;;  %v1455_v9 = vmax.f32 %v3017_v1, -128.0  ;;  %v1456_v10 = vmax.f32 %v3018_v2, -128.0 }
  0xc0   :  { %v1457_v11 = vmax.f32 %v3019_v3, -128.0  ;;  %v1458_v12 = vmax.f32 %v3020_v4, -128.0  ;;  %v1459_v13 = vmax.f32 %v3021_v5, -128.0  ;;  %v1460_v14 = vmax.f32 %v3022_v6, -128.0 }
  0xc1   :  { %v1709_v15 = vmin.f32 %v1453_v7, 127.0  ;;  %v1710_v16 = vmin.f32 %v1454_v8, 127.0  ;;  %v1711_v17 = vmin.f32 %v1455_v9, 127.0  ;;  %v1712_v18 = vmin.f32 %v1456_v10, 127.0 }
  0xc2   :  { %v1713_v20 = vmin.f32 %v1457_v11, 127.0  ;;  %v1714_v21 = vmin.f32 %v1458_v12, 127.0  ;;  %v1715_v22 = vmin.f32 %v1459_v13, 127.0  ;;  %v1716_v23 = vmin.f32 %v1460_v14, 127.0 }
  0xc3   :  { %v3848_v25 = vtrunc.f32 %v1709_v15  ;;  %v3850_v26 = vtrunc.f32 %v1710_v16  ;;  %v3856_v29 = vtrunc.f32 %v1711_v17  ;;  %v3858_v30 = vtrunc.f32 %v1712_v18 }
  0xc4   :  { %v3860_v31 = vtrunc.f32 %v1713_v20  ;;  %v3862_v32 = vtrunc.f32 %v1714_v21  ;;  %v3864_v34 = vtrunc.f32 %v1715_v22  ;;  %v3866_v35 = vtrunc.f32 %v1716_v23  ;;  %v3268_v21 = vpop.eup %3267 }
  0xc5   :  { %v862_v36 = vmul.f32 127.0, %v3264_v19  ;;  %v3869_v38 = vmul.f32 127.0, %v3266_v24 }
  0xc7   :  { %v925_v42 = vmul.f32 %v3333_v41, %v862_v36  ;;  %v926_v44 = vmul.f32 %v3334_v43, %v862_v36  ;;  %v927_v47 = vmul.f32 %v3335_v45, %v862_v36  ;;  %v928_v49 = vmul.f32 %v3336_v48, %v862_v36 }
  0xc8   :  { %v929_v51 = vmul.f32 %v3337_v50, %v862_v36  ;;  %v930_v52 = vmul.f32 %v3338_v46, %v862_v36  ;;  %v931_v54 = vmul.f32 %v3339_v53, %v862_v36  ;;  %v932_v56 = vmul.f32 %v3340_v55, %v862_v36 }
  0xc9   :  { %v2999_v57 = vround.rtne.f32 %v925_v42  ;;  %v3000_v58 = vround.rtne.f32 %v926_v44  ;;  %v3001_v59 = vround.rtne.f32 %v927_v47  ;;  %v3002_v60 = vround.rtne.f32 %v928_v49  ;;  %v3342_v42 = vld [vmem:[#allocation3 + $0xc8] sm:$0xff]  ;;  %v3343_v44 = vld [vmem:[#allocation3 + $0xd0] sm:$0xff]  ;;  %v3344_v47 = vld [vmem:[#allocation3 + $0xd8] sm:$0xff] }
  0xca   :  { %v3003_v61 = vround.rtne.f32 %v929_v51  ;;  %v3004_v62 = vround.rtne.f32 %v930_v52  ;;  %v3005_v63 = vround.rtne.f32 %v931_v54  ;;  %v3006_v0 = vround.rtne.f32 %v932_v56  ;;  %v3345_v49 = vld [vmem:[#allocation3 + $0xe0] sm:$0xff]  ;;  %v3346_v51 = vld [vmem:[#allocation3 + $0xe8] sm:$0xff]  ;;  %v3347_v52 = vld [vmem:[#allocation3 + $0xf0] sm:$0xff] }
  0xcb   :  { %v1437_v1 = vmax.f32 %v2999_v57, -128.0  ;;  %v1438_v2 = vmax.f32 %v3000_v58, -128.0  ;;  %v1439_v3 = vmax.f32 %v3001_v59, -128.0  ;;  %v1440_v4 = vmax.f32 %v3002_v60, -128.0  ;;  %v3348_v54 = vld [vmem:[#allocation3 + $0xf8] sm:$0xff]  ;;  %v3901_v60 = vpop.xlane.xlu1 %611 }
  0xcc   :  { %v1441_v5 = vmax.f32 %v3003_v61, -128.0  ;;  %v1442_v6 = vmax.f32 %v3004_v62, -128.0  ;;  %v1443_v7 = vmax.f32 %v3005_v63, -128.0  ;;  %v1444_v8 = vmax.f32 %v3006_v0, -128.0 }
  0xcd   :  { %v1693_v9 = vmin.f32 %v1437_v1, 127.0  ;;  %v1694_v10 = vmin.f32 %v1438_v2, 127.0  ;;  %v1695_v11 = vmin.f32 %v1439_v3, 127.0  ;;  %v1696_v12 = vmin.f32 %v1440_v4, 127.0 }
  0xce   :  { %v1697_v13 = vmin.f32 %v1441_v5, 127.0  ;;  %v1698_v14 = vmin.f32 %v1442_v6, 127.0  ;;  %v1699_v15 = vmin.f32 %v1443_v7, 127.0  ;;  %v1700_v16 = vmin.f32 %v1444_v8, 127.0  ;;  %v3903_v5 = vpop.xlane.xlu0 %602 }
  0xcf   :  { %v3877_v17 = vtrunc.f32 %v1693_v9  ;;  %v3879_v18 = vtrunc.f32 %v1694_v10  ;;  %v3881_v19 = vtrunc.f32 %v1695_v11  ;;  %v3883_v20 = vtrunc.f32 %v1696_v12 }
  0xd0   :  { %v3885_v22 = vtrunc.f32 %v1697_v13  ;;  %v3887_v23 = vtrunc.f32 %v1698_v14  ;;  %v3889_v24 = vtrunc.f32 %v1699_v15  ;;  %v3891_v36 = vtrunc.f32 %v1700_v16 }
  0xd1   :  { %v949_v41 = vmul.f32 %v3341_v37, %v3869_v38  ;;  %v950_v43 = vmul.f32 %v3342_v42, %v3869_v38  ;;  %v951_v45 = vmul.f32 %v3343_v44, %v3869_v38  ;;  %v952_v48 = vmul.f32 %v3344_v47, %v3869_v38  ;;  %v3913_v44 = vpop.xlane.xlu1 %629 }
  0xd2   :  { %v953_v50 = vmul.f32 %v3345_v49, %v3869_v38  ;;  %v954_v46 = vmul.f32 %v3346_v51, %v3869_v38  ;;  %v955_v53 = vmul.f32 %v3347_v52, %v3869_v38  ;;  %v956_v55 = vmul.f32 %v3348_v54, %v3869_v38 }
  0xd3   :  { %v3023_v56 = vround.rtne.f32 %v949_v41  ;;  %v3024_v57 = vround.rtne.f32 %v950_v43  ;;  %v3025_v58 = vround.rtne.f32 %v951_v45  ;;  %v3026_v59 = vround.rtne.f32 %v952_v48 }
  0xd4   :  { %v3027_v61 = vround.rtne.f32 %v953_v50  ;;  %v3028_v62 = vround.rtne.f32 %v954_v46  ;;  %v3029_v63 = vround.rtne.f32 %v955_v53  ;;  %v3030_v0 = vround.rtne.f32 %v956_v55  ;;  %v3930_v53 = vpop.xlane.xlu0 %620 }
  0xd5   :  { %v1461_v1 = vmax.f32 %v3023_v56, -128.0  ;;  %v1462_v2 = vmax.f32 %v3024_v57, -128.0  ;;  %v1463_v3 = vmax.f32 %v3025_v58, -128.0  ;;  %v1464_v4 = vmax.f32 %v3026_v59, -128.0  ;;  %v3349_v59 = vld [vmem:[#allocation3 + $0x40] sm:$0xff] }
  0xd6   :  { %v1465_v6 = vmax.f32 %v3027_v61, -128.0  ;;  %v1466_v7 = vmax.f32 %v3028_v62, -128.0  ;;  %v1467_v8 = vmax.f32 %v3029_v63, -128.0  ;;  %v1468_v38 = vmax.f32 %v3030_v0, -128.0  ;;  %v3350_v62 = vld [vmem:[#allocation3 + $0x48] sm:$0xff] }
  0xd7   :  { %v1717_v9 = vmin.f32 %v1461_v1, 127.0  ;;  %v1718_v10 = vmin.f32 %v1462_v2, 127.0  ;;  %v1719_v11 = vmin.f32 %v1463_v3, 127.0  ;;  %v1720_v12 = vmin.f32 %v1464_v4, 127.0  ;;  %v3351_v2 = vld [vmem:[#allocation3 + $0x50] sm:$0xff]  ;;  %v3352_v4 = vld [vmem:[#allocation3 + $0x58] sm:$0xff] }
  0xd8   :  { %v1721_v13 = vmin.f32 %v1465_v6, 127.0  ;;  %v1722_v14 = vmin.f32 %v1466_v7, 127.0  ;;  %v1723_v15 = vmin.f32 %v1467_v8, 127.0  ;;  %v1724_v16 = vmin.f32 %v1468_v38, 127.0  ;;  %v3353_v7 = vld [vmem:[#allocation3 + $0x60] sm:$0xff]  ;;  %v3354_v38 = vld [vmem:[#allocation3 + $0x68] sm:$0xff]  ;;  %v3958_v1 = vpop.xlane.xlu0 %638 }
  0xd9   :  { %v3905_v37 = vtrunc.f32 %v1717_v9  ;;  %v3907_v41 = vtrunc.f32 %v1718_v10  ;;  %v3909_v42 = vtrunc.f32 %v1719_v11  ;;  %v3911_v43 = vtrunc.f32 %v1720_v12  ;;  %v3355_v10 = vld [vmem:[#allocation3 + $0x70] sm:$0xff]  ;;  %v3356_v12 = vld [vmem:[#allocation3 + $0x78] sm:$0xff] }
  0xda   :  { %v3915_v45 = vtrunc.f32 %v1721_v13  ;;  %v3917_v47 = vtrunc.f32 %v1722_v14  ;;  %v3919_v48 = vtrunc.f32 %v1723_v15  ;;  %v3921_v49 = vtrunc.f32 %v1724_v16  ;;  %v3956_v14 = vpop.xlane.xlu1 %647 }
  0xdb   :  { %v2209_v50 = vpack.c.f32.eXmY %v3848_v25, %v3905_v37, 312  ;;  %v2219_v51 = vpack.c.f32.eXmY %v3850_v26, %v3907_v41, 312  ;;  %v864_v46 = vmul.f32 127.0, %v3268_v21  ;;  %v2918_v52 = vmul.f32 %v3831_v33, %v5110_v39 }
  0xdc   :  { %v2229_v54 = vpack.c.f32.eXmY %v3856_v29, %v3909_v42, 312  ;;  %v2917_v56 = vmul.f32 %v3831_v33, %v5109_v40  ;;  %v836_v57 = vmax.f32 %v3901_v60, 1e-05  ;;  %v5112_v25 = vpack.c.f32.eXmY %v3858_v30, %v3911_v43, 312 }
  0xdd   :  { %v933_v61 = vmul.f32 %v3349_v59, %v864_v46  ;;  %v934_v63 = vmul.f32 %v3350_v62, %v864_v46  ;;  %2951 = vst.msk [vmem:[%s5108_s3 + $0x28] sm:$0xff] %vm2945_vm0, %v2918_v52  ;;  %v935_v3 = vmul.f32 %v3351_v2, %v864_v46  ;;  %v936_v6 = vmul.f32 %v3352_v4, %v864_v46 }
  0xde   :  { %2950 = vst.msk [vmem:[%s5108_s3 + $0x20] sm:$0xff] %vm2945_vm0, %v2917_v56  ;;  %v937_v8 = vmul.f32 %v3353_v7, %v864_v46  ;;  %v938_v9 = vmul.f32 %v3354_v38, %v864_v46  ;;  %v939_v11 = vmul.f32 %v3355_v10, %v864_v46  ;;  %v940_v13 = vmul.f32 %v3356_v12, %v864_v46 }
  0xdf   :  { %v3007_v15 = vround.rtne.f32 %v933_v61  ;;  %v3008_v16 = vround.rtne.f32 %v934_v63  ;;  %v3009_v52 = vround.rtne.f32 %v935_v3  ;;  %v3010_v59 = vround.rtne.f32 %v936_v6 }
  0xe0   :  { %v3011_v62 = vround.rtne.f32 %v937_v8  ;;  %v3012_v2 = vround.rtne.f32 %v938_v9  ;;  %v3013_v4 = vround.rtne.f32 %v939_v11  ;;  %v3014_v40 = vround.rtne.f32 %v940_v13  ;;  %v3960_v11 = vpop.xlane.xlu1 %665 }
  0xe1   :  { %v1445_v56 = vmax.f32 %v3007_v15, -128.0  ;;  %v1446_v7 = vmax.f32 %v3008_v16, -128.0  ;;  %v1447_v0 = vmax.f32 %v3009_v52, -128.0  ;;  %v1448_v38 = vmax.f32 %v3010_v59, -128.0 }
  0xe2   :  { %v1449_v39 = vmax.f32 %v3011_v62, -128.0  ;;  %v1450_v10 = vmax.f32 %v3012_v2, -128.0  ;;  %v1451_v58 = vmax.f32 %v3013_v4, -128.0  ;;  %v1452_v46 = vmax.f32 %v3014_v40, -128.0  ;;  %v3962_v4 = vpop.xlane.xlu0 %656 }
  0xe3   :  { %v1701_v12 = vmin.f32 %v1445_v56, 127.0  ;;  %v1702_v21 = vmin.f32 %v1446_v7, 127.0  ;;  %v1703_v61 = vmin.f32 %v1447_v0, 127.0  ;;  %v1704_v63 = vmin.f32 %v1448_v38, 127.0 }
  0xe4   :  { %v1705_v3 = vmin.f32 %v1449_v39, 127.0  ;;  %v1706_v6 = vmin.f32 %v1450_v10, 127.0  ;;  %v1707_v8 = vmin.f32 %v1451_v58, 127.0  ;;  %v1708_v9 = vmin.f32 %v1452_v46, 127.0 }
  0xe5   :  { %v1957_v13 = vtrunc.f32 %v1701_v12  ;;  %v1958_v55 = vtrunc.f32 %v1702_v21  ;;  %v1959_v15 = vtrunc.f32 %v1703_v61  ;;  %v1960_v16 = vtrunc.f32 %v1704_v63 }
  0xe6   :  { %v1961_v52 = vtrunc.f32 %v1705_v3  ;;  %v1962_v59 = vtrunc.f32 %v1706_v6  ;;  %v1963_v62 = vtrunc.f32 %v1707_v8  ;;  %v1964_v2 = vtrunc.f32 %v1708_v9  ;;  %v3357_v8 = vld [vmem:[#allocation3 + $0x140] sm:$0xff] }
  0xe7   :  { %v2205_v40 = vpack.c.f32.eXmY %v3877_v17, %v1957_v13, 312  ;;  %v2215_v0 = vpack.c.f32.eXmY %v3879_v18, %v1958_v55, 312  ;;  %v2920_v39 = vmul.f32 %v3831_v33, %v836_v57  ;;  %v835_v58 = vmax.f32 %v3903_v5, 1e-05 }
  0xe8   :  { %v2225_v21 = vpack.c.f32.eXmY %v3881_v19, %v1959_v15, 312  ;;  %v2235_v56 = vpack.c.f32.eXmY %v3883_v20, %v1960_v16, 312  ;;  %v838_v7 = vmax.f32 %v3913_v44, 1e-05  ;;  %v837_v38 = vmax.f32 %v3930_v53, 1e-05 }
  0xe9   :  { %v2213_v17 = vpack.c.b8 %v2209_v50, %v2205_v40  ;;  %v2223_v18 = vpack.c.b8 %v2219_v51, %v2215_v0  ;;  %v2245_v55 = vpack.c.f32.eXmY %v3885_v22, %v1961_v52, 312  ;;  %v2255_v5 = vpack.c.f32.eXmY %v3887_v23, %v1962_v59, 312  ;;  %2953 = vst.msk [vmem:[%s5108_s3 + $0x38] sm:$0xff] %vm2945_vm0, %v2920_v39  ;;  %v684_v22 = vpop.xlane.xlu1 %683  ;;  %v3359_v15 = vld [vmem:[#allocation3 + $0x150] sm:$0xff]  ;;  %v3360_v52 = vld [vmem:[#allocation3 + $0x158] sm:$0xff]  ;;  %v3362_v40 = vld [vmem:[#allocation3 + $0x168] sm:$0xff] }
  0xea   :  { %v2233_v19 = vpack.c.b8 %v2229_v54, %v2225_v21  ;;  %v2243_v20 = vpack.c.b8 %v5112_v25, %v2235_v56  ;;  %v2265_v26 = vpack.c.f32.eXmY %v3889_v24, %v1963_v62, 312  ;;  %v2275_v37 = vpack.c.f32.eXmY %v3891_v36, %v1964_v2, 312  ;;  %v3361_v2 = vld [vmem:[#allocation3 + $0x160] sm:$0xff]  ;;  %v3363_v39 = vld [vmem:[#allocation3 + $0x170] sm:$0xff]  ;;  %v3364_v21 = vld [vmem:[#allocation3 + $0x178] sm:$0xff] }
  0xeb   :  { %v5113_v23 = vpack.c.f32.eXmY %v3860_v31, %v3915_v45, 312  ;;  %v5114_v44 = vpack.c.f32.eXmY %v3862_v32, %v3917_v47, 312  ;;  %2845 = vst [vmem:[#allocation6] sm:$0xff] %v2213_v17  ;;  %2846 = vst [vmem:[#allocation6 + $0x8] sm:$0xff] %v2223_v18  ;;  %v5115_v29 = vmax.f32 %v3852_v27, 1e-05  ;;  %v2919_v30 = vmul.f32 %v3831_v33, %v835_v58  ;;  %v675_v45 = vpop.xlane.xlu0 %674 }
  0xec   :  { %v5116_v24 = vpack.c.f32.eXmY %v3864_v34, %v3919_v48, 312  ;;  %v5117_v42 = vpack.c.f32.eXmY %v3866_v35, %v3921_v49, 312  ;;  %2847 = vst [vmem:[#allocation6 + $0x10] sm:$0xff] %v2233_v19  ;;  %2848 = vst [vmem:[#allocation6 + $0x18] sm:$0xff] %v2243_v20  ;;  %v5118_v32 = vmax.f32 %v3854_v28, 1e-05  ;;  %v2922_v43 = vmul.f32 %v3831_v33, %v838_v7 }
  0xed   :  { %v2253_v41 = vpack.c.b8 %v5113_v23, %v2245_v55  ;;  %v2263_v50 = vpack.c.b8 %v5114_v44, %v2255_v5  ;;  %3269 = vrcp.f32 %v5115_v29  ;;  %2952 = vst.msk [vmem:[%s5108_s3 + $0x30] sm:$0xff] %vm2945_vm0, %v2919_v30  ;;  %v2921_v27 = vmul.f32 %v3831_v33, %v837_v38 }
  0xee   :  { %v2273_v36 = vpack.c.b8 %v5116_v24, %v2265_v26  ;;  %v2283_v31 = vpack.c.b8 %v5117_v42, %v2275_v37  ;;  %3271 = vrcp.f32 %v5118_v32  ;;  %v840_v34 = vmax.f32 %v3956_v14, 1e-05  ;;  %2955 = vst.msk [vmem:[%s5108_s3 + $0x48] sm:$0xff] %vm2945_vm0, %v2922_v43 }
  0xef   :  { %2849 = vst [vmem:[#allocation6 + $0x20] sm:$0xff] %v2253_v41  ;;  %2850 = vst [vmem:[#allocation6 + $0x28] sm:$0xff] %v2263_v50  ;;  %3273 = vrcp.f32 %v836_v57  ;;  %v839_v28 = vmax.f32 %v3958_v1, 1e-05  ;;  %v842_v35 = vmax.f32 %v3960_v11, 1e-05  ;;  %v4036_v1 = vpop.xlane.xlu1 %701 }
  0xf0   :  { %2851 = vst [vmem:[#allocation6 + $0x30] sm:$0xff] %v2273_v36  ;;  %2852 = vst [vmem:[#allocation6 + $0x38] sm:$0xff] %v2283_v31  ;;  %3275 = vrcp.f32 %v835_v58  ;;  %v841_v60 = vmax.f32 %v3962_v4, 1e-05  ;;  %v844_v47 = vmax.f32 %v684_v22, 1e-05  ;;  %v2924_v48 = vmul.f32 %v3831_v33, %v840_v34 }
  0xf1   :  { %3277 = vrcp.f32 %v838_v7  ;;  %2954 = vst.msk [vmem:[%s5108_s3 + $0x40] sm:$0xff] %vm2945_vm0, %v2921_v27  ;;  %v2923_v49 = vmul.f32 %v3831_v33, %v839_v28  ;;  %v843_v51 = vmax.f32 %v675_v45, 1e-05  ;;  %v2926_v53 = vmul.f32 %v3831_v33, %v842_v35  ;;  %v3358_v11 = vld [vmem:[#allocation3 + $0x148] sm:$0xff] }
  0xf2   :  { %3279 = vrcp.f32 %v837_v38  ;;  %v2925_v54 = vmul.f32 %v3831_v33, %v841_v60  ;;  %v2928_v57 = vmul.f32 %v3831_v33, %v844_v47  ;;  %2957 = vst.msk [vmem:[%s5108_s3 + $0x58] sm:$0xff] %vm2945_vm0, %v2924_v48  ;;  %v5111_v10 = vmax.f32 %v4036_v1, 1e-05 }
  0xf3   :  { %3281 = vrcp.f32 %v840_v34  ;;  %2956 = vst.msk [vmem:[%s5108_s3 + $0x50] sm:$0xff] %vm2945_vm0, %v2923_v49  ;;  %v2927_v14 = vmul.f32 %v3831_v33, %v843_v51  ;;  %2959 = vst.msk [vmem:[%s5108_s3 + $0x68] sm:$0xff] %vm2945_vm0, %v2926_v53 }
  0xf4   :  { %3283 = vrcp.f32 %v839_v28  ;;  %2958 = vst.msk [vmem:[%s5108_s3 + $0x60] sm:$0xff] %vm2945_vm0, %v2925_v54  ;;  %2961 = vst.msk [vmem:[%s5108_s3 + $0x78] sm:$0xff] %vm2945_vm0, %v2928_v57 }
  0xf5   :  { %3285 = vrcp.f32 %v842_v35  ;;  %2960 = vst.msk [vmem:[%s5108_s3 + $0x70] sm:$0xff] %vm2945_vm0, %v2927_v14 }
  0xf6   :  { %3287 = vrcp.f32 %v841_v60 }
  0xf7   :  { %v3270_v46 = vpop.eup %3269  ;;  %3289 = vrcp.f32 %v844_v47 }
  0xf8   :  { %v3272_v12 = vpop.eup %3271  ;;  %v872_v61 = vmul.f32 127.0, %v3270_v46  ;;  %3291 = vrcp.f32 %v843_v51 }
  0xf9   :  { %v4064_v63 = vpop.eup %3273  ;;  %v4066_v3 = vmul.f32 127.0, %v3272_v12  ;;  %3293 = vrcp.f32 %v5111_v10 }
  0xfa   :  { %v4070_v6 = vpop.eup %3275  ;;  %v965_v9 = vmul.f32 %v3357_v8, %v872_v61  ;;  %v966_v13 = vmul.f32 %v3358_v11, %v872_v61  ;;  %v967_v16 = vmul.f32 %v3359_v15, %v872_v61  ;;  %v968_v59 = vmul.f32 %v3360_v52, %v872_v61 }
  0xfb   :  { %v4072_v62 = vpop.eup %3277  ;;  %v969_v4 = vmul.f32 %v3361_v2, %v872_v61  ;;  %v970_v0 = vmul.f32 %v3362_v40, %v872_v61  ;;  %v971_v58 = vmul.f32 %v3363_v39, %v872_v61  ;;  %v972_v56 = vmul.f32 %v3364_v21, %v872_v61  ;;  %v3365_v61 = vld [vmem:[#allocation3 + $0x100] sm:$0xff] }
  0xfc   :  { %v4074_v7 = vpop.eup %3279  ;;  %v3039_v38 = vround.rtne.f32 %v965_v9  ;;  %v3040_v17 = vround.rtne.f32 %v966_v13  ;;  %v3041_v18 = vround.rtne.f32 %v967_v16  ;;  %v3042_v55 = vround.rtne.f32 %v968_v59  ;;  %v3366_v9 = vld [vmem:[#allocation3 + $0x108] sm:$0xff]  ;;  %v3367_v13 = vld [vmem:[#allocation3 + $0x110] sm:$0xff]  ;;  %v3368_v16 = vld [vmem:[#allocation3 + $0x118] sm:$0xff] }
  0xfd   :  { %v4076_v5 = vpop.eup %3281  ;;  %v3043_v19 = vround.rtne.f32 %v969_v4  ;;  %v3044_v25 = vround.rtne.f32 %v970_v0  ;;  %v3045_v20 = vround.rtne.f32 %v971_v58  ;;  %v3046_v26 = vround.rtne.f32 %v972_v56  ;;  %v3369_v59 = vld [vmem:[#allocation3 + $0x120] sm:$0xff]  ;;  %v3370_v4 = vld [vmem:[#allocation3 + $0x128] sm:$0xff]  ;;  %v3371_v0 = vld [vmem:[#allocation3 + $0x130] sm:$0xff] }
  0xfe   :  { %v4078_v37 = vpop.eup %3283  ;;  %v1477_v22 = vmax.f32 %v3039_v38, -128.0  ;;  %v1478_v23 = vmax.f32 %v3040_v17, -128.0  ;;  %v1479_v41 = vmax.f32 %v3041_v18, -128.0  ;;  %v1480_v44 = vmax.f32 %v3042_v55, -128.0  ;;  %v3372_v58 = vld [vmem:[#allocation3 + $0x138] sm:$0xff] }
  0xff   :  { %v4080_v50 = vpop.eup %3285  ;;  %v1481_v29 = vmax.f32 %v3043_v19, -128.0  ;;  %v1482_v30 = vmax.f32 %v3044_v25, -128.0  ;;  %v1483_v24 = vmax.f32 %v3045_v20, -128.0  ;;  %v1484_v36 = vmax.f32 %v3046_v26, -128.0 }
 0x100   :  { %v4082_v42 = vpop.eup %3287  ;;  %v1733_v31 = vmin.f32 %v1477_v22, 127.0  ;;  %v1734_v32 = vmin.f32 %v1478_v23, 127.0  ;;  %v1735_v43 = vmin.f32 %v1479_v41, 127.0  ;;  %v1736_v45 = vmin.f32 %v1480_v44, 127.0 }
 0x101   :  { %v4084_v27 = vpop.eup %3289  ;;  %v1737_v34 = vmin.f32 %v1481_v29, 127.0  ;;  %v1738_v28 = vmin.f32 %v1482_v30, 127.0  ;;  %v1739_v35 = vmin.f32 %v1483_v24, 127.0  ;;  %v1740_v60 = vmin.f32 %v1484_v36, 127.0 }
 0x102   :  { %v4086_v47 = vpop.eup %3291  ;;  %v4088_v48 = vtrunc.f32 %v1733_v31  ;;  %v4090_v49 = vtrunc.f32 %v1734_v32  ;;  %v4092_v51 = vtrunc.f32 %v1735_v43  ;;  %v4094_v53 = vtrunc.f32 %v1736_v45 }
 0x103   :  { %v4096_v54 = vpop.eup %3293  ;;  %v4098_v57 = vtrunc.f32 %v1737_v34  ;;  %v4100_v14 = vtrunc.f32 %v1738_v28  ;;  %v4102_v46 = vtrunc.f32 %v1739_v35  ;;  %v4104_v12 = vtrunc.f32 %v1740_v60 }
 0x104   :  { %v957_v8 = vmul.f32 %v3365_v61, %v4066_v3  ;;  %v958_v11 = vmul.f32 %v3366_v9, %v4066_v3  ;;  %v959_v15 = vmul.f32 %v3367_v13, %v4066_v3  ;;  %v960_v52 = vmul.f32 %v3368_v16, %v4066_v3 }
 0x105   :  { %v961_v2 = vmul.f32 %v3369_v59, %v4066_v3  ;;  %v962_v40 = vmul.f32 %v3370_v4, %v4066_v3  ;;  %v963_v39 = vmul.f32 %v3371_v0, %v4066_v3  ;;  %v964_v21 = vmul.f32 %v3372_v58, %v4066_v3 }
 0x106   :  { %v3031_v56 = vround.rtne.f32 %v957_v8  ;;  %v3032_v38 = vround.rtne.f32 %v958_v11  ;;  %v3033_v17 = vround.rtne.f32 %v959_v15  ;;  %v3034_v18 = vround.rtne.f32 %v960_v52 }
 0x107   :  { %v3035_v55 = vround.rtne.f32 %v961_v2  ;;  %v3036_v19 = vround.rtne.f32 %v962_v40  ;;  %v3037_v25 = vround.rtne.f32 %v963_v39  ;;  %v3038_v20 = vround.rtne.f32 %v964_v21 }
 0x108   :  { %v1469_v26 = vmax.f32 %v3031_v56, -128.0  ;;  %v1470_v22 = vmax.f32 %v3032_v38, -128.0  ;;  %v1471_v23 = vmax.f32 %v3033_v17, -128.0  ;;  %v1472_v41 = vmax.f32 %v3034_v18, -128.0  ;;  %v3374_v56 = vld [vmem:[#allocation3 + $0x1c8] sm:$0xff]  ;;  %v3375_v18 = vld [vmem:[#allocation3 + $0x1d0] sm:$0xff] }
 0x109   :  { %v1473_v44 = vmax.f32 %v3035_v55, -128.0  ;;  %v1474_v29 = vmax.f32 %v3036_v19, -128.0  ;;  %v1475_v30 = vmax.f32 %v3037_v25, -128.0  ;;  %v1476_v24 = vmax.f32 %v3038_v20, -128.0  ;;  %v3377_v25 = vld [vmem:[#allocation3 + $0x1e0] sm:$0xff] }
 0x10a   :  { %v1725_v36 = vmin.f32 %v1469_v26, 127.0  ;;  %v1726_v31 = vmin.f32 %v1470_v22, 127.0  ;;  %v1727_v32 = vmin.f32 %v1471_v23, 127.0  ;;  %v1728_v3 = vmin.f32 %v1472_v41, 127.0  ;;  %v3378_v26 = vld [vmem:[#allocation3 + $0x1e8] sm:$0xff]  ;;  %v3379_v23 = vld [vmem:[#allocation3 + $0x1f0] sm:$0xff] }
 0x10b   :  { %v1729_v43 = vmin.f32 %v1473_v44, 127.0  ;;  %v1730_v45 = vmin.f32 %v1474_v29, 127.0  ;;  %v1731_v34 = vmin.f32 %v1475_v30, 127.0  ;;  %v1732_v28 = vmin.f32 %v1476_v24, 127.0  ;;  %v3380_v44 = vld [vmem:[#allocation3 + $0x1f8] sm:$0xff] }
 0x10c   :  { %v4114_v35 = vtrunc.f32 %v1725_v36  ;;  %v4116_v60 = vtrunc.f32 %v1726_v31  ;;  %v4118_v61 = vtrunc.f32 %v1727_v32  ;;  %v4120_v8 = vtrunc.f32 %v1728_v3 }
 0x10d   :  { %v4122_v9 = vtrunc.f32 %v1729_v43  ;;  %v4124_v11 = vtrunc.f32 %v1730_v45  ;;  %v4126_v13 = vtrunc.f32 %v1731_v34  ;;  %v4128_v15 = vtrunc.f32 %v1732_v28 }
 0x10e   :  { %v876_v59 = vmul.f32 127.0, %v4064_v63  ;;  %v4136_v2 = vmul.f32 127.0, %v4070_v6  ;;  %v4143_v0 = vmul.f32 127.0, %v4072_v62  ;;  %v4146_v39 = vmul.f32 127.0, %v4074_v7  ;;  %v3373_v6 = vld [vmem:[#allocation3 + $0x1c0] sm:$0xff]  ;;  %v3376_v7 = vld [vmem:[#allocation3 + $0x1d8] sm:$0xff] }
 0x110   :  { %v981_v21 = vmul.f32 %v3373_v6, %v876_v59  ;;  %v982_v38 = vmul.f32 %v3374_v56, %v876_v59  ;;  %v983_v55 = vmul.f32 %v3375_v18, %v876_v59  ;;  %v984_v19 = vmul.f32 %v3376_v7, %v876_v59 }
 0x111   :  { %v985_v20 = vmul.f32 %v3377_v25, %v876_v59  ;;  %v986_v22 = vmul.f32 %v3378_v26, %v876_v59  ;;  %v987_v41 = vmul.f32 %v3379_v23, %v876_v59  ;;  %v988_v29 = vmul.f32 %v3380_v44, %v876_v59 }
 0x112   :  { %v3055_v30 = vround.rtne.f32 %v981_v21  ;;  %v3056_v24 = vround.rtne.f32 %v982_v38  ;;  %v3057_v36 = vround.rtne.f32 %v983_v55  ;;  %v3058_v31 = vround.rtne.f32 %v984_v19 }
 0x113   :  { %v3059_v32 = vround.rtne.f32 %v985_v20  ;;  %v3060_v3 = vround.rtne.f32 %v986_v22  ;;  %v3061_v43 = vround.rtne.f32 %v987_v41  ;;  %v3062_v45 = vround.rtne.f32 %v988_v29 }
 0x114   :  { %v1493_v34 = vmax.f32 %v3055_v30, -128.0  ;;  %v1494_v28 = vmax.f32 %v3056_v24, -128.0  ;;  %v1495_v6 = vmax.f32 %v3057_v36, -128.0  ;;  %v1496_v56 = vmax.f32 %v3058_v31, -128.0  ;;  %v3381_v31 = vld [vmem:[#allocation3 + $0x180] sm:$0xff] }
 0x115   :  { %v1497_v18 = vmax.f32 %v3059_v32, -128.0  ;;  %v1498_v7 = vmax.f32 %v3060_v3, -128.0  ;;  %v1499_v25 = vmax.f32 %v3061_v43, -128.0  ;;  %v1500_v26 = vmax.f32 %v3062_v45, -128.0  ;;  %v3382_v3 = vld [vmem:[#allocation3 + $0x188] sm:$0xff]  ;;  %v3383_v43 = vld [vmem:[#allocation3 + $0x190] sm:$0xff] }
 0x116   :  { %v1749_v10 = vmin.f32 %v1493_v34, 127.0  ;;  %v1750_v23 = vmin.f32 %v1494_v28, 127.0  ;;  %v1751_v62 = vmin.f32 %v1495_v6, 127.0  ;;  %v1752_v59 = vmin.f32 %v1496_v56, 127.0  ;;  %v3384_v45 = vld [vmem:[#allocation3 + $0x198] sm:$0xff]  ;;  %v3385_v28 = vld [vmem:[#allocation3 + $0x1a0] sm:$0xff] }
 0x117   :  { %v1753_v21 = vmin.f32 %v1497_v18, 127.0  ;;  %v1754_v38 = vmin.f32 %v1498_v7, 127.0  ;;  %v1755_v55 = vmin.f32 %v1499_v25, 127.0  ;;  %v1756_v19 = vmin.f32 %v1500_v26, 127.0  ;;  %v3386_v56 = vld [vmem:[#allocation3 + $0x1a8] sm:$0xff]  ;;  %v3387_v7 = vld [vmem:[#allocation3 + $0x1b0] sm:$0xff] }
 0x118   :  { %v4156_v20 = vtrunc.f32 %v1749_v10  ;;  %v4158_v22 = vtrunc.f32 %v1750_v23  ;;  %v4160_v41 = vtrunc.f32 %v1751_v62  ;;  %v4162_v44 = vtrunc.f32 %v1752_v59  ;;  %v3388_v26 = vld [vmem:[#allocation3 + $0x1b8] sm:$0xff] }
 0x119   :  { %v4164_v29 = vtrunc.f32 %v1753_v21  ;;  %v4166_v30 = vtrunc.f32 %v1754_v38  ;;  %v4168_v24 = vtrunc.f32 %v1755_v55  ;;  %v4170_v36 = vtrunc.f32 %v1756_v19 }
 0x11a   :  { %v973_v32 = vmul.f32 %v3381_v31, %v4136_v2  ;;  %v974_v10 = vmul.f32 %v3382_v3, %v4136_v2  ;;  %v975_v62 = vmul.f32 %v3383_v43, %v4136_v2  ;;  %v976_v34 = vmul.f32 %v3384_v45, %v4136_v2 }
 0x11b   :  { %v977_v6 = vmul.f32 %v3385_v28, %v4136_v2  ;;  %v978_v18 = vmul.f32 %v3386_v56, %v4136_v2  ;;  %v979_v25 = vmul.f32 %v3387_v7, %v4136_v2  ;;  %v980_v23 = vmul.f32 %v3388_v26, %v4136_v2 }
 0x11c   :  { %v3047_v59 = vround.rtne.f32 %v973_v32  ;;  %v3048_v21 = vround.rtne.f32 %v974_v10  ;;  %v3049_v38 = vround.rtne.f32 %v975_v62  ;;  %v3050_v55 = vround.rtne.f32 %v976_v34 }
 0x11d   :  { %v3051_v19 = vround.rtne.f32 %v977_v6  ;;  %v3052_v31 = vround.rtne.f32 %v978_v18  ;;  %v3053_v3 = vround.rtne.f32 %v979_v25  ;;  %v3054_v43 = vround.rtne.f32 %v980_v23 }
 0x11e   :  { %v1485_v45 = vmax.f32 %v3047_v59, -128.0  ;;  %v1486_v17 = vmax.f32 %v3048_v21, -128.0  ;;  %v1487_v28 = vmax.f32 %v3049_v38, -128.0  ;;  %v1488_v63 = vmax.f32 %v3050_v55, -128.0 }
 0x11f   :  { %v1489_v58 = vmax.f32 %v3051_v19, -128.0  ;;  %v1490_v56 = vmax.f32 %v3052_v31, -128.0  ;;  %v1491_v40 = vmax.f32 %v3053_v3, -128.0  ;;  %v1492_v4 = vmax.f32 %v3054_v43, -128.0  ;;  %v3389_v31 = vld [vmem:[#allocation3 + $0x240] sm:$0xff]  ;;  %v3392_v3 = vld [vmem:[#allocation3 + $0x258] sm:$0xff] }
 0x120   :  { %v1741_v7 = vmin.f32 %v1485_v45, 127.0  ;;  %v1742_v52 = vmin.f32 %v1486_v17, 127.0  ;;  %v1743_v16 = vmin.f32 %v1487_v28, 127.0  ;;  %v1744_v2 = vmin.f32 %v1488_v63, 127.0  ;;  %v3390_v63 = vld [vmem:[#allocation3 + $0x248] sm:$0xff] }
 0x121   :  { %v1745_v32 = vmin.f32 %v1489_v58, 127.0  ;;  %v1746_v10 = vmin.f32 %v1490_v56, 127.0  ;;  %v1747_v62 = vmin.f32 %v1491_v40, 127.0  ;;  %v1748_v34 = vmin.f32 %v1492_v4, 127.0 }
 0x122   :  { %v1997_v6 = vtrunc.f32 %v1741_v7  ;;  %v1998_v18 = vtrunc.f32 %v1742_v52  ;;  %v1999_v25 = vtrunc.f32 %v1743_v16  ;;  %v2000_v26 = vtrunc.f32 %v1744_v2  ;;  %v3391_v16 = vld [vmem:[#allocation3 + $0x250] sm:$0xff] }
 0x123   :  { %v2001_v23 = vtrunc.f32 %v1745_v32  ;;  %v2002_v59 = vtrunc.f32 %v1746_v10  ;;  %v2003_v21 = vtrunc.f32 %v1747_v62  ;;  %v2004_v38 = vtrunc.f32 %v1748_v34 }
 0x124   :  { %v2289_v55 = vpack.c.f32.eXmY %v1997_v6, %v4156_v20, 312  ;;  %v2299_v19 = vpack.c.f32.eXmY %v1998_v18, %v4158_v22, 312  ;;  %v997_v17 = vmul.f32 %v3389_v31, %v4143_v0  ;;  %v998_v58 = vmul.f32 %v3390_v63, %v4143_v0 }
 0x125   :  { %v2309_v4 = vpack.c.f32.eXmY %v1999_v25, %v4160_v41, 312  ;;  %v2319_v52 = vpack.c.f32.eXmY %v2000_v26, %v4162_v44, 312  ;;  %v999_v40 = vmul.f32 %v3391_v16, %v4143_v0  ;;  %v1000_v43 = vmul.f32 %v3392_v3, %v4143_v0 }
 0x126   :  { %v5119_v20 = vpack.c.f32.eXmY %v4114_v35, %v4088_v48, 312  ;;  %v5120_v45 = vpack.c.f32.eXmY %v4116_v60, %v4090_v49, 312  ;;  %v3071_v34 = vround.rtne.f32 %v997_v17  ;;  %v3072_v6 = vround.rtne.f32 %v998_v58 }
 0x127   :  { %v2329_v56 = vpack.c.f32.eXmY %v2001_v23, %v4164_v29, 312  ;;  %v2339_v41 = vpack.c.f32.eXmY %v2002_v59, %v4166_v30, 312  ;;  %v3394_v30 = vld [vmem:[#allocation3 + $0x268] sm:$0xff]  ;;  %v3073_v18 = vround.rtne.f32 %v999_v40  ;;  %v3074_v25 = vround.rtne.f32 %v1000_v43 }
 0x128   :  { %v2293_v22 = vpack.c.b8 %v2289_v55, %v5119_v20  ;;  %v2303_v28 = vpack.c.b8 %v2299_v19, %v5120_v45  ;;  %v5121_v44 = vpack.c.f32.eXmY %v4118_v61, %v4092_v51, 312  ;;  %v5122_v2 = vpack.c.f32.eXmY %v4120_v8, %v4094_v53, 312  ;;  %v3393_v51 = vld [vmem:[#allocation3 + $0x260] sm:$0xff] }
 0x129   :  { %v2349_v10 = vpack.c.f32.eXmY %v2003_v21, %v4168_v24, 312  ;;  %v2359_v48 = vpack.c.f32.eXmY %v2004_v38, %v4170_v36, 312  ;;  %v1001_v61 = vmul.f32 %v3393_v51, %v4143_v0  ;;  %v1002_v53 = vmul.f32 %v3394_v30, %v4143_v0  ;;  %v3396_v36 = vld [vmem:[#allocation3 + $0x278] sm:$0xff]  ;;  %v3402_v51 = vld [vmem:[#allocation3 + $0x228] sm:$0xff]  ;;  %v3403_v30 = vld [vmem:[#allocation3 + $0x230] sm:$0xff] }
 0x12a   :  { %v2313_v7 = vpack.c.b8 %v2309_v4, %v5121_v44  ;;  %v2323_v32 = vpack.c.b8 %v2319_v52, %v5122_v2  ;;  %v5123_v49 = vpack.c.f32.eXmY %v4122_v9, %v4098_v57, 312  ;;  %v5124_v60 = vpack.c.f32.eXmY %v4124_v11, %v4100_v14, 312  ;;  %2853 = vst [vmem:[#allocation6 + $0x40] sm:$0xff] %v2293_v22  ;;  %v3395_v14 = vld [vmem:[#allocation3 + $0x270] sm:$0xff]  ;;  %v3397_v44 = vld [vmem:[#allocation3 + $0x200] sm:$0xff]  ;;  %v3398_v2 = vld [vmem:[#allocation3 + $0x208] sm:$0xff] }
 0x12b   :  { %2854 = vst [vmem:[#allocation6 + $0x48] sm:$0xff] %v2303_v28  ;;  %v5125_v8 = vpack.c.f32.eXmY %v4126_v13, %v4102_v46, 312  ;;  %v5126_v57 = vpack.c.f32.eXmY %v4128_v15, %v4104_v12, 312  ;;  %v1003_v11 = vmul.f32 %v3395_v14, %v4143_v0  ;;  %v1004_v62 = vmul.f32 %v3396_v36, %v4143_v0 }
 0x12c   :  { %v2333_v35 = vpack.c.b8 %v2329_v56, %v5123_v49  ;;  %v2343_v29 = vpack.c.b8 %v2339_v41, %v5124_v60  ;;  %2855 = vst [vmem:[#allocation6 + $0x50] sm:$0xff] %v2313_v7  ;;  %2856 = vst [vmem:[#allocation6 + $0x58] sm:$0xff] %v2323_v32  ;;  %v3075_v46 = vround.rtne.f32 %v1001_v61  ;;  %v3076_v13 = vround.rtne.f32 %v1002_v53  ;;  %v3400_v49 = vld [vmem:[#allocation3 + $0x218] sm:$0xff]  ;;  %v3401_v60 = vld [vmem:[#allocation3 + $0x220] sm:$0xff] }
 0x12d   :  { %v2353_v24 = vpack.c.b8 %v2349_v10, %v5125_v8  ;;  %v2363_v9 = vpack.c.b8 %v2359_v48, %v5126_v57  ;;  %v3077_v12 = vround.rtne.f32 %v1003_v11  ;;  %v3078_v15 = vround.rtne.f32 %v1004_v62  ;;  %v3399_v10 = vld [vmem:[#allocation3 + $0x210] sm:$0xff]  ;;  %v3404_v8 = vld [vmem:[#allocation3 + $0x238] sm:$0xff] }
 0x12e   :  { %2857 = vst [vmem:[#allocation6 + $0x60] sm:$0xff] %v2333_v35  ;;  %2858 = vst [vmem:[#allocation6 + $0x68] sm:$0xff] %v2343_v29  ;;  %v1509_v26 = vmax.f32 %v3071_v34, -128.0  ;;  %v1510_v23 = vmax.f32 %v3072_v6, -128.0  ;;  %v1511_v59 = vmax.f32 %v3073_v18, -128.0  ;;  %v1512_v21 = vmax.f32 %v3074_v25, -128.0 }
 0x12f   :  { %2859 = vst [vmem:[#allocation6 + $0x70] sm:$0xff] %v2353_v24  ;;  %2860 = vst [vmem:[#allocation6 + $0x78] sm:$0xff] %v2363_v9  ;;  %v1513_v38 = vmax.f32 %v3075_v46, -128.0  ;;  %v1514_v55 = vmax.f32 %v3076_v13, -128.0  ;;  %v1515_v19 = vmax.f32 %v3077_v12, -128.0  ;;  %v1516_v0 = vmax.f32 %v3078_v15, -128.0 }
 0x130   :  { %v1765_v31 = vmin.f32 %v1509_v26, 127.0  ;;  %v1766_v63 = vmin.f32 %v1510_v23, 127.0  ;;  %v1767_v17 = vmin.f32 %v1511_v59, 127.0  ;;  %v1768_v58 = vmin.f32 %v1512_v21, 127.0 }
 0x131   :  { %v1769_v4 = vmin.f32 %v1513_v38, 127.0  ;;  %v1770_v52 = vmin.f32 %v1514_v55, 127.0  ;;  %v1771_v16 = vmin.f32 %v1515_v19, 127.0  ;;  %v1772_v40 = vmin.f32 %v1516_v0, 127.0 }
 0x132   :  { %v4220_v3 = vtrunc.f32 %v1765_v31  ;;  %v4222_v43 = vtrunc.f32 %v1766_v63  ;;  %v4224_v20 = vtrunc.f32 %v1767_v17  ;;  %v4226_v22 = vtrunc.f32 %v1768_v58 }
 0x133   :  { %v4228_v45 = vtrunc.f32 %v1769_v4  ;;  %v4230_v28 = vtrunc.f32 %v1770_v52  ;;  %v4232_v56 = vtrunc.f32 %v1771_v16  ;;  %v4234_v41 = vtrunc.f32 %v1772_v40 }
 0x134   :  { %v989_v7 = vmul.f32 %v3397_v44, %v4146_v39  ;;  %v990_v32 = vmul.f32 %v3398_v2, %v4146_v39  ;;  %v991_v48 = vmul.f32 %v3399_v10, %v4146_v39  ;;  %v992_v35 = vmul.f32 %v3400_v49, %v4146_v39 }
 0x135   :  { %v993_v29 = vmul.f32 %v3401_v60, %v4146_v39  ;;  %v994_v61 = vmul.f32 %v3402_v51, %v4146_v39  ;;  %v995_v53 = vmul.f32 %v3403_v30, %v4146_v39  ;;  %v996_v24 = vmul.f32 %v3404_v8, %v4146_v39  ;;  %v3407_v8 = vld [vmem:[#allocation3 + $0x2d0] sm:$0xff] }
 0x136   :  { %v3063_v57 = vround.rtne.f32 %v989_v7  ;;  %v3064_v9 = vround.rtne.f32 %v990_v32  ;;  %v3065_v14 = vround.rtne.f32 %v991_v48  ;;  %v3066_v11 = vround.rtne.f32 %v992_v35 }
 0x137   :  { %v3067_v36 = vround.rtne.f32 %v993_v29  ;;  %v3068_v62 = vround.rtne.f32 %v994_v61  ;;  %v3069_v34 = vround.rtne.f32 %v995_v53  ;;  %v3070_v6 = vround.rtne.f32 %v996_v24  ;;  %v3406_v61 = vld [vmem:[#allocation3 + $0x2c8] sm:$0xff] }
 0x138   :  { %v1501_v18 = vmax.f32 %v3063_v57, -128.0  ;;  %v1502_v25 = vmax.f32 %v3064_v9, -128.0  ;;  %v1503_v46 = vmax.f32 %v3065_v14, -128.0  ;;  %v1504_v13 = vmax.f32 %v3066_v11, -128.0  ;;  %v3409_v9 = vld [vmem:[#allocation3 + $0x2e0] sm:$0xff]  ;;  %v3410_v11 = vld [vmem:[#allocation3 + $0x2e8] sm:$0xff] }
 0x139   :  { %v1505_v12 = vmax.f32 %v3067_v36, -128.0  ;;  %v1506_v15 = vmax.f32 %v3068_v62, -128.0  ;;  %v1507_v26 = vmax.f32 %v3069_v34, -128.0  ;;  %v1508_v23 = vmax.f32 %v3070_v6, -128.0  ;;  %v3411_v62 = vld [vmem:[#allocation3 + $0x2f0] sm:$0xff]  ;;  %v3412_v6 = vld [vmem:[#allocation3 + $0x2f8] sm:$0xff] }
 0x13a   :  { %v1757_v59 = vmin.f32 %v1501_v18, 127.0  ;;  %v1758_v21 = vmin.f32 %v1502_v25, 127.0  ;;  %v1759_v38 = vmin.f32 %v1503_v46, 127.0  ;;  %v1760_v39 = vmin.f32 %v1504_v13, 127.0 }
 0x13b   :  { %v1761_v55 = vmin.f32 %v1505_v12, 127.0  ;;  %v1762_v19 = vmin.f32 %v1506_v15, 127.0  ;;  %v1763_v0 = vmin.f32 %v1507_v26, 127.0  ;;  %v1764_v31 = vmin.f32 %v1508_v23, 127.0 }
 0x13c   :  { %v4244_v63 = vtrunc.f32 %v1757_v59  ;;  %v4246_v17 = vtrunc.f32 %v1758_v21  ;;  %v4248_v58 = vtrunc.f32 %v1759_v38  ;;  %v4250_v4 = vtrunc.f32 %v1760_v39 }
 0x13d   :  { %v4252_v52 = vtrunc.f32 %v1761_v55  ;;  %v4254_v16 = vtrunc.f32 %v1762_v19  ;;  %v4256_v40 = vtrunc.f32 %v1763_v0  ;;  %v4258_v44 = vtrunc.f32 %v1764_v31 }
 0x13e   :  { %v2365_v7 = vpack.c.f32.eXmY %v4244_v63, %v4220_v3, 312  ;;  %v2375_v2 = vpack.c.f32.eXmY %v4246_v17, %v4222_v43, 312  ;;  %v884_v32 = vmul.f32 127.0, %v4076_v5  ;;  %v4266_v10 = vmul.f32 127.0, %v4078_v37  ;;  %v3405_v37 = vld [vmem:[#allocation3 + $0x2c0] sm:$0xff] }
 0x13f   :  { %v2385_v48 = vpack.c.f32.eXmY %v4248_v58, %v4224_v20, 312  ;;  %v2395_v49 = vpack.c.f32.eXmY %v4250_v4, %v4226_v22, 312  ;;  %v4273_v35 = vmul.f32 127.0, %v4080_v50  ;;  %v4276_v60 = vmul.f32 127.0, %v4082_v42  ;;  %v3408_v42 = vld [vmem:[#allocation3 + $0x2d8] sm:$0xff]  ;;  %v3425_v20 = vld [vmem:[#allocation3 + $0x360] sm:$0xff] }
 0x140   :  { %v1013_v51 = vmul.f32 %v3405_v37, %v884_v32  ;;  %v1014_v30 = vmul.f32 %v3406_v61, %v884_v32  ;;  %v1015_v24 = vmul.f32 %v3407_v8, %v884_v32  ;;  %v1016_v57 = vmul.f32 %v3408_v42, %v884_v32 }
 0x141   :  { %v1017_v14 = vmul.f32 %v3409_v9, %v884_v32  ;;  %v1018_v36 = vmul.f32 %v3410_v11, %v884_v32  ;;  %v1019_v34 = vmul.f32 %v3411_v62, %v884_v32  ;;  %v1020_v18 = vmul.f32 %v3412_v6, %v884_v32 }
 0x142   :  { %v3087_v25 = vround.rtne.f32 %v1013_v51  ;;  %v3088_v46 = vround.rtne.f32 %v1014_v30  ;;  %v3089_v13 = vround.rtne.f32 %v1015_v24  ;;  %v3090_v12 = vround.rtne.f32 %v1016_v57 }
 0x143   :  { %v3091_v15 = vround.rtne.f32 %v1017_v14  ;;  %v3092_v26 = vround.rtne.f32 %v1018_v36  ;;  %v3093_v23 = vround.rtne.f32 %v1019_v34  ;;  %v3094_v59 = vround.rtne.f32 %v1020_v18 }
 0x144   :  { %v1525_v21 = vmax.f32 %v3087_v25, -128.0  ;;  %v1526_v38 = vmax.f32 %v3088_v46, -128.0  ;;  %v1527_v39 = vmax.f32 %v3089_v13, -128.0  ;;  %v1528_v55 = vmax.f32 %v3090_v12, -128.0  ;;  %v3413_v25 = vld [vmem:[#allocation3 + $0x280] sm:$0xff]  ;;  %v3414_v13 = vld [vmem:[#allocation3 + $0x288] sm:$0xff] }
 0x145   :  { %v1529_v19 = vmax.f32 %v3091_v15, -128.0  ;;  %v1530_v0 = vmax.f32 %v3092_v26, -128.0  ;;  %v1531_v31 = vmax.f32 %v3093_v23, -128.0  ;;  %v1532_v37 = vmax.f32 %v3094_v59, -128.0  ;;  %v3415_v15 = vld [vmem:[#allocation3 + $0x290] sm:$0xff]  ;;  %v3416_v23 = vld [vmem:[#allocation3 + $0x298] sm:$0xff] }
 0x146   :  { %v1781_v61 = vmin.f32 %v1525_v21, 127.0  ;;  %v1782_v8 = vmin.f32 %v1526_v38, 127.0  ;;  %v1783_v42 = vmin.f32 %v1527_v39, 127.0  ;;  %v1784_v32 = vmin.f32 %v1528_v55, 127.0  ;;  %v3417_v21 = vld [vmem:[#allocation3 + $0x2a0] sm:$0xff]  ;;  %v3418_v39 = vld [vmem:[#allocation3 + $0x2a8] sm:$0xff] }
 0x147   :  { %v1785_v51 = vmin.f32 %v1529_v19, 127.0  ;;  %v1786_v30 = vmin.f32 %v1530_v0, 127.0  ;;  %v1787_v24 = vmin.f32 %v1531_v31, 127.0  ;;  %v1788_v57 = vmin.f32 %v1532_v37, 127.0  ;;  %v3419_v19 = vld [vmem:[#allocation3 + $0x2b0] sm:$0xff]  ;;  %v3420_v31 = vld [vmem:[#allocation3 + $0x2b8] sm:$0xff] }
 0x148   :  { %v4286_v9 = vtrunc.f32 %v1781_v61  ;;  %v4288_v14 = vtrunc.f32 %v1782_v8  ;;  %v4290_v11 = vtrunc.f32 %v1783_v42  ;;  %v4292_v36 = vtrunc.f32 %v1784_v32 }
 0x149   :  { %v4294_v62 = vtrunc.f32 %v1785_v51  ;;  %v4296_v34 = vtrunc.f32 %v1786_v30  ;;  %v4298_v6 = vtrunc.f32 %v1787_v24  ;;  %v4300_v18 = vtrunc.f32 %v1788_v57 }
 0x14a   :  { %v1005_v46 = vmul.f32 %v3413_v25, %v4266_v10  ;;  %v1006_v12 = vmul.f32 %v3414_v13, %v4266_v10  ;;  %v1007_v26 = vmul.f32 %v3415_v15, %v4266_v10  ;;  %v1008_v59 = vmul.f32 %v3416_v23, %v4266_v10 }
 0x14b   :  { %v1009_v38 = vmul.f32 %v3417_v21, %v4266_v10  ;;  %v1010_v55 = vmul.f32 %v3418_v39, %v4266_v10  ;;  %v1011_v0 = vmul.f32 %v3419_v19, %v4266_v10  ;;  %v1012_v37 = vmul.f32 %v3420_v31, %v4266_v10 }
 0x14c   :  { %v3079_v61 = vround.rtne.f32 %v1005_v46  ;;  %v3080_v8 = vround.rtne.f32 %v1006_v12  ;;  %v3081_v42 = vround.rtne.f32 %v1007_v26  ;;  %v3082_v32 = vround.rtne.f32 %v1008_v59 }
 0x14d   :  { %v3083_v51 = vround.rtne.f32 %v1009_v38  ;;  %v3084_v30 = vround.rtne.f32 %v1010_v55  ;;  %v3085_v24 = vround.rtne.f32 %v1011_v0  ;;  %v3086_v57 = vround.rtne.f32 %v1012_v37 }
 0x14e   :  { %v1517_v25 = vmax.f32 %v3079_v61, -128.0  ;;  %v1518_v13 = vmax.f32 %v3080_v8, -128.0  ;;  %v1519_v15 = vmax.f32 %v3081_v42, -128.0  ;;  %v1520_v23 = vmax.f32 %v3082_v32, -128.0 }
 0x14f   :  { %v1521_v21 = vmax.f32 %v3083_v51, -128.0  ;;  %v1522_v39 = vmax.f32 %v3084_v30, -128.0  ;;  %v1523_v50 = vmax.f32 %v3085_v24, -128.0  ;;  %v1524_v53 = vmax.f32 %v3086_v57, -128.0  ;;  %v3421_v30 = vld [vmem:[#allocation3 + $0x340] sm:$0xff]  ;;  %v3422_v57 = vld [vmem:[#allocation3 + $0x348] sm:$0xff] }
 0x150   :  { %v1773_v19 = vmin.f32 %v1517_v25, 127.0  ;;  %v1774_v5 = vmin.f32 %v1518_v13, 127.0  ;;  %v1775_v29 = vmin.f32 %v1519_v15, 127.0  ;;  %v1776_v10 = vmin.f32 %v1520_v23, 127.0  ;;  %v3424_v13 = vld [vmem:[#allocation3 + $0x358] sm:$0xff] }
 0x151   :  { %v1777_v46 = vmin.f32 %v1521_v21, 127.0  ;;  %v1778_v12 = vmin.f32 %v1522_v39, 127.0  ;;  %v1779_v26 = vmin.f32 %v1523_v50, 127.0  ;;  %v1780_v59 = vmin.f32 %v1524_v53, 127.0 }
 0x152   :  { %v2029_v38 = vtrunc.f32 %v1773_v19  ;;  %v2030_v55 = vtrunc.f32 %v1774_v5  ;;  %v2031_v0 = vtrunc.f32 %v1775_v29  ;;  %v2032_v31 = vtrunc.f32 %v1776_v10  ;;  %v3423_v29 = vld [vmem:[#allocation3 + $0x350] sm:$0xff] }
 0x153   :  { %v2033_v37 = vtrunc.f32 %v1777_v46  ;;  %v2034_v61 = vtrunc.f32 %v1778_v12  ;;  %v2035_v8 = vtrunc.f32 %v1779_v26  ;;  %v2036_v42 = vtrunc.f32 %v1780_v59 }
 0x154   :  { %v2369_v32 = vpack.c.f32.eXmY %v2029_v38, %v4286_v9, 312  ;;  %v2379_v51 = vpack.c.f32.eXmY %v2030_v55, %v4288_v14, 312  ;;  %v1029_v24 = vmul.f32 %v3421_v30, %v4273_v35  ;;  %v1030_v25 = vmul.f32 %v3422_v57, %v4273_v35 }
 0x155   :  { %v2389_v53 = vpack.c.f32.eXmY %v2031_v0, %v4290_v11, 312  ;;  %v2399_v5 = vpack.c.f32.eXmY %v2032_v31, %v4292_v36, 312  ;;  %v1031_v50 = vmul.f32 %v3423_v29, %v4273_v35  ;;  %v1032_v15 = vmul.f32 %v3424_v13, %v4273_v35  ;;  %v3429_v13 = vld [vmem:[#allocation3 + $0x300] sm:$0xff] }
 0x156   :  { %v2373_v9 = vpack.c.b8 %v2369_v32, %v2365_v7  ;;  %v2383_v14 = vpack.c.b8 %v2379_v51, %v2375_v2  ;;  %v2409_v23 = vpack.c.f32.eXmY %v2033_v37, %v4294_v62, 312  ;;  %v2419_v11 = vpack.c.f32.eXmY %v2034_v61, %v4296_v34, 312  ;;  %v3426_v2 = vld [vmem:[#allocation3 + $0x368] sm:$0xff] }
 0x157   :  { %v2393_v36 = vpack.c.b8 %v2389_v53, %v2385_v48  ;;  %v2403_v21 = vpack.c.b8 %v2399_v5, %v2395_v49  ;;  %v2429_v39 = vpack.c.f32.eXmY %v2035_v8, %v4298_v6, 312  ;;  %v2439_v3 = vpack.c.f32.eXmY %v2036_v42, %v4300_v18, 312  ;;  %v3428_v49 = vld [vmem:[#allocation3 + $0x378] sm:$0xff] }
 0x158   :  { %v5127_v43 = vpack.c.f32.eXmY %v4252_v52, %v4228_v45, 312  ;;  %v5128_v17 = vpack.c.f32.eXmY %v4254_v16, %v4230_v28, 312  ;;  %2861 = vst [vmem:[#allocation6 + $0x80] sm:$0xff] %v2373_v9  ;;  %2862 = vst [vmem:[#allocation6 + $0x88] sm:$0xff] %v2383_v14  ;;  %v1033_v58 = vmul.f32 %v3425_v20, %v4273_v35  ;;  %v3427_v28 = vld [vmem:[#allocation3 + $0x370] sm:$0xff]  ;;  %v3103_v34 = vround.rtne.f32 %v1029_v24  ;;  %v3430_v9 = vld [vmem:[#allocation3 + $0x308] sm:$0xff] }
 0x159   :  { %v1034_v22 = vmul.f32 %v3426_v2, %v4273_v35  ;;  %v5129_v4 = vpack.c.f32.eXmY %v4256_v40, %v4232_v56, 312  ;;  %v5130_v45 = vpack.c.f32.eXmY %v4258_v44, %v4234_v41, 312  ;;  %2863 = vst [vmem:[#allocation6 + $0x90] sm:$0xff] %v2393_v36  ;;  %2864 = vst [vmem:[#allocation6 + $0x98] sm:$0xff] %v2403_v21  ;;  %v3104_v6 = vround.rtne.f32 %v1030_v25  ;;  %v3432_v36 = vld [vmem:[#allocation3 + $0x318] sm:$0xff] }
 0x15a   :  { %v2413_v63 = vpack.c.b8 %v2409_v23, %v5127_v43  ;;  %v2423_v7 = vpack.c.b8 %v2419_v11, %v5128_v17  ;;  %v1035_v16 = vmul.f32 %v3427_v28, %v4273_v35  ;;  %v1036_v62 = vmul.f32 %v3428_v49, %v4273_v35  ;;  %v3431_v23 = vld [vmem:[#allocation3 + $0x310] sm:$0xff]  ;;  %v3434_v43 = vld [vmem:[#allocation3 + $0x328] sm:$0xff]  ;;  %v3436_v20 = vld [vmem:[#allocation3 + $0x338] sm:$0xff] }
 0x15b   :  { %v2433_v48 = vpack.c.b8 %v2429_v39, %v5129_v4  ;;  %v2443_v52 = vpack.c.b8 %v2439_v3, %v5130_v45  ;;  %v3105_v18 = vround.rtne.f32 %v1031_v50  ;;  %v3106_v19 = vround.rtne.f32 %v1032_v15  ;;  %v3433_v39 = vld [vmem:[#allocation3 + $0x320] sm:$0xff]  ;;  %v3435_v17 = vld [vmem:[#allocation3 + $0x330] sm:$0xff] }
 0x15c   :  { %2865 = vst [vmem:[#allocation6 + $0xa0] sm:$0xff] %v2413_v63  ;;  %2866 = vst [vmem:[#allocation6 + $0xa8] sm:$0xff] %v2423_v7  ;;  %v3107_v56 = vround.rtne.f32 %v1033_v58  ;;  %v3108_v40 = vround.rtne.f32 %v1034_v22  ;;  %v3109_v41 = vround.rtne.f32 %v1035_v16  ;;  %v3110_v44 = vround.rtne.f32 %v1036_v62 }
 0x15d   :  { %2867 = vst [vmem:[#allocation6 + $0xb0] sm:$0xff] %v2433_v48  ;;  %2868 = vst [vmem:[#allocation6 + $0xb8] sm:$0xff] %v2443_v52  ;;  %v1541_v10 = vmax.f32 %v3103_v34, -128.0  ;;  %v1542_v46 = vmax.f32 %v3104_v6, -128.0  ;;  %v1543_v12 = vmax.f32 %v3105_v18, -128.0  ;;  %v1544_v26 = vmax.f32 %v3106_v19, -128.0 }
 0x15e   :  { %v1545_v59 = vmax.f32 %v3107_v56, -128.0  ;;  %v1546_v38 = vmax.f32 %v3108_v40, -128.0  ;;  %v1547_v55 = vmax.f32 %v3109_v41, -128.0  ;;  %v1548_v35 = vmax.f32 %v3110_v44, -128.0 }
 0x15f   :  { %v1797_v0 = vmin.f32 %v1541_v10, 127.0  ;;  %v1798_v31 = vmin.f32 %v1542_v46, 127.0  ;;  %v1799_v37 = vmin.f32 %v1543_v12, 127.0  ;;  %v1800_v61 = vmin.f32 %v1544_v26, 127.0 }
 0x160   :  { %v1801_v8 = vmin.f32 %v1545_v59, 127.0  ;;  %v1802_v42 = vmin.f32 %v1546_v38, 127.0  ;;  %v1803_v32 = vmin.f32 %v1547_v55, 127.0  ;;  %v1804_v51 = vmin.f32 %v1548_v35, 127.0 }
 0x161   :  { %v4350_v30 = vtrunc.f32 %v1797_v0  ;;  %v4352_v24 = vtrunc.f32 %v1798_v31  ;;  %v4354_v57 = vtrunc.f32 %v1799_v37  ;;  %v4356_v25 = vtrunc.f32 %v1800_v61 }
 0x162   :  { %v4358_v53 = vtrunc.f32 %v1801_v8  ;;  %v4360_v5 = vtrunc.f32 %v1802_v42  ;;  %v4362_v29 = vtrunc.f32 %v1803_v32  ;;  %v4364_v50 = vtrunc.f32 %v1804_v51 }
 0x163   :  { %v1021_v15 = vmul.f32 %v3429_v13, %v4276_v60  ;;  %v1022_v14 = vmul.f32 %v3430_v9, %v4276_v60  ;;  %v1023_v11 = vmul.f32 %v3431_v23, %v4276_v60  ;;  %v1024_v21 = vmul.f32 %v3432_v36, %v4276_v60 }
 0x164   :  { %v1025_v3 = vmul.f32 %v3433_v39, %v4276_v60  ;;  %v1026_v63 = vmul.f32 %v3434_v43, %v4276_v60  ;;  %v1027_v7 = vmul.f32 %v3435_v17, %v4276_v60  ;;  %v1028_v58 = vmul.f32 %v3436_v20, %v4276_v60  ;;  %v3438_v39 = vld [vmem:[#allocation3 + $0x3c8] sm:$0xff]  ;;  %v3440_v17 = vld [vmem:[#allocation3 + $0x3d8] sm:$0xff]  ;;  %v3441_v20 = vld [vmem:[#allocation3 + $0x3e0] sm:$0xff] }
 0x165   :  { %v3095_v2 = vround.rtne.f32 %v1021_v15  ;;  %v3096_v22 = vround.rtne.f32 %v1022_v14  ;;  %v3097_v4 = vround.rtne.f32 %v1023_v11  ;;  %v3098_v48 = vround.rtne.f32 %v1024_v21 }
 0x166   :  { %v3099_v45 = vround.rtne.f32 %v1025_v3  ;;  %v3100_v52 = vround.rtne.f32 %v1026_v63  ;;  %v3101_v28 = vround.rtne.f32 %v1027_v7  ;;  %v3102_v16 = vround.rtne.f32 %v1028_v58  ;;  %v3439_v63 = vld [vmem:[#allocation3 + $0x3d0] sm:$0xff] }
 0x167   :  { %v1533_v49 = vmax.f32 %v3095_v2, -128.0  ;;  %v1534_v62 = vmax.f32 %v3096_v22, -128.0  ;;  %v1535_v34 = vmax.f32 %v3097_v4, -128.0  ;;  %v1536_v6 = vmax.f32 %v3098_v48, -128.0  ;;  %v3442_v2 = vld [vmem:[#allocation3 + $0x3e8] sm:$0xff]  ;;  %v3443_v4 = vld [vmem:[#allocation3 + $0x3f0] sm:$0xff] }
 0x168   :  { %v1537_v18 = vmax.f32 %v3099_v45, -128.0  ;;  %v1538_v19 = vmax.f32 %v3100_v52, -128.0  ;;  %v1539_v56 = vmax.f32 %v3101_v28, -128.0  ;;  %v1540_v40 = vmax.f32 %v3102_v16, -128.0  ;;  %v3444_v45 = vld [vmem:[#allocation3 + $0x3f8] sm:$0xff] }
 0x169   :  { %v1789_v41 = vmin.f32 %v1533_v49, 127.0  ;;  %v1790_v44 = vmin.f32 %v1534_v62, 127.0  ;;  %v1791_v10 = vmin.f32 %v1535_v34, 127.0  ;;  %v1792_v60 = vmin.f32 %v1536_v6, 127.0 }
 0x16a   :  { %v1793_v46 = vmin.f32 %v1537_v18, 127.0  ;;  %v1794_v12 = vmin.f32 %v1538_v19, 127.0  ;;  %v1795_v26 = vmin.f32 %v1539_v56, 127.0  ;;  %v1796_v59 = vmin.f32 %v1540_v40, 127.0 }
 0x16b   :  { %v4374_v38 = vtrunc.f32 %v1789_v41  ;;  %v4376_v55 = vtrunc.f32 %v1790_v44  ;;  %v4378_v35 = vtrunc.f32 %v1791_v10  ;;  %v4380_v0 = vtrunc.f32 %v1792_v60 }
 0x16c   :  { %v4382_v31 = vtrunc.f32 %v1793_v46  ;;  %v4384_v37 = vtrunc.f32 %v1794_v12  ;;  %v4386_v61 = vtrunc.f32 %v1795_v26  ;;  %v4388_v8 = vtrunc.f32 %v1796_v59 }
 0x16d   :  { %v2445_v42 = vpack.c.f32.eXmY %v4374_v38, %v4350_v30, 312  ;;  %v2455_v32 = vpack.c.f32.eXmY %v4376_v55, %v4352_v24, 312  ;;  %v892_v51 = vmul.f32 127.0, %v4084_v27  ;;  %v4396_v13 = vmul.f32 127.0, %v4086_v47  ;;  %v3437_v47 = vld [vmem:[#allocation3 + $0x3c0] sm:$0xff] }
 0x16e   :  { %v2465_v15 = vpack.c.f32.eXmY %v4378_v35, %v4354_v57, 312  ;;  %v2475_v9 = vpack.c.f32.eXmY %v4380_v0, %v4356_v25, 312  ;;  %v4403_v14 = vmul.f32 127.0, %v4096_v54  ;;  %v5131_v23 = vmax.f32 %v4036_v1, 1e-05  ;;  %v3457_v57 = vld [vmem:[#allocation3 + $0x460] sm:$0xff] }
 0x16f   :  { %v2485_v36 = vpack.c.f32.eXmY %v4382_v31, %v4358_v53, 312  ;;  %v2495_v27 = vpack.c.f32.eXmY %v4384_v37, %v4360_v5, 312  ;;  %v1045_v21 = vmul.f32 %v3437_v47, %v892_v51  ;;  %v1046_v3 = vmul.f32 %v3438_v39, %v892_v51  ;;  %v4422_v47 = vpop.xlane.xlu1 %719  ;;  %v3458_v35 = vld [vmem:[#allocation3 + $0x468] sm:$0xff] }
 0x170   :  { %v2930_v11 = vmul.f32 %v3831_v33, %v5131_v23  ;;  %v1047_v1 = vmul.f32 %v3439_v63, %v892_v51  ;;  %v1048_v7 = vmul.f32 %v3440_v17, %v892_v51  ;;  %v1049_v58 = vmul.f32 %v3441_v20, %v892_v51 }
 0x171   :  { %v1050_v22 = vmul.f32 %v3442_v2, %v892_v51  ;;  %v1051_v48 = vmul.f32 %v3443_v4, %v892_v51  ;;  %v1052_v52 = vmul.f32 %v3444_v45, %v892_v51  ;;  %v3119_v28 = vround.rtne.f32 %v1045_v21 }
 0x172   :  { %2963 = vst.msk [vmem:[%s5108_s3 + $0x88] sm:$0xff] %vm2945_vm0, %v2930_v11  ;;  %v3120_v16 = vround.rtne.f32 %v1046_v3  ;;  %v3121_v49 = vround.rtne.f32 %v1047_v1  ;;  %v3122_v62 = vround.rtne.f32 %v1048_v7  ;;  %v3123_v34 = vround.rtne.f32 %v1049_v58  ;;  %v4420_v11 = vpop.xlane.xlu0 %692 }
 0x173   :  { %v3124_v6 = vround.rtne.f32 %v1050_v22  ;;  %v3125_v18 = vround.rtne.f32 %v1051_v48  ;;  %v3126_v19 = vround.rtne.f32 %v1052_v52  ;;  %v1557_v56 = vmax.f32 %v3119_v28, -128.0  ;;  %v3445_v48 = vld [vmem:[#allocation3 + $0x380] sm:$0xff]  ;;  %v3446_v52 = vld [vmem:[#allocation3 + $0x388] sm:$0xff] }
 0x174   :  { %v1558_v40 = vmax.f32 %v3120_v16, -128.0  ;;  %v1559_v41 = vmax.f32 %v3121_v49, -128.0  ;;  %v1560_v44 = vmax.f32 %v3122_v62, -128.0  ;;  %v1561_v10 = vmax.f32 %v3123_v34, -128.0  ;;  %v3447_v16 = vld [vmem:[#allocation3 + $0x390] sm:$0xff]  ;;  %v3448_v62 = vld [vmem:[#allocation3 + $0x398] sm:$0xff] }
 0x175   :  { %v1562_v60 = vmax.f32 %v3124_v6, -128.0  ;;  %v1563_v46 = vmax.f32 %v3125_v18, -128.0  ;;  %v1564_v12 = vmax.f32 %v3126_v19, -128.0  ;;  %v1813_v26 = vmin.f32 %v1557_v56, 127.0  ;;  %v3449_v6 = vld [vmem:[#allocation3 + $0x3a0] sm:$0xff]  ;;  %v3450_v19 = vld [vmem:[#allocation3 + $0x3a8] sm:$0xff] }
 0x176   :  { %v1814_v59 = vmin.f32 %v1558_v40, 127.0  ;;  %v1815_v23 = vmin.f32 %v1559_v41, 127.0  ;;  %v1816_v51 = vmin.f32 %v1560_v44, 127.0  ;;  %v1817_v21 = vmin.f32 %v1561_v10, 127.0  ;;  %v3451_v40 = vld [vmem:[#allocation3 + $0x3b0] sm:$0xff]  ;;  %v3452_v44 = vld [vmem:[#allocation3 + $0x3b8] sm:$0xff] }
 0x177   :  { %v1818_v39 = vmin.f32 %v1562_v60, 127.0  ;;  %v1819_v3 = vmin.f32 %v1563_v46, 127.0  ;;  %v1820_v63 = vmin.f32 %v1564_v12, 127.0  ;;  %v4424_v1 = vtrunc.f32 %v1813_v26 }
 0x178   :  { %v4426_v17 = vtrunc.f32 %v1814_v59  ;;  %v4428_v7 = vtrunc.f32 %v1815_v23  ;;  %v4430_v20 = vtrunc.f32 %v1816_v51  ;;  %v4432_v58 = vtrunc.f32 %v1817_v21  ;;  %v4448_v59 = vpop.xlane.xlu0 %710  ;;  %v4450_v23 = vpop.xlane.xlu1 %737 }
 0x179   :  { %v4434_v2 = vtrunc.f32 %v1818_v39  ;;  %v4436_v22 = vtrunc.f32 %v1819_v3  ;;  %v4438_v4 = vtrunc.f32 %v1820_v63  ;;  %v1037_v45 = vmul.f32 %v3445_v48, %v4396_v13 }
 0x17a   :  { %v1038_v28 = vmul.f32 %v3446_v52, %v4396_v13  ;;  %v1039_v49 = vmul.f32 %v3447_v16, %v4396_v13  ;;  %v1040_v34 = vmul.f32 %v3448_v62, %v4396_v13  ;;  %v1041_v18 = vmul.f32 %v3449_v6, %v4396_v13 }
 0x17b   :  { %v1042_v56 = vmul.f32 %v3450_v19, %v4396_v13  ;;  %v1043_v41 = vmul.f32 %v3451_v40, %v4396_v13  ;;  %v1044_v10 = vmul.f32 %v3452_v44, %v4396_v13  ;;  %v3111_v60 = vround.rtne.f32 %v1037_v45 }
 0x17c   :  { %v3112_v46 = vround.rtne.f32 %v1038_v28  ;;  %v3113_v12 = vround.rtne.f32 %v1039_v49  ;;  %v3114_v26 = vround.rtne.f32 %v1040_v34  ;;  %v3115_v51 = vround.rtne.f32 %v1041_v18 }
 0x17d   :  { %v3116_v21 = vround.rtne.f32 %v1042_v56  ;;  %v3117_v39 = vround.rtne.f32 %v1043_v41  ;;  %v3118_v3 = vround.rtne.f32 %v1044_v10  ;;  %v1549_v63 = vmax.f32 %v3111_v60, -128.0  ;;  %v4452_v60 = vpop.xlane.xlu0 %728 }
 0x17e   :  { %v1550_v48 = vmax.f32 %v3112_v46, -128.0  ;;  %v1551_v52 = vmax.f32 %v3113_v12, -128.0  ;;  %v1552_v16 = vmax.f32 %v3114_v26, -128.0  ;;  %v1553_v62 = vmax.f32 %v3115_v51, -128.0  ;;  %v4454_v46 = vpop.xlane.xlu1 %755 }
 0x17f   :  { %v1554_v6 = vmax.f32 %v3116_v21, -128.0  ;;  %v1555_v19 = vmax.f32 %v3117_v39, -128.0  ;;  %v1556_v13 = vmax.f32 %v3118_v3, -128.0  ;;  %v1805_v45 = vmin.f32 %v1549_v63, 127.0  ;;  %v3453_v63 = vld [vmem:[#allocation3 + $0x440] sm:$0xff] }
 0x180   :  { %v1806_v28 = vmin.f32 %v1550_v48, 127.0  ;;  %v1807_v49 = vmin.f32 %v1551_v52, 127.0  ;;  %v1808_v34 = vmin.f32 %v1552_v16, 127.0  ;;  %v1809_v40 = vmin.f32 %v1553_v62, 127.0  ;;  %v3454_v52 = vld [vmem:[#allocation3 + $0x448] sm:$0xff] }
 0x181   :  { %v1810_v44 = vmin.f32 %v1554_v6, 127.0  ;;  %v1811_v54 = vmin.f32 %v1555_v19, 127.0  ;;  %v1812_v43 = vmin.f32 %v1556_v13, 127.0  ;;  %v2061_v18 = vtrunc.f32 %v1805_v45  ;;  %v3455_v19 = vld [vmem:[#allocation3 + $0x450] sm:$0xff]  ;;  %v3456_v45 = vld [vmem:[#allocation3 + $0x458] sm:$0xff]  ;;  %v4488_v0 = vpop.xlane.xlu0 %746 }
 0x182   :  { %v2062_v56 = vtrunc.f32 %v1806_v28  ;;  %v2063_v41 = vtrunc.f32 %v1807_v49  ;;  %v2064_v10 = vtrunc.f32 %v1808_v34  ;;  %v2065_v12 = vtrunc.f32 %v1809_v40 }
 0x183   :  { %v2066_v26 = vtrunc.f32 %v1810_v44  ;;  %v2067_v51 = vtrunc.f32 %v1811_v54  ;;  %v2068_v21 = vtrunc.f32 %v1812_v43  ;;  %v2449_v39 = vpack.c.f32.eXmY %v2061_v18, %v4424_v1, 312 }
 0x184   :  { %v2459_v3 = vpack.c.f32.eXmY %v2062_v56, %v4426_v17, 312  ;;  %v1061_v48 = vmul.f32 %v3453_v63, %v4403_v14  ;;  %v1062_v16 = vmul.f32 %v3454_v52, %v4403_v14  ;;  %v2469_v62 = vpack.c.f32.eXmY %v2063_v41, %v4428_v7, 312 }
 0x185   :  { %v2479_v6 = vpack.c.f32.eXmY %v2064_v10, %v4430_v20, 312  ;;  %v1063_v13 = vmul.f32 %v3455_v19, %v4403_v14  ;;  %v1064_v43 = vmul.f32 %v3456_v45, %v4403_v14  ;;  %v2453_v54 = vpack.c.b8 %v2449_v39, %v2445_v42  ;;  %v4490_v42 = vpop.xlane.xlu1 %773  ;;  %v765_v56 = vpop.xlane.xlu0 %764 }
 0x186   :  { %v2463_v1 = vpack.c.b8 %v2459_v3, %v2455_v32  ;;  %v2489_v17 = vpack.c.f32.eXmY %v2065_v12, %v4432_v58, 312  ;;  %v2499_v7 = vpack.c.f32.eXmY %v2066_v26, %v4434_v2, 312  ;;  %v2473_v20 = vpack.c.b8 %v2469_v62, %v2465_v15  ;;  %v3459_v32 = vld [vmem:[#allocation3 + $0x470] sm:$0xff] }
 0x187   :  { %v2483_v28 = vpack.c.b8 %v2479_v6, %v2475_v9  ;;  %v2509_v49 = vpack.c.f32.eXmY %v2067_v51, %v4436_v22, 312  ;;  %v2519_v30 = vpack.c.f32.eXmY %v2068_v21, %v4438_v4, 312  ;;  %2869 = vst [vmem:[#allocation6 + $0xc0] sm:$0xff] %v2453_v54  ;;  %v1065_v55 = vmul.f32 %v3457_v57, %v4403_v14  ;;  %v3460_v9 = vld [vmem:[#allocation3 + $0x478] sm:$0xff] }
 0x188   :  { %v2493_v24 = vpack.c.b8 %v2489_v17, %v2485_v36  ;;  %v2503_v38 = vpack.c.b8 %v2499_v7, %v2495_v27  ;;  %2870 = vst [vmem:[#allocation6 + $0xc8] sm:$0xff] %v2463_v1  ;;  %v1066_v25 = vmul.f32 %v3458_v35, %v4403_v14  ;;  %v5132_v53 = vpack.c.f32.eXmY %v4386_v61, %v4362_v29, 312 }
 0x189   :  { %v5133_v5 = vpack.c.f32.eXmY %v4388_v8, %v4364_v50, 312  ;;  %2871 = vst [vmem:[#allocation6 + $0xd0] sm:$0xff] %v2473_v20  ;;  %2872 = vst [vmem:[#allocation6 + $0xd8] sm:$0xff] %v2483_v28  ;;  %v1067_v15 = vmul.f32 %v3459_v32, %v4403_v14  ;;  %v1068_v36 = vmul.f32 %v3460_v9, %v4403_v14  ;;  %v3135_v27 = vround.rtne.f32 %v1061_v48  ;;  %v4509_v41 = vpop.xlane.xlu1 %791  ;;  %v783_v45 = vpop.xlane.xlu0 %782 }
 0x18a   :  { %v2513_v31 = vpack.c.b8 %v2509_v49, %v5132_v53  ;;  %2873 = vst [vmem:[#allocation6 + $0xe0] sm:$0xff] %v2493_v24  ;;  %2874 = vst [vmem:[#allocation6 + $0xe8] sm:$0xff] %v2503_v38  ;;  %v3136_v58 = vround.rtne.f32 %v1062_v16  ;;  %v3137_v2 = vround.rtne.f32 %v1063_v13  ;;  %v3138_v22 = vround.rtne.f32 %v1064_v43 }
 0x18b   :  { %v2523_v37 = vpack.c.b8 %v2519_v30, %v5133_v5  ;;  %v3139_v29 = vround.rtne.f32 %v1065_v55  ;;  %v3140_v61 = vround.rtne.f32 %v1066_v25  ;;  %v3141_v50 = vround.rtne.f32 %v1067_v15 }
 0x18c   :  { %2875 = vst [vmem:[#allocation6 + $0xf0] sm:$0xff] %v2513_v31  ;;  %v3142_v8 = vround.rtne.f32 %v1068_v36  ;;  %v1573_v4 = vmax.f32 %v3135_v27, -128.0  ;;  %v4500_v34 = vmax.f32 %v3136_v58, -128.0  ;;  %v4502_v40 = vmax.f32 %v3137_v2, -128.0 }
 0x18d   :  { %2876 = vst [vmem:[#allocation6 + $0xf8] sm:$0xff] %v2523_v37  ;;  %v4504_v44 = vmax.f32 %v3138_v22, -128.0  ;;  %v4506_v14 = vmax.f32 %v3139_v29, -128.0  ;;  %v845_v18 = vmax.f32 %v4420_v11, 1e-05  ;;  %v4511_v10 = vmax.f32 %v3140_v61, -128.0 }
 0x18e   :  { %v4513_v12 = vmax.f32 %v3141_v50, -128.0  ;;  %v4515_v26 = vmax.f32 %v3142_v8, -128.0  ;;  %v1829_v51 = vmin.f32 %v1573_v4, 127.0  ;;  %v1830_v21 = vmin.f32 %v4500_v34, 127.0  ;;  %v3461_v22 = vld [vmem:[#allocation3 + $0x400] sm:$0xff]  ;;  %v3462_v61 = vld [vmem:[#allocation3 + $0x408] sm:$0xff] }
 0x18f   :  { %v1831_v39 = vmin.f32 %v4502_v40, 127.0  ;;  %v1832_v3 = vmin.f32 %v4504_v44, 127.0  ;;  %v1833_v63 = vmin.f32 %v4506_v14, 127.0  ;;  %3295 = vrcp.f32 %v845_v18  ;;  %v3463_v8 = vld [vmem:[#allocation3 + $0x410] sm:$0xff]  ;;  %v3464_v34 = vld [vmem:[#allocation3 + $0x418] sm:$0xff]  ;;  %v3465_v14 = vld [vmem:[#allocation3 + $0x420] sm:$0xff] }
 0x190   :  { %v2929_v11 = vmul.f32 %v3831_v33, %v845_v18  ;;  %v848_v48 = vmax.f32 %v4422_v47, 1e-05  ;;  %v847_v52 = vmax.f32 %v4448_v59, 1e-05  ;;  %v850_v16 = vmax.f32 %v4450_v23, 1e-05  ;;  %v810_v59 = vpop.xlane.xlu1 %809 }
 0x191   :  { %v849_v62 = vmax.f32 %v4452_v60, 1e-05  ;;  %v852_v6 = vmax.f32 %v4454_v46, 1e-05  ;;  %v851_v47 = vmax.f32 %v4488_v0, 1e-05  ;;  %v4580_v25 = vtrunc.f32 %v1829_v51  ;;  %v4594_v0 = vpop.xlane.xlu0 %800 }
 0x192   :  { %2962 = vst.msk [vmem:[%s5108_s3 + $0x80] sm:$0xff] %vm2945_vm0, %v2929_v11  ;;  %3297 = vrcp.f32 %v848_v48  ;;  %v2932_v19 = vmul.f32 %v3831_v33, %v848_v48  ;;  %v2931_v13 = vmul.f32 %v3831_v33, %v847_v52  ;;  %v2934_v23 = vmul.f32 %v3831_v33, %v850_v16 }
 0x193   :  { %3299 = vrcp.f32 %v847_v52  ;;  %v2933_v60 = vmul.f32 %v3831_v33, %v849_v62  ;;  %v2936_v46 = vmul.f32 %v3831_v33, %v852_v6  ;;  %v2935_v43 = vmul.f32 %v3831_v33, %v851_v47 }
 0x194   :  { %2965 = vst.msk [vmem:[%s5108_s3 + $0x98] sm:$0xff] %vm2945_vm0, %v2932_v19  ;;  %2964 = vst.msk [vmem:[%s5108_s3 + $0x90] sm:$0xff] %vm2945_vm0, %v2931_v13  ;;  %3301 = vrcp.f32 %v850_v16  ;;  %v854_v54 = vmax.f32 %v4490_v42, 1e-05  ;;  %v853_v1 = vmax.f32 %v765_v56, 1e-05  ;;  %v4596_v53 = vtrunc.f32 %v1830_v21 }
 0x195   :  { %2967 = vst.msk [vmem:[%s5108_s3 + $0xa8] sm:$0xff] %vm2945_vm0, %v2934_v23  ;;  %3303 = vrcp.f32 %v849_v62  ;;  %2966 = vst.msk [vmem:[%s5108_s3 + $0xa0] sm:$0xff] %vm2945_vm0, %v2933_v60  ;;  %v856_v17 = vmax.f32 %v4509_v41, 1e-05  ;;  %v855_v7 = vmax.f32 %v783_v45, 1e-05  ;;  %v4598_v31 = vtrunc.f32 %v1831_v39 }
 0x196   :  { %2969 = vst.msk [vmem:[%s5108_s3 + $0xb8] sm:$0xff] %vm2945_vm0, %v2936_v46  ;;  %v858_v20 = vmax.f32 %v810_v59, 1e-05  ;;  %v1834_v28 = vmin.f32 %v4511_v10, 127.0  ;;  %3305 = vrcp.f32 %v852_v6  ;;  %2968 = vst.msk [vmem:[%s5108_s3 + $0xb0] sm:$0xff] %vm2945_vm0, %v2935_v43  ;;  %v2938_v49 = vmul.f32 %v3831_v33, %v854_v54  ;;  %v3466_v56 = vld [vmem:[#allocation3 + $0x428] sm:$0xff] }
 0x197   :  { %v2937_v30 = vmul.f32 %v3831_v33, %v853_v1  ;;  %3307 = vrcp.f32 %v851_v47  ;;  %v2940_v24 = vmul.f32 %v3831_v33, %v856_v17  ;;  %v2939_v38 = vmul.f32 %v3831_v33, %v855_v7  ;;  %v3467_v10 = vld [vmem:[#allocation3 + $0x430] sm:$0xff] }
 0x198   :  { %v2942_v57 = vmul.f32 %v3831_v33, %v858_v20  ;;  %v1835_v55 = vmin.f32 %v4513_v12, 127.0  ;;  %v1836_v35 = vmin.f32 %v4515_v26, 127.0  ;;  %3309 = vrcp.f32 %v854_v54  ;;  %2971 = vst.msk [vmem:[%s5108_s3 + $0xc8] sm:$0xff] %vm2945_vm0, %v2938_v49  ;;  %v3468_v26 = vld [vmem:[#allocation3 + $0x438] sm:$0xff] }
 0x199   :  { %2970 = vst.msk [vmem:[%s5108_s3 + $0xc0] sm:$0xff] %vm2945_vm0, %v2937_v30  ;;  %3311 = vrcp.f32 %v853_v1  ;;  %2973 = vst.msk [vmem:[%s5108_s3 + $0xd8] sm:$0xff] %vm2945_vm0, %v2940_v24  ;;  %v3296_v42 = vpop.eup %3295  ;;  %v4600_v5 = vtrunc.f32 %v1832_v3  ;;  %v4602_v37 = vtrunc.f32 %v1833_v63  ;;  %v4604_v32 = vtrunc.f32 %v1834_v28 }
 0x19a   :  { %2972 = vst.msk [vmem:[%s5108_s3 + $0xd0] sm:$0xff] %vm2945_vm0, %v2939_v38  ;;  %2975 = vst.msk [vmem:[%s5108_s3 + $0xe8] sm:$0xff] %vm2945_vm0, %v2942_v57  ;;  %3313 = vrcp.f32 %v856_v17  ;;  %v894_v15 = vmul.f32 127.0, %v3296_v42  ;;  %v4608_v36 = vtrunc.f32 %v1835_v55  ;;  %v4610_v27 = vtrunc.f32 %v1836_v35 }
 0x19b   :  { %3315 = vrcp.f32 %v855_v7 }
 0x19c   :  { %v4606_v9 = vpop.eup %3297  ;;  %3317 = vrcp.f32 %v858_v20  ;;  %v1053_v29 = vmul.f32 %v3461_v22, %v894_v15  ;;  %v1054_v50 = vmul.f32 %v3462_v61, %v894_v15  ;;  %v1055_v4 = vmul.f32 %v3463_v8, %v894_v15 }
 0x19d   :  { %v3300_v2 = vpop.eup %3299  ;;  %v1056_v40 = vmul.f32 %v3464_v34, %v894_v15  ;;  %v1057_v18 = vmul.f32 %v3465_v14, %v894_v15  ;;  %v1058_v41 = vmul.f32 %v3466_v56, %v894_v15  ;;  %v1059_v12 = vmul.f32 %v3467_v10, %v894_v15 }
 0x19e   :  { %v3302_v44 = vpop.eup %3301  ;;  %v1060_v51 = vmul.f32 %v3468_v26, %v894_v15  ;;  %v3127_v39 = vround.rtne.f32 %v1053_v29  ;;  %v3128_v3 = vround.rtne.f32 %v1054_v50  ;;  %v3129_v63 = vround.rtne.f32 %v1055_v4 }
 0x19f   :  { %v3304_v21 = vpop.eup %3303  ;;  %v3130_v11 = vround.rtne.f32 %v1056_v40  ;;  %v3131_v52 = vround.rtne.f32 %v1057_v18  ;;  %v3132_v16 = vround.rtne.f32 %v1058_v41  ;;  %v3133_v62 = vround.rtne.f32 %v1059_v12 }
 0x1a0   :  { %v4613_v48 = vpop.eup %3305  ;;  %v3134_v6 = vround.rtne.f32 %v1060_v51  ;;  %v1565_v13 = vmax.f32 %v3127_v39, -128.0  ;;  %v1566_v47 = vmax.f32 %v3128_v3, -128.0  ;;  %v1567_v45 = vmax.f32 %v3129_v63, -128.0  ;;  %v3469_v39 = vld [vmem:[#allocation3 + $0x4c0] sm:$0xff] }
 0x1a1   :  { %v4615_v19 = vpop.eup %3307  ;;  %v1568_v59 = vmax.f32 %v3130_v11, -128.0  ;;  %v1569_v60 = vmax.f32 %v3131_v52, -128.0  ;;  %v1570_v46 = vmax.f32 %v3132_v16, -128.0  ;;  %v1571_v43 = vmax.f32 %v3133_v62, -128.0  ;;  %v3473_v62 = vld [vmem:[#allocation3 + $0x4e0] sm:$0xff] }
 0x1a2   :  { %v4617_v23 = vpop.eup %3309  ;;  %v1572_v54 = vmax.f32 %v3134_v6, -128.0  ;;  %v1821_v17 = vmin.f32 %v1565_v13, 127.0  ;;  %v1822_v7 = vmin.f32 %v1566_v47, 127.0  ;;  %v1823_v20 = vmin.f32 %v1567_v45, 127.0  ;;  %v3474_v13 = vld [vmem:[#allocation3 + $0x4e8] sm:$0xff]  ;;  %v3475_v45 = vld [vmem:[#allocation3 + $0x4f0] sm:$0xff] }
 0x1a3   :  { %v4619_v1 = vpop.eup %3311  ;;  %v1824_v28 = vmin.f32 %v1568_v59, 127.0  ;;  %v1825_v30 = vmin.f32 %v1569_v60, 127.0  ;;  %v1826_v24 = vmin.f32 %v1570_v46, 127.0  ;;  %v1827_v38 = vmin.f32 %v1571_v43, 127.0  ;;  %v3476_v60 = vld [vmem:[#allocation3 + $0x4f8] sm:$0xff] }
 0x1a4   :  { %v4621_v49 = vpop.eup %3313  ;;  %v1828_v57 = vmin.f32 %v1572_v54, 127.0  ;;  %v4625_v35 = vtrunc.f32 %v1821_v17  ;;  %v4627_v42 = vtrunc.f32 %v1822_v7  ;;  %v4629_v15 = vtrunc.f32 %v1823_v20 }
 0x1a5   :  { %v4623_v55 = vpop.eup %3315  ;;  %v4631_v22 = vtrunc.f32 %v1824_v28  ;;  %v4635_v61 = vtrunc.f32 %v1825_v30  ;;  %v4637_v50 = vtrunc.f32 %v1826_v24  ;;  %v4639_v8 = vtrunc.f32 %v1827_v38 }
 0x1a6   :  { %v4633_v29 = vpop.eup %3317  ;;  %v4641_v4 = vtrunc.f32 %v1828_v57  ;;  %v900_v14 = vmul.f32 127.0, %v4606_v9  ;;  %v4648_v18 = vmul.f32 127.0, %v3300_v2  ;;  %v4654_v10 = vmul.f32 127.0, %v3302_v44  ;;  %v3470_v2 = vld [vmem:[#allocation3 + $0x4c8] sm:$0xff]  ;;  %v3471_v44 = vld [vmem:[#allocation3 + $0x4d0] sm:$0xff] }
 0x1a7   :  { %v4656_v12 = vmul.f32 127.0, %v3304_v21  ;;  %v3472_v21 = vld [vmem:[#allocation3 + $0x4d8] sm:$0xff] }
 0x1a8   :  { %v1077_v9 = vmul.f32 %v3469_v39, %v900_v14  ;;  %v1078_v3 = vmul.f32 %v3470_v2, %v900_v14  ;;  %v1079_v52 = vmul.f32 %v3471_v44, %v900_v14  ;;  %v1080_v16 = vmul.f32 %v3472_v21, %v900_v14 }
 0x1a9   :  { %v1081_v6 = vmul.f32 %v3473_v62, %v900_v14  ;;  %v1082_v47 = vmul.f32 %v3474_v13, %v900_v14  ;;  %v1083_v59 = vmul.f32 %v3475_v45, %v900_v14  ;;  %v1084_v46 = vmul.f32 %v3476_v60, %v900_v14 }
 0x1aa   :  { %v3151_v43 = vround.rtne.f32 %v1077_v9  ;;  %v3152_v54 = vround.rtne.f32 %v1078_v3  ;;  %v3153_v17 = vround.rtne.f32 %v1079_v52  ;;  %v3154_v7 = vround.rtne.f32 %v1080_v16 }
 0x1ab   :  { %v3155_v20 = vround.rtne.f32 %v1081_v6  ;;  %v3156_v28 = vround.rtne.f32 %v1082_v47  ;;  %v3157_v30 = vround.rtne.f32 %v1083_v59  ;;  %v3158_v24 = vround.rtne.f32 %v1084_v46 }
 0x1ac   :  { %v1589_v38 = vmax.f32 %v3151_v43, -128.0  ;;  %v1590_v57 = vmax.f32 %v3152_v54, -128.0  ;;  %v1591_v39 = vmax.f32 %v3153_v17, -128.0  ;;  %v1592_v2 = vmax.f32 %v3154_v7, -128.0  ;;  %v3477_v7 = vld [vmem:[#allocation3 + $0x480] sm:$0xff] }
 0x1ad   :  { %v1593_v44 = vmax.f32 %v3155_v20, -128.0  ;;  %v1594_v21 = vmax.f32 %v3156_v28, -128.0  ;;  %v1595_v62 = vmax.f32 %v3157_v30, -128.0  ;;  %v1596_v13 = vmax.f32 %v3158_v24, -128.0  ;;  %v3478_v28 = vld [vmem:[#allocation3 + $0x488] sm:$0xff]  ;;  %v3479_v30 = vld [vmem:[#allocation3 + $0x490] sm:$0xff] }
 0x1ae   :  { %v1845_v58 = vmin.f32 %v1589_v38, 127.0  ;;  %v1846_v45 = vmin.f32 %v1590_v57, 127.0  ;;  %v1847_v11 = vmin.f32 %v1591_v39, 127.0  ;;  %v1848_v14 = vmin.f32 %v1592_v2, 127.0  ;;  %v3480_v24 = vld [vmem:[#allocation3 + $0x498] sm:$0xff]  ;;  %v3481_v57 = vld [vmem:[#allocation3 + $0x4a0] sm:$0xff] }
 0x1af   :  { %v1849_v9 = vmin.f32 %v1593_v44, 127.0  ;;  %v1850_v3 = vmin.f32 %v1594_v21, 127.0  ;;  %v1851_v52 = vmin.f32 %v1595_v62, 127.0  ;;  %v1852_v16 = vmin.f32 %v1596_v13, 127.0  ;;  %v3482_v2 = vld [vmem:[#allocation3 + $0x4a8] sm:$0xff]  ;;  %v3483_v21 = vld [vmem:[#allocation3 + $0x4b0] sm:$0xff] }
 0x1b0   :  { %v4666_v6 = vtrunc.f32 %v1845_v58  ;;  %v4668_v47 = vtrunc.f32 %v1846_v45  ;;  %v4670_v59 = vtrunc.f32 %v1847_v11  ;;  %v4672_v60 = vtrunc.f32 %v1848_v14  ;;  %v3484_v13 = vld [vmem:[#allocation3 + $0x4b8] sm:$0xff] }
 0x1b1   :  { %v4674_v46 = vtrunc.f32 %v1849_v9  ;;  %v4676_v43 = vtrunc.f32 %v1850_v3  ;;  %v4678_v54 = vtrunc.f32 %v1851_v52  ;;  %v4680_v17 = vtrunc.f32 %v1852_v16 }
 0x1b2   :  { %v1069_v20 = vmul.f32 %v3477_v7, %v4648_v18  ;;  %v1070_v58 = vmul.f32 %v3478_v28, %v4648_v18  ;;  %v1071_v11 = vmul.f32 %v3479_v30, %v4648_v18  ;;  %v1072_v38 = vmul.f32 %v3480_v24, %v4648_v18 }
 0x1b3   :  { %v1073_v39 = vmul.f32 %v3481_v57, %v4648_v18  ;;  %v1074_v44 = vmul.f32 %v3482_v2, %v4648_v18  ;;  %v1075_v62 = vmul.f32 %v3483_v21, %v4648_v18  ;;  %v1076_v45 = vmul.f32 %v3484_v13, %v4648_v18 }
 0x1b4   :  { %v3143_v14 = vround.rtne.f32 %v1069_v20  ;;  %v3144_v9 = vround.rtne.f32 %v1070_v58  ;;  %v3145_v3 = vround.rtne.f32 %v1071_v11  ;;  %v3146_v52 = vround.rtne.f32 %v1072_v38 }
 0x1b5   :  { %v3147_v16 = vround.rtne.f32 %v1073_v39  ;;  %v3148_v7 = vround.rtne.f32 %v1074_v44  ;;  %v3149_v28 = vround.rtne.f32 %v1075_v62  ;;  %v3150_v30 = vround.rtne.f32 %v1076_v45 }
 0x1b6   :  { %v1581_v24 = vmax.f32 %v3143_v14, -128.0  ;;  %v1582_v63 = vmax.f32 %v3144_v9, -128.0  ;;  %v1583_v57 = vmax.f32 %v3145_v3, -128.0  ;;  %v1584_v51 = vmax.f32 %v3146_v52, -128.0 }
 0x1b7   :  { %v1585_v26 = vmax.f32 %v3147_v16, -128.0  ;;  %v1586_v2 = vmax.f32 %v3148_v7, -128.0  ;;  %v1587_v41 = vmax.f32 %v3149_v28, -128.0  ;;  %v1588_v56 = vmax.f32 %v3150_v30, -128.0  ;;  %v3485_v7 = vld [vmem:[#allocation3 + $0x540] sm:$0xff]  ;;  %v3488_v28 = vld [vmem:[#allocation3 + $0x558] sm:$0xff] }
 0x1b8   :  { %v1837_v21 = vmin.f32 %v1581_v24, 127.0  ;;  %v1838_v40 = vmin.f32 %v1582_v63, 127.0  ;;  %v1839_v34 = vmin.f32 %v1583_v57, 127.0  ;;  %v1840_v18 = vmin.f32 %v1584_v51, 127.0  ;;  %v3486_v51 = vld [vmem:[#allocation3 + $0x548] sm:$0xff] }
 0x1b9   :  { %v1841_v20 = vmin.f32 %v1585_v26, 127.0  ;;  %v1842_v58 = vmin.f32 %v1586_v2, 127.0  ;;  %v1843_v11 = vmin.f32 %v1587_v41, 127.0  ;;  %v1844_v38 = vmin.f32 %v1588_v56, 127.0 }
 0x1ba   :  { %v2093_v39 = vtrunc.f32 %v1837_v21  ;;  %v2094_v44 = vtrunc.f32 %v1838_v40  ;;  %v2095_v62 = vtrunc.f32 %v1839_v34  ;;  %v2096_v13 = vtrunc.f32 %v1840_v18  ;;  %v3487_v34 = vld [vmem:[#allocation3 + $0x550] sm:$0xff] }
 0x1bb   :  { %v2097_v45 = vtrunc.f32 %v1841_v20  ;;  %v2098_v14 = vtrunc.f32 %v1842_v58  ;;  %v2099_v9 = vtrunc.f32 %v1843_v11  ;;  %v2100_v3 = vtrunc.f32 %v1844_v38 }
 0x1bc   :  { %v2529_v52 = vpack.c.f32.eXmY %v2093_v39, %v4666_v6, 312  ;;  %v2539_v16 = vpack.c.f32.eXmY %v2094_v44, %v4668_v47, 312  ;;  %v1093_v63 = vmul.f32 %v3485_v7, %v4654_v10  ;;  %v1094_v26 = vmul.f32 %v3486_v51, %v4654_v10 }
 0x1bd   :  { %v2549_v56 = vpack.c.f32.eXmY %v2095_v62, %v4670_v59, 312  ;;  %v2559_v40 = vpack.c.f32.eXmY %v2096_v13, %v4672_v60, 312  ;;  %v1095_v41 = vmul.f32 %v3487_v34, %v4654_v10  ;;  %v1096_v30 = vmul.f32 %v3488_v28, %v4654_v10 }
 0x1be   :  { %v5134_v6 = vpack.c.f32.eXmY %v4625_v35, %v4580_v25, 312  ;;  %v5135_v24 = vpack.c.f32.eXmY %v4627_v42, %v4596_v53, 312  ;;  %v3167_v38 = vround.rtne.f32 %v1093_v63  ;;  %v3168_v39 = vround.rtne.f32 %v1094_v26 }
 0x1bf   :  { %v2569_v2 = vpack.c.f32.eXmY %v2097_v45, %v4674_v46, 312  ;;  %v2579_v59 = vpack.c.f32.eXmY %v2098_v14, %v4676_v43, 312  ;;  %v3490_v43 = vld [vmem:[#allocation3 + $0x568] sm:$0xff]  ;;  %v3169_v44 = vround.rtne.f32 %v1095_v41  ;;  %v3170_v62 = vround.rtne.f32 %v1096_v30 }
 0x1c0   :  { %v2533_v47 = vpack.c.b8 %v2529_v52, %v5134_v6  ;;  %v2543_v57 = vpack.c.b8 %v2539_v16, %v5135_v24  ;;  %v5136_v60 = vpack.c.f32.eXmY %v4629_v15, %v4598_v31, 312  ;;  %v5137_v18 = vpack.c.f32.eXmY %v4631_v22, %v4600_v5, 312  ;;  %v3489_v31 = vld [vmem:[#allocation3 + $0x560] sm:$0xff] }
 0x1c1   :  { %v2589_v58 = vpack.c.f32.eXmY %v2099_v9, %v4678_v54, 312  ;;  %v2599_v25 = vpack.c.f32.eXmY %v2100_v3, %v4680_v17, 312  ;;  %v1097_v15 = vmul.f32 %v3489_v31, %v4654_v10  ;;  %v1098_v5 = vmul.f32 %v3490_v43, %v4654_v10  ;;  %v3492_v17 = vld [vmem:[#allocation3 + $0x578] sm:$0xff]  ;;  %v3498_v31 = vld [vmem:[#allocation3 + $0x528] sm:$0xff]  ;;  %v3499_v43 = vld [vmem:[#allocation3 + $0x530] sm:$0xff] }
 0x1c2   :  { %v2553_v21 = vpack.c.b8 %v2549_v56, %v5136_v60  ;;  %v2563_v20 = vpack.c.b8 %v2559_v40, %v5137_v18  ;;  %v5138_v53 = vpack.c.f32.eXmY %v4635_v61, %v4602_v37, 312  ;;  %v5139_v42 = vpack.c.f32.eXmY %v4637_v50, %v4604_v32, 312  ;;  %2877 = vst [vmem:[#allocation6 + $0x100] sm:$0xff] %v2533_v47  ;;  %v3491_v32 = vld [vmem:[#allocation3 + $0x570] sm:$0xff]  ;;  %v3493_v60 = vld [vmem:[#allocation3 + $0x500] sm:$0xff]  ;;  %v3494_v18 = vld [vmem:[#allocation3 + $0x508] sm:$0xff] }
 0x1c3   :  { %2878 = vst [vmem:[#allocation6 + $0x108] sm:$0xff] %v2543_v57  ;;  %v5140_v22 = vpack.c.f32.eXmY %v4639_v8, %v4608_v36, 312  ;;  %v5141_v37 = vpack.c.f32.eXmY %v4641_v4, %v4610_v27, 312  ;;  %v1099_v50 = vmul.f32 %v3491_v32, %v4654_v10  ;;  %v1100_v11 = vmul.f32 %v3492_v17, %v4654_v10 }
 0x1c4   :  { %v2573_v35 = vpack.c.b8 %v2569_v2, %v5138_v53  ;;  %v2583_v46 = vpack.c.b8 %v2579_v59, %v5139_v42  ;;  %2879 = vst [vmem:[#allocation6 + $0x110] sm:$0xff] %v2553_v21  ;;  %2880 = vst [vmem:[#allocation6 + $0x118] sm:$0xff] %v2563_v20  ;;  %v3171_v36 = vround.rtne.f32 %v1097_v15  ;;  %v3172_v8 = vround.rtne.f32 %v1098_v5  ;;  %v3496_v53 = vld [vmem:[#allocation3 + $0x518] sm:$0xff]  ;;  %v3497_v42 = vld [vmem:[#allocation3 + $0x520] sm:$0xff] }
 0x1c5   :  { %v2593_v54 = vpack.c.b8 %v2589_v58, %v5140_v22  ;;  %v2603_v61 = vpack.c.b8 %v2599_v25, %v5141_v37  ;;  %v3173_v27 = vround.rtne.f32 %v1099_v50  ;;  %v3174_v4 = vround.rtne.f32 %v1100_v11  ;;  %v3495_v58 = vld [vmem:[#allocation3 + $0x510] sm:$0xff]  ;;  %v3500_v22 = vld [vmem:[#allocation3 + $0x538] sm:$0xff] }
 0x1c6   :  { %2881 = vst [vmem:[#allocation6 + $0x120] sm:$0xff] %v2573_v35  ;;  %2882 = vst [vmem:[#allocation6 + $0x128] sm:$0xff] %v2583_v46  ;;  %v1605_v13 = vmax.f32 %v3167_v38, -128.0  ;;  %v1606_v45 = vmax.f32 %v3168_v39, -128.0  ;;  %v1607_v14 = vmax.f32 %v3169_v44, -128.0  ;;  %v1608_v9 = vmax.f32 %v3170_v62, -128.0 }
 0x1c7   :  { %2883 = vst [vmem:[#allocation6 + $0x130] sm:$0xff] %v2593_v54  ;;  %2884 = vst [vmem:[#allocation6 + $0x138] sm:$0xff] %v2603_v61  ;;  %v1609_v3 = vmax.f32 %v3171_v36, -128.0  ;;  %v1610_v52 = vmax.f32 %v3172_v8, -128.0  ;;  %v1611_v16 = vmax.f32 %v3173_v27, -128.0  ;;  %v1612_v10 = vmax.f32 %v3174_v4, -128.0 }
 0x1c8   :  { %v1861_v7 = vmin.f32 %v1605_v13, 127.0  ;;  %v1862_v51 = vmin.f32 %v1606_v45, 127.0  ;;  %v1863_v63 = vmin.f32 %v1607_v14, 127.0  ;;  %v1864_v26 = vmin.f32 %v1608_v9, 127.0 }
 0x1c9   :  { %v1865_v56 = vmin.f32 %v1609_v3, 127.0  ;;  %v1866_v40 = vmin.f32 %v1610_v52, 127.0  ;;  %v1867_v34 = vmin.f32 %v1611_v16, 127.0  ;;  %v1868_v41 = vmin.f32 %v1612_v10, 127.0 }
 0x1ca   :  { %v4730_v28 = vtrunc.f32 %v1861_v7  ;;  %v4732_v30 = vtrunc.f32 %v1862_v51  ;;  %v4734_v6 = vtrunc.f32 %v1863_v63  ;;  %v4736_v47 = vtrunc.f32 %v1864_v26 }
 0x1cb   :  { %v4738_v24 = vtrunc.f32 %v1865_v56  ;;  %v4740_v57 = vtrunc.f32 %v1866_v40  ;;  %v4742_v2 = vtrunc.f32 %v1867_v34  ;;  %v4744_v59 = vtrunc.f32 %v1868_v41 }
 0x1cc   :  { %v1085_v21 = vmul.f32 %v3493_v60, %v4656_v12  ;;  %v1086_v20 = vmul.f32 %v3494_v18, %v4656_v12  ;;  %v1087_v25 = vmul.f32 %v3495_v58, %v4656_v12  ;;  %v1088_v35 = vmul.f32 %v3496_v53, %v4656_v12 }
 0x1cd   :  { %v1089_v46 = vmul.f32 %v3497_v42, %v4656_v12  ;;  %v1090_v15 = vmul.f32 %v3498_v31, %v4656_v12  ;;  %v1091_v5 = vmul.f32 %v3499_v43, %v4656_v12  ;;  %v1092_v54 = vmul.f32 %v3500_v22, %v4656_v12  ;;  %v3503_v22 = vld [vmem:[#allocation3 + $0x5d0] sm:$0xff] }
 0x1ce   :  { %v3159_v37 = vround.rtne.f32 %v1085_v21  ;;  %v3160_v61 = vround.rtne.f32 %v1086_v20  ;;  %v3161_v32 = vround.rtne.f32 %v1087_v25  ;;  %v3162_v50 = vround.rtne.f32 %v1088_v35 }
 0x1cf   :  { %v3163_v17 = vround.rtne.f32 %v1089_v46  ;;  %v3164_v11 = vround.rtne.f32 %v1090_v15  ;;  %v3165_v38 = vround.rtne.f32 %v1091_v5  ;;  %v3166_v39 = vround.rtne.f32 %v1092_v54  ;;  %v3502_v15 = vld [vmem:[#allocation3 + $0x5c8] sm:$0xff] }
 0x1d0   :  { %v1597_v44 = vmax.f32 %v3159_v37, -128.0  ;;  %v1598_v62 = vmax.f32 %v3160_v61, -128.0  ;;  %v1599_v36 = vmax.f32 %v3161_v32, -128.0  ;;  %v1600_v8 = vmax.f32 %v3162_v50, -128.0  ;;  %v3505_v61 = vld [vmem:[#allocation3 + $0x5e0] sm:$0xff]  ;;  %v3506_v50 = vld [vmem:[#allocation3 + $0x5e8] sm:$0xff] }
 0x1d1   :  { %v1601_v27 = vmax.f32 %v3163_v17, -128.0  ;;  %v1602_v4 = vmax.f32 %v3164_v11, -128.0  ;;  %v1603_v13 = vmax.f32 %v3165_v38, -128.0  ;;  %v1604_v45 = vmax.f32 %v3166_v39, -128.0  ;;  %v3507_v11 = vld [vmem:[#allocation3 + $0x5f0] sm:$0xff]  ;;  %v3508_v39 = vld [vmem:[#allocation3 + $0x5f8] sm:$0xff] }
 0x1d2   :  { %v1853_v14 = vmin.f32 %v1597_v44, 127.0  ;;  %v1854_v9 = vmin.f32 %v1598_v62, 127.0  ;;  %v1855_v3 = vmin.f32 %v1599_v36, 127.0  ;;  %v1856_v12 = vmin.f32 %v1600_v8, 127.0 }
 0x1d3   :  { %v1857_v52 = vmin.f32 %v1601_v27, 127.0  ;;  %v1858_v16 = vmin.f32 %v1602_v4, 127.0  ;;  %v1859_v10 = vmin.f32 %v1603_v13, 127.0  ;;  %v1860_v7 = vmin.f32 %v1604_v45, 127.0 }
 0x1d4   :  { %v4754_v51 = vtrunc.f32 %v1853_v14  ;;  %v4756_v63 = vtrunc.f32 %v1854_v9  ;;  %v4758_v26 = vtrunc.f32 %v1855_v3  ;;  %v4760_v56 = vtrunc.f32 %v1856_v12 }
 0x1d5   :  { %v4762_v40 = vtrunc.f32 %v1857_v52  ;;  %v4764_v34 = vtrunc.f32 %v1858_v16  ;;  %v4766_v41 = vtrunc.f32 %v1859_v10  ;;  %v4768_v60 = vtrunc.f32 %v1860_v7 }
 0x1d6   :  { %v2605_v21 = vpack.c.f32.eXmY %v4754_v51, %v4730_v28, 312  ;;  %v2615_v18 = vpack.c.f32.eXmY %v4756_v63, %v4732_v30, 312  ;;  %v908_v20 = vmul.f32 127.0, %v4613_v48  ;;  %v4776_v58 = vmul.f32 127.0, %v4615_v19  ;;  %v3501_v19 = vld [vmem:[#allocation3 + $0x5c0] sm:$0xff] }
 0x1d7   :  { %v2625_v25 = vpack.c.f32.eXmY %v4758_v26, %v4734_v6, 312  ;;  %v2635_v53 = vpack.c.f32.eXmY %v4760_v56, %v4736_v47, 312  ;;  %v4783_v35 = vmul.f32 127.0, %v4617_v23  ;;  %v4786_v42 = vmul.f32 127.0, %v4619_v1  ;;  %v3504_v1 = vld [vmem:[#allocation3 + $0x5d8] sm:$0xff]  ;;  %v3521_v6 = vld [vmem:[#allocation3 + $0x660] sm:$0xff] }
 0x1d8   :  { %v1109_v31 = vmul.f32 %v3501_v19, %v908_v20  ;;  %v1110_v43 = vmul.f32 %v3502_v15, %v908_v20  ;;  %v1111_v54 = vmul.f32 %v3503_v22, %v908_v20  ;;  %v1112_v37 = vmul.f32 %v3504_v1, %v908_v20 }
 0x1d9   :  { %v1113_v32 = vmul.f32 %v3505_v61, %v908_v20  ;;  %v1114_v17 = vmul.f32 %v3506_v50, %v908_v20  ;;  %v1115_v38 = vmul.f32 %v3507_v11, %v908_v20  ;;  %v1116_v44 = vmul.f32 %v3508_v39, %v908_v20 }
 0x1da   :  { %v3183_v62 = vround.rtne.f32 %v1109_v31  ;;  %v3184_v36 = vround.rtne.f32 %v1110_v43  ;;  %v3185_v8 = vround.rtne.f32 %v1111_v54  ;;  %v3186_v27 = vround.rtne.f32 %v1112_v37 }
 0x1db   :  { %v3187_v4 = vround.rtne.f32 %v1113_v32  ;;  %v3188_v13 = vround.rtne.f32 %v1114_v17  ;;  %v3189_v45 = vround.rtne.f32 %v1115_v38  ;;  %v3190_v14 = vround.rtne.f32 %v1116_v44 }
 0x1dc   :  { %v1621_v9 = vmax.f32 %v3183_v62, -128.0  ;;  %v1622_v3 = vmax.f32 %v3184_v36, -128.0  ;;  %v1623_v12 = vmax.f32 %v3185_v8, -128.0  ;;  %v1624_v52 = vmax.f32 %v3186_v27, -128.0  ;;  %v3509_v62 = vld [vmem:[#allocation3 + $0x580] sm:$0xff]  ;;  %v3510_v8 = vld [vmem:[#allocation3 + $0x588] sm:$0xff] }
 0x1dd   :  { %v1625_v16 = vmax.f32 %v3187_v4, -128.0  ;;  %v1626_v10 = vmax.f32 %v3188_v13, -128.0  ;;  %v1627_v7 = vmax.f32 %v3189_v45, -128.0  ;;  %v1628_v19 = vmax.f32 %v3190_v14, -128.0  ;;  %v3511_v4 = vld [vmem:[#allocation3 + $0x590] sm:$0xff]  ;;  %v3512_v45 = vld [vmem:[#allocation3 + $0x598] sm:$0xff] }
 0x1de   :  { %v1877_v15 = vmin.f32 %v1621_v9, 127.0  ;;  %v1878_v22 = vmin.f32 %v1622_v3, 127.0  ;;  %v1879_v1 = vmin.f32 %v1623_v12, 127.0  ;;  %v1880_v20 = vmin.f32 %v1624_v52, 127.0  ;;  %v3513_v9 = vld [vmem:[#allocation3 + $0x5a0] sm:$0xff]  ;;  %v3514_v12 = vld [vmem:[#allocation3 + $0x5a8] sm:$0xff] }
 0x1df   :  { %v1881_v31 = vmin.f32 %v1625_v16, 127.0  ;;  %v1882_v43 = vmin.f32 %v1626_v10, 127.0  ;;  %v1883_v54 = vmin.f32 %v1627_v7, 127.0  ;;  %v1884_v37 = vmin.f32 %v1628_v19, 127.0  ;;  %v3515_v16 = vld [vmem:[#allocation3 + $0x5b0] sm:$0xff]  ;;  %v3516_v7 = vld [vmem:[#allocation3 + $0x5b8] sm:$0xff] }
 0x1e0   :  { %v4796_v61 = vtrunc.f32 %v1877_v15  ;;  %v4798_v32 = vtrunc.f32 %v1878_v22  ;;  %v4800_v50 = vtrunc.f32 %v1879_v1  ;;  %v4802_v17 = vtrunc.f32 %v1880_v20 }
 0x1e1   :  { %v4804_v11 = vtrunc.f32 %v1881_v31  ;;  %v4806_v38 = vtrunc.f32 %v1882_v43  ;;  %v4808_v39 = vtrunc.f32 %v1883_v54  ;;  %v4810_v44 = vtrunc.f32 %v1884_v37 }
 0x1e2   :  { %v1101_v36 = vmul.f32 %v3509_v62, %v4776_v58  ;;  %v1102_v27 = vmul.f32 %v3510_v8, %v4776_v58  ;;  %v1103_v13 = vmul.f32 %v3511_v4, %v4776_v58  ;;  %v1104_v14 = vmul.f32 %v3512_v45, %v4776_v58 }
 0x1e3   :  { %v1105_v3 = vmul.f32 %v3513_v9, %v4776_v58  ;;  %v1106_v52 = vmul.f32 %v3514_v12, %v4776_v58  ;;  %v1107_v10 = vmul.f32 %v3515_v16, %v4776_v58  ;;  %v1108_v19 = vmul.f32 %v3516_v7, %v4776_v58 }
 0x1e4   :  { %v3175_v15 = vround.rtne.f32 %v1101_v36  ;;  %v3176_v22 = vround.rtne.f32 %v1102_v27  ;;  %v3177_v1 = vround.rtne.f32 %v1103_v13  ;;  %v3178_v20 = vround.rtne.f32 %v1104_v14 }
 0x1e5   :  { %v3179_v31 = vround.rtne.f32 %v1105_v3  ;;  %v3180_v43 = vround.rtne.f32 %v1106_v52  ;;  %v3181_v54 = vround.rtne.f32 %v1107_v10  ;;  %v3182_v37 = vround.rtne.f32 %v1108_v19 }
 0x1e6   :  { %v1613_v62 = vmax.f32 %v3175_v15, -128.0  ;;  %v1614_v8 = vmax.f32 %v3176_v22, -128.0  ;;  %v1615_v4 = vmax.f32 %v3177_v1, -128.0  ;;  %v1616_v45 = vmax.f32 %v3178_v20, -128.0 }
 0x1e7   :  { %v1617_v9 = vmax.f32 %v3179_v31, -128.0  ;;  %v1618_v12 = vmax.f32 %v3180_v43, -128.0  ;;  %v1619_v23 = vmax.f32 %v3181_v54, -128.0  ;;  %v1620_v5 = vmax.f32 %v3182_v37, -128.0  ;;  %v3517_v43 = vld [vmem:[#allocation3 + $0x640] sm:$0xff]  ;;  %v3518_v37 = vld [vmem:[#allocation3 + $0x648] sm:$0xff] }
 0x1e8   :  { %v1869_v16 = vmin.f32 %v1613_v62, 127.0  ;;  %v1870_v48 = vmin.f32 %v1614_v8, 127.0  ;;  %v1871_v46 = vmin.f32 %v1615_v4, 127.0  ;;  %v1872_v58 = vmin.f32 %v1616_v45, 127.0  ;;  %v3520_v8 = vld [vmem:[#allocation3 + $0x658] sm:$0xff] }
 0x1e9   :  { %v1873_v36 = vmin.f32 %v1617_v9, 127.0  ;;  %v1874_v27 = vmin.f32 %v1618_v12, 127.0  ;;  %v1875_v13 = vmin.f32 %v1619_v23, 127.0  ;;  %v1876_v14 = vmin.f32 %v1620_v5, 127.0 }
 0x1ea   :  { %v2125_v3 = vtrunc.f32 %v1869_v16  ;;  %v2126_v52 = vtrunc.f32 %v1870_v48  ;;  %v2127_v10 = vtrunc.f32 %v1871_v46  ;;  %v2128_v7 = vtrunc.f32 %v1872_v58  ;;  %v3519_v46 = vld [vmem:[#allocation3 + $0x650] sm:$0xff] }
 0x1eb   :  { %v2129_v19 = vtrunc.f32 %v1873_v36  ;;  %v2130_v15 = vtrunc.f32 %v1874_v27  ;;  %v2131_v22 = vtrunc.f32 %v1875_v13  ;;  %v2132_v1 = vtrunc.f32 %v1876_v14 }
 0x1ec   :  { %v2609_v20 = vpack.c.f32.eXmY %v2125_v3, %v4796_v61, 312  ;;  %v2619_v31 = vpack.c.f32.eXmY %v2126_v52, %v4798_v32, 312  ;;  %v1125_v54 = vmul.f32 %v3517_v43, %v4783_v35  ;;  %v1126_v62 = vmul.f32 %v3518_v37, %v4783_v35 }
 0x1ed   :  { %v2629_v5 = vpack.c.f32.eXmY %v2127_v10, %v4800_v50, 312  ;;  %v2639_v48 = vpack.c.f32.eXmY %v2128_v7, %v4802_v17, 312  ;;  %v1127_v23 = vmul.f32 %v3519_v46, %v4783_v35  ;;  %v1128_v4 = vmul.f32 %v3520_v8, %v4783_v35  ;;  %v3525_v8 = vld [vmem:[#allocation3 + $0x600] sm:$0xff] }
 0x1ee   :  { %v2613_v61 = vpack.c.b8 %v2609_v20, %v2605_v21  ;;  %v2623_v32 = vpack.c.b8 %v2619_v31, %v2615_v18  ;;  %v2649_v45 = vpack.c.f32.eXmY %v2129_v19, %v4804_v11, 312  ;;  %v2659_v50 = vpack.c.f32.eXmY %v2130_v15, %v4806_v38, 312  ;;  %v3522_v18 = vld [vmem:[#allocation3 + $0x668] sm:$0xff] }
 0x1ef   :  { %v2633_v17 = vpack.c.b8 %v2629_v5, %v2625_v25  ;;  %v2643_v9 = vpack.c.b8 %v2639_v48, %v2635_v53  ;;  %v2669_v12 = vpack.c.f32.eXmY %v2131_v22, %v4808_v39, 312  ;;  %v2679_v28 = vpack.c.f32.eXmY %v2132_v1, %v4810_v44, 312  ;;  %v3524_v53 = vld [vmem:[#allocation3 + $0x678] sm:$0xff] }
 0x1f0   :  { %v5142_v30 = vpack.c.f32.eXmY %v4762_v40, %v4738_v24, 312  ;;  %v5143_v63 = vpack.c.f32.eXmY %v4764_v34, %v4740_v57, 312  ;;  %2885 = vst [vmem:[#allocation6 + $0x140] sm:$0xff] %v2613_v61  ;;  %2886 = vst [vmem:[#allocation6 + $0x148] sm:$0xff] %v2623_v32  ;;  %v1129_v26 = vmul.f32 %v3521_v6, %v4783_v35  ;;  %v3523_v57 = vld [vmem:[#allocation3 + $0x670] sm:$0xff]  ;;  %v3199_v38 = vround.rtne.f32 %v1125_v54  ;;  %v3526_v61 = vld [vmem:[#allocation3 + $0x608] sm:$0xff] }
 0x1f1   :  { %v1130_v47 = vmul.f32 %v3522_v18, %v4783_v35  ;;  %v5144_v56 = vpack.c.f32.eXmY %v4766_v41, %v4742_v2, 312  ;;  %v5145_v24 = vpack.c.f32.eXmY %v4768_v60, %v4744_v59, 312  ;;  %2887 = vst [vmem:[#allocation6 + $0x150] sm:$0xff] %v2633_v17  ;;  %2888 = vst [vmem:[#allocation6 + $0x158] sm:$0xff] %v2643_v9  ;;  %v3200_v39 = vround.rtne.f32 %v1126_v62  ;;  %v3528_v17 = vld [vmem:[#allocation3 + $0x618] sm:$0xff] }
 0x1f2   :  { %v2653_v51 = vpack.c.b8 %v2649_v45, %v5142_v30  ;;  %v2663_v21 = vpack.c.b8 %v2659_v50, %v5143_v63  ;;  %v1131_v34 = vmul.f32 %v3523_v57, %v4783_v35  ;;  %v1132_v11 = vmul.f32 %v3524_v53, %v4783_v35  ;;  %v3527_v45 = vld [vmem:[#allocation3 + $0x610] sm:$0xff]  ;;  %v3530_v30 = vld [vmem:[#allocation3 + $0x628] sm:$0xff]  ;;  %v3532_v6 = vld [vmem:[#allocation3 + $0x638] sm:$0xff] }
 0x1f3   :  { %v2673_v25 = vpack.c.b8 %v2669_v12, %v5144_v56  ;;  %v2683_v40 = vpack.c.b8 %v2679_v28, %v5145_v24  ;;  %v3201_v44 = vround.rtne.f32 %v1127_v23  ;;  %v3202_v16 = vround.rtne.f32 %v1128_v4  ;;  %v3529_v12 = vld [vmem:[#allocation3 + $0x620] sm:$0xff]  ;;  %v3531_v63 = vld [vmem:[#allocation3 + $0x630] sm:$0xff] }
 0x1f4   :  { %2889 = vst [vmem:[#allocation6 + $0x160] sm:$0xff] %v2653_v51  ;;  %2890 = vst [vmem:[#allocation6 + $0x168] sm:$0xff] %v2663_v21  ;;  %v3203_v2 = vround.rtne.f32 %v1129_v26  ;;  %v3204_v41 = vround.rtne.f32 %v1130_v47  ;;  %v3205_v59 = vround.rtne.f32 %v1131_v34  ;;  %v3206_v60 = vround.rtne.f32 %v1132_v11 }
 0x1f5   :  { %2891 = vst [vmem:[#allocation6 + $0x170] sm:$0xff] %v2673_v25  ;;  %2892 = vst [vmem:[#allocation6 + $0x178] sm:$0xff] %v2683_v40  ;;  %v1637_v58 = vmax.f32 %v3199_v38, -128.0  ;;  %v1638_v36 = vmax.f32 %v3200_v39, -128.0  ;;  %v1639_v27 = vmax.f32 %v3201_v44, -128.0  ;;  %v1640_v13 = vmax.f32 %v3202_v16, -128.0 }
 0x1f6   :  { %v1641_v14 = vmax.f32 %v3203_v2, -128.0  ;;  %v1642_v3 = vmax.f32 %v3204_v41, -128.0  ;;  %v1643_v52 = vmax.f32 %v3205_v59, -128.0  ;;  %v1644_v35 = vmax.f32 %v3206_v60, -128.0 }
 0x1f7   :  { %v1893_v10 = vmin.f32 %v1637_v58, 127.0  ;;  %v1894_v7 = vmin.f32 %v1638_v36, 127.0  ;;  %v1895_v19 = vmin.f32 %v1639_v27, 127.0  ;;  %v1896_v15 = vmin.f32 %v1640_v13, 127.0 }
 0x1f8   :  { %v1897_v22 = vmin.f32 %v1641_v14, 127.0  ;;  %v1898_v1 = vmin.f32 %v1642_v3, 127.0  ;;  %v1899_v20 = vmin.f32 %v1643_v52, 127.0  ;;  %v1900_v31 = vmin.f32 %v1644_v35, 127.0 }
 0x1f9   :  { %v4860_v43 = vtrunc.f32 %v1893_v10  ;;  %v4862_v54 = vtrunc.f32 %v1894_v7  ;;  %v4864_v37 = vtrunc.f32 %v1895_v19  ;;  %v4866_v62 = vtrunc.f32 %v1896_v15 }
 0x1fa   :  { %v4868_v5 = vtrunc.f32 %v1897_v22  ;;  %v4870_v48 = vtrunc.f32 %v1898_v1  ;;  %v4872_v46 = vtrunc.f32 %v1899_v20  ;;  %v4874_v23 = vtrunc.f32 %v1900_v31 }
 0x1fb   :  { %v1117_v4 = vmul.f32 %v3525_v8, %v4786_v42  ;;  %v1118_v32 = vmul.f32 %v3526_v61, %v4786_v42  ;;  %v1119_v50 = vmul.f32 %v3527_v45, %v4786_v42  ;;  %v1120_v9 = vmul.f32 %v3528_v17, %v4786_v42 }
 0x1fc   :  { %v1121_v28 = vmul.f32 %v3529_v12, %v4786_v42  ;;  %v1122_v51 = vmul.f32 %v3530_v30, %v4786_v42  ;;  %v1123_v21 = vmul.f32 %v3531_v63, %v4786_v42  ;;  %v1124_v26 = vmul.f32 %v3532_v6, %v4786_v42  ;;  %v3534_v12 = vld [vmem:[#allocation3 + $0x6c8] sm:$0xff] }
 0x1fd   :  { %v3191_v18 = vround.rtne.f32 %v1117_v4  ;;  %v3192_v47 = vround.rtne.f32 %v1118_v32  ;;  %v3193_v56 = vround.rtne.f32 %v1119_v50  ;;  %v3194_v25 = vround.rtne.f32 %v1120_v9 }
 0x1fe   :  { %v3195_v24 = vround.rtne.f32 %v1121_v28  ;;  %v3196_v40 = vround.rtne.f32 %v1122_v51  ;;  %v3197_v57 = vround.rtne.f32 %v1123_v21  ;;  %v3198_v34 = vround.rtne.f32 %v1124_v26  ;;  %v3535_v51 = vld [vmem:[#allocation3 + $0x6d0] sm:$0xff]  ;;  %v3536_v21 = vld [vmem:[#allocation3 + $0x6d8] sm:$0xff]  ;;  %v3537_v26 = vld [vmem:[#allocation3 + $0x6e0] sm:$0xff] }
 0x1ff   :  { %v1629_v53 = vmax.f32 %v3191_v18, -128.0  ;;  %v1630_v11 = vmax.f32 %v3192_v47, -128.0  ;;  %v1631_v38 = vmax.f32 %v3193_v56, -128.0  ;;  %v1632_v39 = vmax.f32 %v3194_v25, -128.0  ;;  %v3538_v47 = vld [vmem:[#allocation3 + $0x6e8] sm:$0xff]  ;;  %v3539_v25 = vld [vmem:[#allocation3 + $0x6f0] sm:$0xff] }
 0x200   :  { %v1633_v44 = vmax.f32 %v3195_v24, -128.0  ;;  %v1634_v16 = vmax.f32 %v3196_v40, -128.0  ;;  %v1635_v2 = vmax.f32 %v3197_v57, -128.0  ;;  %v1636_v41 = vmax.f32 %v3198_v34, -128.0  ;;  %v3540_v40 = vld [vmem:[#allocation3 + $0x6f8] sm:$0xff] }
 0x201   :  { %v1885_v59 = vmin.f32 %v1629_v53, 127.0  ;;  %v1886_v60 = vmin.f32 %v1630_v11, 127.0  ;;  %v1887_v58 = vmin.f32 %v1631_v38, 127.0  ;;  %v1888_v42 = vmin.f32 %v1632_v39, 127.0 }
 0x202   :  { %v1889_v36 = vmin.f32 %v1633_v44, 127.0  ;;  %v1890_v27 = vmin.f32 %v1634_v16, 127.0  ;;  %v1891_v13 = vmin.f32 %v1635_v2, 127.0  ;;  %v1892_v14 = vmin.f32 %v1636_v41, 127.0 }
 0x203   :  { %v4884_v3 = vtrunc.f32 %v1885_v59  ;;  %v4886_v52 = vtrunc.f32 %v1886_v60  ;;  %v4888_v35 = vtrunc.f32 %v1887_v58  ;;  %v4890_v10 = vtrunc.f32 %v1888_v42 }
 0x204   :  { %v4892_v7 = vtrunc.f32 %v1889_v36  ;;  %v4894_v19 = vtrunc.f32 %v1890_v27  ;;  %v4896_v15 = vtrunc.f32 %v1891_v13  ;;  %v4898_v22 = vtrunc.f32 %v1892_v14 }
 0x205   :  { %v2685_v1 = vpack.c.f32.eXmY %v4884_v3, %v4860_v43, 312  ;;  %v2695_v20 = vpack.c.f32.eXmY %v4886_v52, %v4862_v54, 312  ;;  %v916_v31 = vmul.f32 127.0, %v4621_v49  ;;  %v4910_v61 = vmul.f32 127.0, %v4623_v55  ;;  %v3533_v49 = vld [vmem:[#allocation3 + $0x6c0] sm:$0xff] }
 0x206   :  { %v2705_v8 = vpack.c.f32.eXmY %v4888_v35, %v4864_v37, 312  ;;  %v2715_v4 = vpack.c.f32.eXmY %v4890_v10, %v4866_v62, 312  ;;  %v5146_v32 = vmax.f32 %v4594_v0, 1e-05  ;;  %v920_v37 = vmul.f32 127.0, %v4633_v29  ;;  %v3550_v35 = vld [vmem:[#allocation3 + $0x748] sm:$0xff] }
 0x207   :  { %v2725_v50 = vpack.c.f32.eXmY %v4892_v7, %v4868_v5, 312  ;;  %v2735_v17 = vpack.c.f32.eXmY %v4894_v19, %v4870_v48, 312  ;;  %v1141_v9 = vmul.f32 %v3533_v49, %v916_v31  ;;  %v1142_v28 = vmul.f32 %v3534_v12, %v916_v31  ;;  %v3549_v5 = vld [vmem:[#allocation3 + $0x740] sm:$0xff]  ;;  %v3551_v7 = vld [vmem:[#allocation3 + $0x750] sm:$0xff]  ;;  %v3552_v19 = vld [vmem:[#allocation3 + $0x758] sm:$0xff] }
 0x208   :  { %v2941_v45 = vmul.f32 %v3831_v33, %v5146_v32  ;;  %v2745_v30 = vpack.c.f32.eXmY %v4896_v15, %v4872_v46, 312  ;;  %v2755_v55 = vpack.c.f32.eXmY %v4898_v22, %v4874_v23, 312  ;;  %v1143_v63 = vmul.f32 %v3535_v51, %v916_v31  ;;  %v3553_v46 = vld [vmem:[#allocation3 + $0x760] sm:$0xff]  ;;  %v3555_v23 = vld [vmem:[#allocation3 + $0x770] sm:$0xff] }
 0x209   :  { %v1144_v6 = vmul.f32 %v3536_v21, %v916_v31  ;;  %v1145_v18 = vmul.f32 %v3537_v26, %v916_v31  ;;  %v1146_v56 = vmul.f32 %v3538_v47, %v916_v31  ;;  %v1147_v24 = vmul.f32 %v3539_v25, %v916_v31  ;;  %v3541_v25 = vld [vmem:[#allocation3 + $0x680] sm:$0xff] }
 0x20a   :  { %2974 = vst.msk [vmem:[%s5108_s3 + $0xe0] sm:$0xff] %vm2945_vm0, %v2941_v45  ;;  %v1148_v57 = vmul.f32 %v3540_v40, %v916_v31  ;;  %v3215_v34 = vround.rtne.f32 %v1141_v9  ;;  %v3216_v53 = vround.rtne.f32 %v1142_v28  ;;  %v3217_v11 = vround.rtne.f32 %v1143_v63  ;;  %v3542_v40 = vld [vmem:[#allocation3 + $0x688] sm:$0xff] }
 0x20b   :  { %v3218_v38 = vround.rtne.f32 %v1144_v6  ;;  %v3219_v39 = vround.rtne.f32 %v1145_v18  ;;  %v3220_v44 = vround.rtne.f32 %v1146_v56  ;;  %v3221_v16 = vround.rtne.f32 %v1147_v24 }
 0x20c   :  { %v3222_v2 = vround.rtne.f32 %v1148_v57  ;;  %v1653_v41 = vmax.f32 %v3215_v34, -128.0  ;;  %v1654_v59 = vmax.f32 %v3216_v53, -128.0  ;;  %v1655_v60 = vmax.f32 %v3217_v11, -128.0  ;;  %v3543_v34 = vld [vmem:[#allocation3 + $0x690] sm:$0xff]  ;;  %v3544_v11 = vld [vmem:[#allocation3 + $0x698] sm:$0xff] }
 0x20d   :  { %v1656_v58 = vmax.f32 %v3218_v38, -128.0  ;;  %v1657_v42 = vmax.f32 %v3219_v39, -128.0  ;;  %v1658_v36 = vmax.f32 %v3220_v44, -128.0  ;;  %v1659_v27 = vmax.f32 %v3221_v16, -128.0  ;;  %v3545_v39 = vld [vmem:[#allocation3 + $0x6a0] sm:$0xff]  ;;  %v3546_v16 = vld [vmem:[#allocation3 + $0x6a8] sm:$0xff] }
 0x20e   :  { %v1660_v13 = vmax.f32 %v3222_v2, -128.0  ;;  %v1909_v14 = vmin.f32 %v1653_v41, 127.0  ;;  %v1910_v32 = vmin.f32 %v1654_v59, 127.0  ;;  %v1911_v45 = vmin.f32 %v1655_v60, 127.0  ;;  %v3547_v41 = vld [vmem:[#allocation3 + $0x6b0] sm:$0xff]  ;;  %v3548_v60 = vld [vmem:[#allocation3 + $0x6b8] sm:$0xff] }
 0x20f   :  { %v1912_v31 = vmin.f32 %v1656_v58, 127.0  ;;  %v1913_v49 = vmin.f32 %v1657_v42, 127.0  ;;  %v1914_v9 = vmin.f32 %v1658_v36, 127.0  ;;  %v1915_v12 = vmin.f32 %v1659_v27, 127.0 }
 0x210   :  { %v1916_v28 = vmin.f32 %v1660_v13, 127.0  ;;  %v2165_v51 = vtrunc.f32 %v1909_v14  ;;  %v2166_v63 = vtrunc.f32 %v1910_v32  ;;  %v4927_v21 = vtrunc.f32 %v1911_v45 }
 0x211   :  { %v4929_v6 = vtrunc.f32 %v1912_v31  ;;  %v4931_v26 = vtrunc.f32 %v1913_v49  ;;  %v4933_v18 = vtrunc.f32 %v1914_v9  ;;  %v4935_v47 = vtrunc.f32 %v1915_v12 }
 0x212   :  { %v4937_v56 = vtrunc.f32 %v1916_v28  ;;  %v1133_v24 = vmul.f32 %v3541_v25, %v4910_v61  ;;  %v1134_v57 = vmul.f32 %v3542_v40, %v4910_v61  ;;  %v1135_v53 = vmul.f32 %v3543_v34, %v4910_v61 }
 0x213   :  { %v1136_v38 = vmul.f32 %v3544_v11, %v4910_v61  ;;  %v1137_v44 = vmul.f32 %v3545_v39, %v4910_v61  ;;  %v1138_v2 = vmul.f32 %v3546_v16, %v4910_v61  ;;  %v1139_v59 = vmul.f32 %v3547_v41, %v4910_v61 }
 0x214   :  { %v1140_v58 = vmul.f32 %v3548_v60, %v4910_v61  ;;  %v3207_v42 = vround.rtne.f32 %v1133_v24  ;;  %v3208_v36 = vround.rtne.f32 %v1134_v57  ;;  %v3209_v27 = vround.rtne.f32 %v1135_v53 }
 0x215   :  { %v3210_v13 = vround.rtne.f32 %v1136_v38  ;;  %v3211_v14 = vround.rtne.f32 %v1137_v44  ;;  %v3212_v32 = vround.rtne.f32 %v1138_v2  ;;  %v3213_v45 = vround.rtne.f32 %v1139_v59 }
 0x216   :  { %v3214_v31 = vround.rtne.f32 %v1140_v58  ;;  %v1645_v49 = vmax.f32 %v3207_v42, -128.0  ;;  %v1646_v9 = vmax.f32 %v3208_v36, -128.0  ;;  %v1647_v12 = vmax.f32 %v3209_v27, -128.0 }
 0x217   :  { %v1648_v28 = vmax.f32 %v3210_v13, -128.0  ;;  %v1649_v25 = vmax.f32 %v3211_v14, -128.0  ;;  %v1650_v40 = vmax.f32 %v3212_v32, -128.0  ;;  %v1651_v34 = vmax.f32 %v3213_v45, -128.0 }
 0x218   :  { %v1652_v11 = vmax.f32 %v3214_v31, -128.0  ;;  %v1901_v39 = vmin.f32 %v1645_v49, 127.0  ;;  %v1902_v16 = vmin.f32 %v1646_v9, 127.0  ;;  %v1903_v41 = vmin.f32 %v1647_v12, 127.0 }
 0x219   :  { %v1904_v61 = vmin.f32 %v1648_v28, 127.0  ;;  %v1905_v24 = vmin.f32 %v1649_v25, 127.0  ;;  %v1906_v57 = vmin.f32 %v1650_v40, 127.0  ;;  %v1907_v53 = vmin.f32 %v1651_v34, 127.0 }
 0x21a   :  { %v1908_v38 = vmin.f32 %v1652_v11, 127.0  ;;  %v2157_v44 = vtrunc.f32 %v1901_v39  ;;  %v2158_v2 = vtrunc.f32 %v1902_v16  ;;  %v2159_v59 = vtrunc.f32 %v1903_v41 }
 0x21b   :  { %v2160_v60 = vtrunc.f32 %v1904_v61  ;;  %v2161_v58 = vtrunc.f32 %v1905_v24  ;;  %v2162_v42 = vtrunc.f32 %v1906_v57  ;;  %v2163_v36 = vtrunc.f32 %v1907_v53 }
 0x21c   :  { %v2164_v27 = vtrunc.f32 %v1908_v38  ;;  %v2689_v13 = vpack.c.f32.eXmY %v2157_v44, %v2165_v51, 312  ;;  %v2699_v14 = vpack.c.f32.eXmY %v2158_v2, %v2166_v63, 312  ;;  %v1157_v48 = vmul.f32 %v3549_v5, %v920_v37 }
 0x21d   :  { %v2709_v32 = vpack.c.f32.eXmY %v2159_v59, %v4927_v21, 312  ;;  %v2719_v45 = vpack.c.f32.eXmY %v2160_v60, %v4929_v6, 312  ;;  %v1158_v10 = vmul.f32 %v3550_v35, %v920_v37  ;;  %v1159_v29 = vmul.f32 %v3551_v7, %v920_v37 }
 0x21e   :  { %v2693_v31 = vpack.c.b8 %v2689_v13, %v2685_v1  ;;  %v2703_v49 = vpack.c.b8 %v2699_v14, %v2695_v20  ;;  %v2729_v9 = vpack.c.f32.eXmY %v2161_v58, %v4931_v26, 312  ;;  %v2739_v12 = vpack.c.f32.eXmY %v2162_v42, %v4933_v18, 312  ;;  %v3554_v20 = vld [vmem:[#allocation3 + $0x768] sm:$0xff] }
 0x21f   :  { %v2713_v51 = vpack.c.b8 %v2709_v32, %v2705_v8  ;;  %v2723_v63 = vpack.c.b8 %v2719_v45, %v2715_v4  ;;  %v2749_v21 = vpack.c.f32.eXmY %v2163_v36, %v4935_v47, 312  ;;  %v2759_v43 = vpack.c.f32.eXmY %v2164_v27, %v4937_v56, 312  ;;  %v3556_v4 = vld [vmem:[#allocation3 + $0x778] sm:$0xff] }
 0x220   :  { %v2733_v54 = vpack.c.b8 %v2729_v9, %v2725_v50  ;;  %v2743_v3 = vpack.c.b8 %v2739_v12, %v2735_v17  ;;  %2893 = vst [vmem:[#allocation6 + $0x180] sm:$0xff] %v2693_v31  ;;  %2894 = vst [vmem:[#allocation6 + $0x188] sm:$0xff] %v2703_v49  ;;  %v1160_v1 = vmul.f32 %v3552_v19, %v920_v37  ;;  %v828_v17 = vpop.xlane.xlu1 %827  ;;  %v3232_v6 = vround.rtne.f32 %v1158_v10  ;;  %v3562_v10 = vld [vmem:[#allocation3 + $0x728] sm:$0xff] }
 0x221   :  { %v2753_v62 = vpack.c.b8 %v2749_v21, %v2745_v30  ;;  %v2763_v52 = vpack.c.b8 %v2759_v43, %v2755_v55  ;;  %2895 = vst [vmem:[#allocation6 + $0x190] sm:$0xff] %v2713_v51  ;;  %2896 = vst [vmem:[#allocation6 + $0x198] sm:$0xff] %v2723_v63  ;;  %v1161_v15 = vmul.f32 %v3553_v46, %v920_v37  ;;  %v819_v30 = vpop.xlane.xlu0 %818  ;;  %v3231_v55 = vround.rtne.f32 %v1157_v48  ;;  %v3557_v21 = vld [vmem:[#allocation3 + $0x700] sm:$0xff] }
 0x222   :  { %2897 = vst [vmem:[#allocation6 + $0x1a0] sm:$0xff] %v2733_v54  ;;  %2898 = vst [vmem:[#allocation6 + $0x1a8] sm:$0xff] %v2743_v3  ;;  %v1162_v8 = vmul.f32 %v3554_v20, %v920_v37  ;;  %v1163_v22 = vmul.f32 %v3555_v23, %v920_v37  ;;  %v1164_v50 = vmul.f32 %v3556_v4, %v920_v37  ;;  %v3233_v26 = vround.rtne.f32 %v1159_v29  ;;  %v3558_v54 = vld [vmem:[#allocation3 + $0x708] sm:$0xff]  ;;  %v3559_v37 = vld [vmem:[#allocation3 + $0x710] sm:$0xff] }
 0x223   :  { %2899 = vst [vmem:[#allocation6 + $0x1b0] sm:$0xff] %v2753_v62  ;;  %2900 = vst [vmem:[#allocation6 + $0x1b8] sm:$0xff] %v2763_v52  ;;  %v3234_v18 = vround.rtne.f32 %v1160_v1  ;;  %v3235_v47 = vround.rtne.f32 %v1161_v15  ;;  %v5147_v40 = vmax.f32 %v4594_v0, 1e-05  ;;  %v860_v34 = vmax.f32 %v828_v17, 1e-05 }
 0x224   :  { %v3236_v56 = vround.rtne.f32 %v1162_v8  ;;  %v3237_v28 = vround.rtne.f32 %v1163_v22  ;;  %v3238_v25 = vround.rtne.f32 %v1164_v50  ;;  %v859_v11 = vmax.f32 %v819_v30, 1e-05  ;;  %v3560_v52 = vld [vmem:[#allocation3 + $0x718] sm:$0xff]  ;;  %v3561_v48 = vld [vmem:[#allocation3 + $0x720] sm:$0xff]  ;;  %v3563_v29 = vld [vmem:[#allocation3 + $0x730] sm:$0xff] }
 0x225   :  { %3319 = vrcp.f32 %v5147_v40  ;;  %v1669_v39 = vmax.f32 %v3231_v55, -128.0  ;;  %v1670_v16 = vmax.f32 %v3232_v6, -128.0  ;;  %v2944_v41 = vmul.f32 %v3831_v33, %v860_v34  ;;  %v3564_v1 = vld [vmem:[#allocation3 + $0x738] sm:$0xff] }
 0x226   :  { %v2943_v61 = vmul.f32 %v3831_v33, %v859_v11  ;;  %v1671_v24 = vmax.f32 %v3233_v26, -128.0  ;;  %v1672_v57 = vmax.f32 %v3234_v18, -128.0  ;;  %v1673_v53 = vmax.f32 %v3235_v47, -128.0 }
 0x227   :  { %v1674_v38 = vmax.f32 %v3236_v56, -128.0  ;;  %v1675_v44 = vmax.f32 %v3237_v28, -128.0  ;;  %v1676_v2 = vmax.f32 %v3238_v25, -128.0  ;;  %2977 = vst.msk [vmem:[%s5108_s3 + $0xf8] sm:$0xff] %vm2945_vm0, %v2944_v41  ;;  %v1925_v0 = vmin.f32 %v1669_v39, 127.0 }
 0x228   :  { %2976 = vst.msk [vmem:[%s5108_s3 + $0xf0] sm:$0xff] %vm2945_vm0, %v2943_v61  ;;  %v1926_v59 = vmin.f32 %v1670_v16, 127.0  ;;  %v1927_v60 = vmin.f32 %v1671_v24, 127.0  ;;  %v1928_v33 = vmin.f32 %v1672_v57, 127.0  ;;  %v1929_v58 = vmin.f32 %v1673_v53, 127.0  ;;  %s3792_s3 = smov [#allocation6]  }
 0x229   :  { %v1930_v42 = vmin.f32 %v1674_v38, 127.0  ;;  %v1931_v36 = vmin.f32 %v1675_v44, 127.0  ;;  %v1932_v27 = vmin.f32 %v1676_v2, 127.0  ;;  %v4990_v14 = vtrunc.f32 %v1925_v0  ;;  %s2983_s10 = sshll.u32 %s3792_s3, 4  ;;  %s2984_s10 = int_to_ptr.vmem [resolvable:$true] %s2983_s10 }
 0x22a   :  { %v4992_v32 = vtrunc.f32 %v1926_v59  ;;  %3321 = vrcp.f32 %v860_v34  ;;  %v4994_v45 = vtrunc.f32 %v1927_v60  ;;  %v4996_v31 = vtrunc.f32 %v1928_v33  ;;  %s3603_s11 = scalar_lea.vmem %s2984_s10, 8192  ;;  %p3608_p9 = scmp.lt.s32.totalorder %s2984_s10, %s2984_s10 }
 0x22b   :  { %3323 = vrcp.f32 %v859_v11  ;;  %v4998_v9 = vtrunc.f32 %v1929_v58  ;;  %v5000_v12 = vtrunc.f32 %v1930_v42  ;;  %v5002_v51 = vtrunc.f32 %v1931_v36  ;;  %p3604_p8 = scmp.ne.s32.totalorder %s2984_s10, %s3603_s11  ;;  %p3609_p10 = scmp.lt.s32.totalorder %s3603_s11, %s3603_s11 }
 0x22c   :  { %v5004_v63 = vtrunc.f32 %v1932_v27 }
 0x22d   :  { %p3610_p11 = por %p3609_p10, %p3608_p9 }
 0x22f   :  { %v3320_v13 = vpop.eup %3319  ;;  %p3611_p12 = pnand %p3610_p11, %p3604_p8 }
 0x230   :  { %v918_v49 = vmul.f32 127.0, %v3320_v13 }
 0x232   :  { %v1149_v43 = vmul.f32 %v3557_v21, %v918_v49  ;;  %v1150_v3 = vmul.f32 %v3558_v54, %v918_v49  ;;  %v1151_v62 = vmul.f32 %v3559_v37, %v918_v49  ;;  %v1152_v5 = vmul.f32 %v3560_v52, %v918_v49  ;;  %v3565_v54 = vld [vmem:[#allocation3 + $0x7c0] sm:$0xff]  ;;  %v3566_v37 = vld [vmem:[#allocation3 + $0x7c8] sm:$0xff] }
 0x233   :  { %v1153_v35 = vmul.f32 %v3561_v48, %v918_v49  ;;  %v1154_v7 = vmul.f32 %v3562_v10, %v918_v49  ;;  %v1155_v19 = vmul.f32 %v3563_v29, %v918_v49  ;;  %v1156_v46 = vmul.f32 %v3564_v1, %v918_v49  ;;  %v3567_v48 = vld [vmem:[#allocation3 + $0x7d0] sm:$0xff]  ;;  %v3568_v10 = vld [vmem:[#allocation3 + $0x7d8] sm:$0xff]  ;;  %v3569_v29 = vld [vmem:[#allocation3 + $0x7e0] sm:$0xff] }
 0x234   :  { %v3223_v15 = vround.rtne.f32 %v1149_v43  ;;  %v3224_v20 = vround.rtne.f32 %v1150_v3  ;;  %v3225_v8 = vround.rtne.f32 %v1151_v62  ;;  %v3226_v23 = vround.rtne.f32 %v1152_v5  ;;  %v3322_v39 = vpop.eup %3321  ;;  %v3570_v1 = vld [vmem:[#allocation3 + $0x7e8] sm:$0xff] }
 0x235   :  { %v3227_v22 = vround.rtne.f32 %v1153_v35  ;;  %v3228_v4 = vround.rtne.f32 %v1154_v7  ;;  %v3229_v50 = vround.rtne.f32 %v1155_v19  ;;  %v3230_v17 = vround.rtne.f32 %v1156_v46  ;;  %v3324_v57 = vpop.eup %3323 }
 0x236   :  { %v1661_v30 = vmax.f32 %v3223_v15, -128.0  ;;  %v1662_v55 = vmax.f32 %v3224_v20, -128.0  ;;  %v1663_v6 = vmax.f32 %v3225_v8, -128.0  ;;  %v1664_v26 = vmax.f32 %v3226_v23, -128.0  ;;  %v3571_v15 = vld [vmem:[#allocation3 + $0x7f0] sm:$0xff]  ;;  %v3572_v8 = vld [vmem:[#allocation3 + $0x7f8] sm:$0xff] }
 0x237   :  { %v1665_v18 = vmax.f32 %v3227_v22, -128.0  ;;  %v1666_v47 = vmax.f32 %v3228_v4, -128.0  ;;  %v1667_v56 = vmax.f32 %v3229_v50, -128.0  ;;  %v1668_v28 = vmax.f32 %v3230_v17, -128.0 }
 0x238   :  { %v1917_v25 = vmin.f32 %v1661_v30, 127.0  ;;  %v1918_v40 = vmin.f32 %v1662_v55, 127.0  ;;  %v1919_v34 = vmin.f32 %v1663_v6, 127.0  ;;  %v1920_v11 = vmin.f32 %v1664_v26, 127.0 }
 0x239   :  { %v1921_v16 = vmin.f32 %v1665_v18, 127.0  ;;  %v1922_v41 = vmin.f32 %v1666_v47, 127.0  ;;  %v1923_v61 = vmin.f32 %v1667_v56, 127.0  ;;  %v1924_v24 = vmin.f32 %v1668_v28, 127.0 }
 0x23a   :  { %v5006_v53 = vtrunc.f32 %v1917_v25  ;;  %v5008_v38 = vtrunc.f32 %v1918_v40  ;;  %v5010_v44 = vtrunc.f32 %v1919_v34  ;;  %v5012_v2 = vtrunc.f32 %v1920_v11 }
 0x23b   :  { %v5014_v0 = vtrunc.f32 %v1921_v16  ;;  %v5016_v59 = vtrunc.f32 %v1922_v41  ;;  %v5018_v60 = vtrunc.f32 %v1923_v61  ;;  %v5020_v33 = vtrunc.f32 %v1924_v24 }
 0x23c   :  { %v2765_v58 = vpack.c.f32.eXmY %v5006_v53, %v4990_v14, 312  ;;  %v2775_v42 = vpack.c.f32.eXmY %v5008_v38, %v4992_v32, 312  ;;  %v924_v36 = vmul.f32 127.0, %v3322_v39  ;;  %v5030_v49 = vmul.f32 127.0, %v3324_v57 }
 0x23d   :  { %v2785_v27 = vpack.c.f32.eXmY %v5010_v44, %v4994_v45, 312  ;;  %v2795_v13 = vpack.c.f32.eXmY %v5012_v2, %v4996_v31, 312 }
 0x23e   :  { %v2805_v21 = vpack.c.f32.eXmY %v5014_v0, %v4998_v9, 312  ;;  %v2815_v43 = vpack.c.f32.eXmY %v5016_v59, %v5000_v12, 312  ;;  %v1173_v3 = vmul.f32 %v3565_v54, %v924_v36  ;;  %v1174_v62 = vmul.f32 %v3566_v37, %v924_v36 }
 0x23f   :  { %v2825_v52 = vpack.c.f32.eXmY %v5018_v60, %v5002_v51, 312  ;;  %v2835_v5 = vpack.c.f32.eXmY %v5020_v33, %v5004_v63, 312  ;;  %v1175_v35 = vmul.f32 %v3567_v48, %v924_v36  ;;  %v1176_v7 = vmul.f32 %v3568_v10, %v924_v36 }
 0x240   :  { %v1177_v19 = vmul.f32 %v3569_v29, %v924_v36  ;;  %v1178_v46 = vmul.f32 %v3570_v1, %v924_v36  ;;  %v1179_v20 = vmul.f32 %v3571_v15, %v924_v36  ;;  %v1180_v23 = vmul.f32 %v3572_v8, %v924_v36 }
 0x241   :  { %v3247_v22 = vround.rtne.f32 %v1173_v3  ;;  %v3248_v4 = vround.rtne.f32 %v1174_v62  ;;  %v3249_v50 = vround.rtne.f32 %v1175_v35  ;;  %v3250_v17 = vround.rtne.f32 %v1176_v7 }
 0x242   :  { %v3251_v30 = vround.rtne.f32 %v1177_v19  ;;  %v3252_v55 = vround.rtne.f32 %v1178_v46  ;;  %v3253_v6 = vround.rtne.f32 %v1179_v20  ;;  %v3254_v26 = vround.rtne.f32 %v1180_v23  ;;  %v3573_v19 = vld [vmem:[#allocation3 + $0x780] sm:$0xff]  ;;  %v3574_v46 = vld [vmem:[#allocation3 + $0x788] sm:$0xff]  ;;  %v3575_v20 = vld [vmem:[#allocation3 + $0x790] sm:$0xff] }
 0x243   :  { %v1685_v18 = vmax.f32 %v3247_v22, -128.0  ;;  %v1686_v47 = vmax.f32 %v3248_v4, -128.0  ;;  %v1687_v56 = vmax.f32 %v3249_v50, -128.0  ;;  %v1688_v28 = vmax.f32 %v3250_v17, -128.0  ;;  %v3576_v23 = vld [vmem:[#allocation3 + $0x798] sm:$0xff]  ;;  %v3577_v4 = vld [vmem:[#allocation3 + $0x7a0] sm:$0xff] }
 0x244   :  { %v1689_v25 = vmax.f32 %v3251_v30, -128.0  ;;  %v1690_v40 = vmax.f32 %v3252_v55, -128.0  ;;  %v1691_v34 = vmax.f32 %v3253_v6, -128.0  ;;  %v1692_v11 = vmax.f32 %v3254_v26, -128.0  ;;  %v3578_v17 = vld [vmem:[#allocation3 + $0x7a8] sm:$0xff]  ;;  %v3579_v55 = vld [vmem:[#allocation3 + $0x7b0] sm:$0xff] }
 0x245   :  { %v1941_v39 = vmin.f32 %v1685_v18, 127.0  ;;  %v1942_v16 = vmin.f32 %v1686_v47, 127.0  ;;  %v1943_v41 = vmin.f32 %v1687_v56, 127.0  ;;  %v1944_v61 = vmin.f32 %v1688_v28, 127.0  ;;  %v3580_v26 = vld [vmem:[#allocation3 + $0x7b8] sm:$0xff] }
 0x246   :  { %v1945_v24 = vmin.f32 %v1689_v25, 127.0  ;;  %v1946_v57 = vmin.f32 %v1690_v40, 127.0  ;;  %v1947_v36 = vmin.f32 %v1691_v34, 127.0  ;;  %v1948_v54 = vmin.f32 %v1692_v11, 127.0 }
 0x247   :  { %v2197_v3 = vtrunc.f32 %v1941_v39  ;;  %v2198_v37 = vtrunc.f32 %v1942_v16  ;;  %v5040_v62 = vtrunc.f32 %v1943_v41  ;;  %v5042_v48 = vtrunc.f32 %v1944_v61 }
 0x248   :  { %v5044_v35 = vtrunc.f32 %v1945_v24  ;;  %v5046_v10 = vtrunc.f32 %v1946_v57  ;;  %v5048_v7 = vtrunc.f32 %v1947_v36  ;;  %v5050_v29 = vtrunc.f32 %v1948_v54 }
 0x249   :  { %v1165_v1 = vmul.f32 %v3573_v19, %v5030_v49  ;;  %v1166_v15 = vmul.f32 %v3574_v46, %v5030_v49  ;;  %v1167_v8 = vmul.f32 %v3575_v20, %v5030_v49  ;;  %v1168_v22 = vmul.f32 %v3576_v23, %v5030_v49 }
 0x24a   :  { %v1169_v50 = vmul.f32 %v3577_v4, %v5030_v49  ;;  %v1170_v30 = vmul.f32 %v3578_v17, %v5030_v49  ;;  %v1171_v6 = vmul.f32 %v3579_v55, %v5030_v49  ;;  %v1172_v18 = vmul.f32 %v3580_v26, %v5030_v49 }
 0x24b   :  { %v3239_v47 = vround.rtne.f32 %v1165_v1  ;;  %v3240_v56 = vround.rtne.f32 %v1166_v15  ;;  %v3241_v28 = vround.rtne.f32 %v1167_v8  ;;  %v3242_v25 = vround.rtne.f32 %v1168_v22 }
 0x24c   :  { %v3243_v40 = vround.rtne.f32 %v1169_v50  ;;  %v3244_v34 = vround.rtne.f32 %v1170_v30  ;;  %v3245_v11 = vround.rtne.f32 %v1171_v6  ;;  %v3246_v39 = vround.rtne.f32 %v1172_v18 }
 0x24d   :  { %v1677_v16 = vmax.f32 %v3239_v47, -128.0  ;;  %v1678_v41 = vmax.f32 %v3240_v56, -128.0  ;;  %v1679_v61 = vmax.f32 %v3241_v28, -128.0  ;;  %v1680_v24 = vmax.f32 %v3242_v25, -128.0 }
 0x24e   :  { %v1681_v57 = vmax.f32 %v3243_v40, -128.0  ;;  %v1682_v36 = vmax.f32 %v3244_v34, -128.0  ;;  %v1683_v54 = vmax.f32 %v3245_v11, -128.0  ;;  %v1684_v19 = vmax.f32 %v3246_v39, -128.0 }
 0x24f   :  { %v1933_v46 = vmin.f32 %v1677_v16, 127.0  ;;  %v1934_v20 = vmin.f32 %v1678_v41, 127.0  ;;  %v1935_v23 = vmin.f32 %v1679_v61, 127.0  ;;  %v1936_v49 = vmin.f32 %v1680_v24, 127.0 }
 0x250   :  { %v1937_v1 = vmin.f32 %v1681_v57, 127.0  ;;  %v1938_v15 = vmin.f32 %v1682_v36, 127.0  ;;  %v1939_v8 = vmin.f32 %v1683_v54, 127.0  ;;  %v1940_v22 = vmin.f32 %v1684_v19, 127.0 }
 0x251   :  { %v2189_v4 = vtrunc.f32 %v1933_v46  ;;  %v2190_v50 = vtrunc.f32 %v1934_v20  ;;  %v2191_v17 = vtrunc.f32 %v1935_v23  ;;  %v2192_v30 = vtrunc.f32 %v1936_v49 }
 0x252   :  { %v2193_v55 = vtrunc.f32 %v1937_v1  ;;  %v2194_v6 = vtrunc.f32 %v1938_v15  ;;  %v2195_v26 = vtrunc.f32 %v1939_v8  ;;  %v2196_v18 = vtrunc.f32 %v1940_v22 }
 0x253   :  { %v2769_v47 = vpack.c.f32.eXmY %v2189_v4, %v2197_v3, 312  ;;  %v2779_v56 = vpack.c.f32.eXmY %v2190_v50, %v2198_v37, 312 }
 0x254   :  { %v2789_v28 = vpack.c.f32.eXmY %v2191_v17, %v5040_v62, 312  ;;  %v2799_v25 = vpack.c.f32.eXmY %v2192_v30, %v5042_v48, 312 }
 0x255   :  { %v2773_v40 = vpack.c.b8 %v2769_v47, %v2765_v58  ;;  %v2783_v34 = vpack.c.b8 %v2779_v56, %v2775_v42  ;;  %v2809_v11 = vpack.c.f32.eXmY %v2193_v55, %v5044_v35, 312  ;;  %v2819_v39 = vpack.c.f32.eXmY %v2194_v6, %v5046_v10, 312 }
 0x256   :  { %v2793_v3 = vpack.c.b8 %v2789_v28, %v2785_v27  ;;  %v2803_v37 = vpack.c.b8 %v2799_v25, %v2795_v13  ;;  %v2829_v14 = vpack.c.f32.eXmY %v2195_v26, %v5048_v7, 312  ;;  %v2839_v53 = vpack.c.f32.eXmY %v2196_v18, %v5050_v29, 312 }
 0x257   :  { %v2813_v32 = vpack.c.b8 %v2809_v11, %v2805_v21  ;;  %v2823_v38 = vpack.c.b8 %v2819_v39, %v2815_v43  ;;  %2901 = vst [vmem:[#allocation6 + $0x1c0] sm:$0xff] %v2773_v40  ;;  %2902 = vst [vmem:[#allocation6 + $0x1c8] sm:$0xff] %v2783_v34 }
 0x258   :  { %v2833_v45 = vpack.c.b8 %v2829_v14, %v2825_v52  ;;  %v2843_v31 = vpack.c.b8 %v2839_v53, %v2835_v5  ;;  %2903 = vst [vmem:[#allocation6 + $0x1d0] sm:$0xff] %v2793_v3  ;;  %2904 = vst [vmem:[#allocation6 + $0x1d8] sm:$0xff] %v2803_v37 }
 0x259   :  { %2905 = vst [vmem:[#allocation6 + $0x1e0] sm:$0xff] %v2813_v32  ;;  %2906 = vst [vmem:[#allocation6 + $0x1e8] sm:$0xff] %v2823_v38 }
 0x25a   :  { %2907 = vst [vmem:[#allocation6 + $0x1f0] sm:$0xff] %v2833_v45  ;;  %2908 = vst [vmem:[#allocation6 + $0x1f8] sm:$0xff] %v2843_v31 }
 0x25b   :  { %3614 = shalt.err (!%p3611_p12)
}
 0x25c   :  { %s3615_s14 = scalar_lea.hbm %s5107_s2, 8192 }
 0x25d   :  { %p3616_p13 = scmp.ne.s32.totalorder %s5107_s2, %s3615_s14  ;;  %p3619_p0 = scmp.lt.u32.totalorder %s3615_s14, %s5107_s2 }
 0x25f   :  { %p3621_p1 = pnand %p3619_p0, %p3616_p13 }
 0x261   :  { %3624 = shalt.err (!%p3621_p1)
}
 0x262   :  { %2989 = dma.vmem_to_hbm [thread:$0]  %s2984_s10, 8192, %s5107_s2, [#allocation5], %s3790_s22, %s3790_s22, %s3791_s23  }
 0x263   :  { %3627 = dma.done.wait [#allocation5], 8192  }
 0x264   :  { %3628 = vsyncadd [#allocation5], 4294959104 }
 0x265   :  { %2997 = vsyncpa [#allocation4], 1 }
 0x266   :  { %2998 = vsyncpa [#allocation5], 1 }

</bundles_post_ra>
